<compile_context>
chip_gen: v6e
topology: v6e:2x2x1
jax: 0.10.0
libtpu: 0.0.40
codegen_flags: <defaults>
</compile_context>

<pallas_src>
import jax
import jax.numpy as jnp
from jax.experimental import pallas as pl
from jax.experimental.pallas import tpu as pltpu


# ---------------------------------------------------------------------------
# Kernel
# ---------------------------------------------------------------------------
def _decoder_decode_kernel(x_ref,       # (Tc, Hp)   bf16 embedding rows of this chunk
                           h0_ref,      # (1, Hp)    f32 initial hidden state
                           wih_ref,     # (Hp, 3Hp)  bf16 W_ih^T (VMEM-resident)
                           whh_ref,     # (Hp, 3Hp)  bf16 W_hh^T (VMEM-resident)
                           bih_ref,     # (1, 3Hp)   f32
                           bhh_ref,     # (1, 3Hp)   f32
                           wout_ref,    # (Hp, TV)   bf16 W_out^T vocab tile
                           bout_ref,    # (1, TV)    f32 (padded cols = -1e30)
                           logp_ref,    # out: (Tc, Vp) log-probs (resident across j)
                           hseq_ref,    # out: (Tc, Hp) hidden states (resident across j)
                           h_carry):    # scratch: (1, Hp) f32 carried hidden state
    c = pl.program_id(0)
    j = pl.program_id(1)
    Hp = h_carry.shape[-1]
    Tc = x_ref.shape[0]
    TV = wout_ref.shape[-1]

    # Load the caller-provided initial hidden state once.
    @pl.when(jnp.logical_and(c == 0, j == 0))
    def _():
        h_carry[...] = h0_ref[...]

    # --- GRU over the Tc tokens of this chunk (once per chunk) ---------------
    @pl.when(j == 0)
    def _():
        # Batched input-gate GEMM for the whole chunk (off the serial path),
        # native bf16 operands on the MXU, f32 accumulation.
        x = jnp.maximum(x_ref[...], 0)                                 # ReLU, bf16
        gi = jnp.dot(x, wih_ref[...],
                     preferred_element_type=jnp.float32) + bih_ref[...]  # (Tc, 3Hp) f32

        h = h_carry[...]                                               # (1, Hp) f32
        for i in range(Tc):                                            # static unroll (Tc small)
            gh = jnp.dot(h.astype(jnp.bfloat16), whh_ref[...],
                         preferred_element_type=jnp.float32) + bhh_ref[...]  # (1, 3Hp)
            gi_i = gi[i:i + 1, :]
            # PyTorch GRU gate order: r, z, n
            r = jax.nn.sigmoid(gi_i[:, 0:Hp] + gh[:, 0:Hp])
            z = jax.nn.sigmoid(gi_i[:, Hp:2 * Hp] + gh[:, Hp:2 * Hp])
            n = jnp.tanh(gi_i[:, 2 * Hp:3 * Hp] + r * gh[:, 2 * Hp:3 * Hp])
            h = (1.0 - z) * n + z * h                                  # (1, Hp) f32
            hseq_ref[i:i + 1, :] = h       # static-offset VMEM row store
        h_carry[...] = h                   # carry to next chunk (stays f32)

    # --- output projection for this vocab tile (bf16 MXU, f32 acc) ----------
    h_chunk = hseq_ref[...]                                            # (Tc, Hp) f32
    logits = jnp.dot(h_chunk.astype(jnp.bfloat16), wout_ref[...],
                     preferred_element_type=jnp.float32) + bout_ref[...]  # (Tc, TV)
    if TV == logp_ref.shape[-1]:           # NV == 1: single full-width store
        logp_ref[...] = logits
    else:                                  # NV > 1: lane-aligned tile store
        col = pl.multiple_of(j * TV, 128)
        logp_ref[:, pl.ds(col, TV)] = logits

    # --- log-softmax finalize, in place, on the last vocab tile --------------
    @pl.when(j == pl.num_programs(1) - 1)
    def _():
        allv = logp_ref[...]                                           # (Tc, Vp) f32
        m = jnp.max(allv, axis=-1, keepdims=True)
        lse = m + jnp.log(jnp.sum(jnp.exp(allv - m), axis=-1, keepdims=True))
        logp_ref[...] = allv - lse


# ---------------------------------------------------------------------------
# Sizing helpers (generation aware: v7x 64 MiB VMEM vs 128 MiB on v5e/v6e)
# ---------------------------------------------------------------------------
def _round_up(x, m):
    return ((x + m - 1) // m) * m


def _vmem_capacity_bytes():
    try:
        return int(pltpu.get_tpu_info().vmem_capacity_bytes)
    except Exception:
        return 64 << 20          # conservative (v7x per-TensorCore)


def _vmem_limit_bytes(Hp, Vp, TV, Tc):
    bf, f32 = 2, 4
    est = (2 * (2 * Hp * 3 * Hp * bf + 2 * 3 * Hp * f32 + Hp * f32)  # GRU weights/biases/h0
           + 2 * (Hp * TV * bf + TV * f32)                           # W_out/b_out tile
           + 2 * Tc * Hp * bf                                        # embedding chunk
           + 2 * (Tc * Vp * f32 + Tc * Hp * f32)                     # output blocks
           + Hp * f32)                                               # hidden-carry scratch
    cap = _vmem_capacity_bytes() * 3 // 4                            # never exceed physical VMEM
    return int(min(max(est + (8 << 20), 32 << 20), cap))


# ---------------------------------------------------------------------------
# Parameter preparation (pad to lane-dense shapes, cast weights to bf16)
# ---------------------------------------------------------------------------
def prepare_decoder_params(params, tv_max=None):
    """Pad/transpose/cast raw parameters into the kernel layout (do once)."""
    H = params["hidden_size"]
    V = params["output_size"]
    Hp = _round_up(H, 128)

    if tv_max is None:
        # Size the vocab tile from the device's VMEM: resident GRU weights plus a
        # double-buffered W_out tile must stay well inside capacity (v7x: 64 MiB).
        budget = _vmem_capacity_bytes() // 2
        gru_resident = 2 * Hp * 3 * Hp * 2 + 4 * 3 * Hp * 4
        avail = max(budget - gru_resident - (4 << 20), 2 << 20)
        tv_max = max(512, min(32768, (avail // (4 * Hp)) // 128 * 128))

    vp0 = _round_up(V, 128)
    if vp0 <= tv_max:
        TV, NV = vp0, 1
    else:
        TV = int(tv_max)
        NV = -(-vp0 // TV)
    Vp = NV * TV

    f32, bf16 = jnp.float32, jnp.bfloat16

    # Embedding table: (V, Hp) bf16 so gathered rows feed the MXU directly.
    emb = jnp.zeros((V, Hp), f32).at[:, :H].set(params["embedding"]).astype(bf16)

    def pad_gru_w(w):  # (3H, H) -> (Hp, 3Hp), transposed, gate blocks of width Hp
        w3 = w.reshape(3, H, H)                               # (gate, out, in)
        w3 = jnp.pad(w3, ((0, 0), (0, Hp - H), (0, Hp - H)))
        return jnp.transpose(w3, (2, 0, 1)).reshape(Hp, 3 * Hp)

    def pad_gru_b(b):  # (3H,) -> (1, 3Hp)
        return jnp.pad(b.reshape(3, H), ((0, 0), (0, Hp - H))).reshape(1, 3 * Hp)

    wih = pad_gru_w(params["w_ih"]).astype(bf16)
    whh = pad_gru_w(params["w_hh"]).astype(bf16)
    bih = pad_gru_b(params["b_ih"]).astype(f32)
    bhh = pad_gru_b(params["b_hh"]).astype(f32)

    wout = jnp.zeros((Hp, Vp), f32).at[:H, :V].set(params["w_out"].T).astype(bf16)
    # Padded vocab columns get a huge negative bias so they vanish in log_softmax.
    bout = jnp.full((1, Vp), -1e30, f32).at[0, :V].set(params["b_out"])

    return dict(H=H, V=V, Hp=Hp, Vp=Vp, TV=TV, NV=NV,
                emb=emb, wih=wih, whh=whh, bih=bih, bhh=bhh,
                wout=wout, bout=bout)


# ---------------------------------------------------------------------------
# Wrappers
# ---------------------------------------------------------------------------
def decoder_rnn_decode(tokens, hidden, prep):
    """Run T decoder forward steps (given token ids) in a single kernel launch.

    tokens : int32 (T,)     token id fed at each step
    hidden : f32 (1, 1, H)  initial GRU hidden state
    Returns (log_probs (T, V), hidden_seq (T, H)).
    """
    H, V = prep["H"], prep["V"]
    Hp, Vp, TV, NV = prep["Hp"], prep["Vp"], prep["TV"], prep["NV"]
    T = int(tokens.shape[0])
    Tc = min(16, _round_up(T, 8))        # tokens per grid step (>= 8 sublanes)
    Tp = _round_up(T, Tc)

    # Gather the (bf16, padded) embedding rows for all tokens once, wrapper-side.
    tok = jnp.zeros((Tp,), jnp.int32).at[:T].set(tokens.astype(jnp.int32))
    x = jnp.take(prep["emb"], tok, axis=0)                       # (Tp, Hp) bf16
    h0 = jnp.zeros((1, Hp), jnp.float32).at[:, :H].set(hidden.reshape(1, H))

    def _call(single_buffer):
        def const_spec(shape):
            idx = lambda c, j, _shape=shape: (0,) * len(_shape)
            if single_buffer:
                return pl.BlockSpec(shape, idx, pipeline_mode=pl.Buffered(1))
            return pl.BlockSpec(shape, idx)

        if NV == 1 and single_buffer:    # W_out fully resident -> single buffer too
            wout_spec = const_spec((Hp, TV))
            bout_spec = const_spec((1, TV))
        else:
            wout_spec = pl.BlockSpec((Hp, TV), lambda c, j: (0, j))
            bout_spec = pl.BlockSpec((1, TV), lambda c, j: (0, j))

        grid_spec = pltpu.PrefetchScalarGridSpec(
            num_scalar_prefetch=0,
            grid=(Tp // Tc, NV),
            in_specs=[
                pl.BlockSpec((Tc, Hp), lambda c, j: (c, 0)),     # embedding rows
                const_spec((1, Hp)),                             # h0
                const_spec((Hp, 3 * Hp)),                        # W_ih^T
                const_spec((Hp, 3 * Hp)),                        # W_hh^T
                const_spec((1, 3 * Hp)),                         # b_ih
                const_spec((1, 3 * Hp)),                         # b_hh
                wout_spec,                                       # W_out^T tile
                bout_spec,                                       # b_out tile
            ],
            out_specs=[
                pl.BlockSpec((Tc, Vp), lambda c, j: (c, 0)),     # log-probs (resident in j)
                pl.BlockSpec((Tc, Hp), lambda c, j: (c, 0)),     # hidden states
            ],
            scratch_shapes=[pltpu.VMEM((1, Hp), jnp.float32)],   # carried hidden state
        )
        out = pl.pallas_call(
            _decoder_decode_kernel,
            grid_spec=grid_spec,
            out_shape=(jax.ShapeDtypeStruct((Tp, Vp), jnp.float32),
                       jax.ShapeDtypeStruct((Tp, Hp), jnp.float32)),
            compiler_params=pltpu.CompilerParams(
                dimension_semantics=("arbitrary", "arbitrary"),
                vmem_limit_bytes=_vmem_limit_bytes(Hp, Vp, TV, Tc)),
        )(x, h0, prep["wih"], prep["whh"], prep["bih"], prep["bhh"],
          prep["wout"], prep["bout"])
        return jax.block_until_ready(out)

    try:
        logp_pad, hseq_pad = _call(single_buffer=True)
    except Exception:
        # pl.Buffered(1) not supported by this JAX/Mosaic build -> default buffering.
        logp_pad, hseq_pad = _call(single_buffer=False)

    return logp_pad[:T, :V], hseq_pad[:T, :H]


def decoder_rnn_step(token, hidden, prep):
    """Single decoder step — exact DecoderRNN.forward semantics.

    token  : int32 (1,), hidden : f32 (1, 1, H)
    Returns (log_probs (1, V), hidden (1, 1, H)).
    """
    logp, hseq = decoder_rnn_decode(token.reshape(1), hidden, prep)
    return logp, hseq[-1].reshape(1, 1, prep["H"])


# ---------------------------------------------------------------------------
# Parameters + pure-JAX reference (mirrors the kernel's bf16-in / f32-acc math)
# ---------------------------------------------------------------------------
def init_params(key, hidden_size, output_size):
    ks = jax.random.split(key, 7)
    H, V = hidden_size, output_size
    s = 1.0 / jnp.sqrt(H)
    return {
        "hidden_size": H,
        "output_size": V,
        "embedding": jax.random.normal(ks[0], (V, H), jnp.float32),
        "w_ih": jax.random.uniform(ks[1], (3 * H, H), jnp.float32, -s, s),
        "w_hh": jax.random.uniform(ks[2], (3 * H, H), jnp.float32, -s, s),
        "b_ih": jax.random.uniform(ks[3], (3 * H,), jnp.float32, -s, s),
        "b_hh": jax.random.uniform(ks[4], (3 * H,), jnp.float32, -s, s),
        "w_out": jax.random.uniform(ks[5], (V, H), jnp.float32, -s, s),
        "b_out": jax.random.uniform(ks[6], (V,), jnp.float32, -s, s),
    }


def decoder_rnn_step_ref(token, hidden, params):
    """Pure-JAX reference with the kernel's numerics: bf16 weights and bf16 matmul
    operands, f32 accumulation / gate math / log-softmax."""
    H = params["hidden_size"]
    rd = lambda a: a.astype(jnp.bfloat16).astype(jnp.float32)
    emb = rd(params["embedding"])
    wih, whh, wout = rd(params["w_ih"]), rd(params["w_hh"]), rd(params["w_out"])

    x = jnp.maximum(emb[token[0]].reshape(1, H), 0.0)    # bf16-valued after relu
    h = hidden.reshape(1, H)
    gi = x @ wih.T + params["b_ih"]
    gh = rd(h) @ whh.T + params["b_hh"]
    r = jax.nn.sigmoid(gi[:, 0:H] + gh[:, 0:H])
    z = jax.nn.sigmoid(gi[:, H:2 * H] + gh[:, H:2 * H])
    n = jnp.tanh(gi[:, 2 * H:3 * H] + r * gh[:, 2 * H:3 * H])
    h_new = (1.0 - z) * n + z * h
    logits = rd(h_new) @ wout.T + params["b_out"]
    log_probs = jax.nn.log_softmax(logits, axis=1)
    return log_probs, h_new.reshape(1, 1, H)


# ---------------------------------------------------------------------------
# Test
# ---------------------------------------------------------------------------
if __name__ == "__main__":
    hidden_size = 32
    output_size = 16
    T = 6

    key = jax.random.PRNGKey(0)
    pkey, hkey, tkey = jax.random.split(key, 3)
    params = init_params(pkey, hidden_size, output_size)
    prep = prepare_decoder_params(params)

    tokens = jax.random.randint(tkey, (T,), 0, output_size, dtype=jnp.int32)
    hidden0 = jax.random.normal(hkey, (1, 1, hidden_size), jnp.float32)

    # --- single step (the module's forward exactly) ---
    lp1, h1 = decoder_rnn_step(tokens[:1], hidden0, prep)
    jax.block_until_ready((lp1, h1))
    ref_lp1, ref_h1 = decoder_rnn_step_ref(tokens[:1], hidden0, params)
    assert lp1.shape == (1, output_size) and h1.shape == (1, 1, hidden_size)
    assert jnp.allclose(lp1, ref_lp1, atol=2e-4, rtol=2e-4)
    assert jnp.allclose(h1, ref_h1, atol=2e-4, rtol=2e-4)

    # --- T forward steps fused into one kernel launch ---
    lps, h_seq = decoder_rnn_decode(tokens, hidden0, prep)
    jax.block_until_ready((lps, h_seq))
    h = hidden0
    for t in range(T):
        ref_lp, h = decoder_rnn_step_ref(tokens[t:t + 1], h, params)
        assert jnp.allclose(lps[t:t + 1], ref_lp, atol=2e-4, rtol=2e-4), t
        assert jnp.allclose(h_seq[t], h.reshape(hidden_size), atol=2e-4, rtol=2e-4), t

    print("KERNEL_OK")
</pallas_src>

<mosaic_0001>
module attributes {stable_mosaic.version = 11 : i64} {
  func.func @_decoder_decode_kernel(%arg0: i32, %arg1: i32, %arg2: memref<8x128xbf16, #tpu.memory_space<vmem>>, %arg3: memref<1x128xf32, #tpu.memory_space<vmem>>, %arg4: memref<128x384xbf16, #tpu.memory_space<vmem>>, %arg5: memref<128x384xbf16, #tpu.memory_space<vmem>>, %arg6: memref<1x384xf32, #tpu.memory_space<vmem>>, %arg7: memref<1x384xf32, #tpu.memory_space<vmem>>, %arg8: memref<128x128xbf16, #tpu.memory_space<vmem>>, %arg9: memref<1x128xf32, #tpu.memory_space<vmem>>, %arg10: memref<8x128xf32, #tpu.memory_space<vmem>>, %arg11: memref<8x128xf32, #tpu.memory_space<vmem>>, %arg12: memref<1x128xf32, #tpu.memory_space<vmem>>) attributes {dimension_semantics = [#tpu.dimension_semantics<arbitrary>, #tpu.dimension_semantics<arbitrary>], iteration_bounds = array<i64: 1, 1>, scalar_prefetch = 0 : i64, scratch_operands = 1 : i64, tpu.core_type = #tpu.core_type<tc>, window_params = [{transform_indices = @transform_0, window_bounds = array<i64: 8, 128>}, {pipeline_mode = #tpu.pipeline_mode<synchronous>, transform_indices = @transform_1, window_bounds = array<i64: 1, 128>}, {pipeline_mode = #tpu.pipeline_mode<synchronous>, transform_indices = @transform_2, window_bounds = array<i64: 128, 384>}, {pipeline_mode = #tpu.pipeline_mode<synchronous>, transform_indices = @transform_3, window_bounds = array<i64: 128, 384>}, {pipeline_mode = #tpu.pipeline_mode<synchronous>, transform_indices = @transform_4, window_bounds = array<i64: 1, 384>}, {pipeline_mode = #tpu.pipeline_mode<synchronous>, transform_indices = @transform_5, window_bounds = array<i64: 1, 384>}, {pipeline_mode = #tpu.pipeline_mode<synchronous>, transform_indices = @transform_6, window_bounds = array<i64: 128, 128>}, {pipeline_mode = #tpu.pipeline_mode<synchronous>, transform_indices = @transform_7, window_bounds = array<i64: 1, 128>}, {transform_indices = @transform_8, window_bounds = array<i64: 8, 128>}, {transform_indices = @transform_9, window_bounds = array<i64: 8, 128>}]} {
    %c0_i32 = arith.constant 0 : i32
    %0 = arith.cmpi eq, %arg0, %c0_i32 : i32
    %c0_i32_0 = arith.constant 0 : i32
    %1 = arith.cmpi eq, %arg1, %c0_i32_0 : i32
    %2 = arith.andi %0, %1 : i1
    %3 = arith.extui %2 : i1 to i32
    %c0_i32_1 = arith.constant 0 : i32
    %4 = arith.cmpi ne, %3, %c0_i32_1 : i32
    scf.if %4 {
      %c0_13 = arith.constant 0 : index
      %c0_14 = arith.constant 0 : index
      %19 = vector.load %arg3[%c0_13, %c0_14] : memref<1x128xf32, #tpu.memory_space<vmem>>, vector<1x128xf32>
      %c0_15 = arith.constant 0 : index
      %c0_16 = arith.constant 0 : index
      %20 = vector.load %arg12[%c0_15, %c0_16] : memref<1x128xf32, #tpu.memory_space<vmem>>, vector<1x128xf32>
      tpu.vector_store %arg12[%c0_15, %c0_16], %19 {strides = array<i32>} : memref<1x128xf32, #tpu.memory_space<vmem>>, vector<1x128xf32>,
    } else {
    }
    %c0_i32_2 = arith.constant 0 : i32
    %5 = arith.cmpi eq, %arg1, %c0_i32_2 : i32
    %6 = arith.extui %5 : i1 to i32
    %c0_i32_3 = arith.constant 0 : i32
    %7 = arith.cmpi ne, %6, %c0_i32_3 : i32
    scf.if %7 {
      %c0_13 = arith.constant 0 : index
      %c0_14 = arith.constant 0 : index
      %19 = vector.load %arg2[%c0_13, %c0_14] : memref<8x128xbf16, #tpu.memory_space<vmem>>, vector<8x128xbf16>
      %cst_15 = arith.constant 0.000000e+00 : bf16
      %20 = vector.broadcast %cst_15 : bf16 to vector<8x128xbf16>
      %21 = arith.maximumf %19, %20 : vector<8x128xbf16>
      %c0_16 = arith.constant 0 : index
      %c0_17 = arith.constant 0 : index
      %22 = vector.load %arg4[%c0_16, %c0_17] : memref<128x384xbf16, #tpu.memory_space<vmem>>, vector<128x384xbf16>
      %cst_18 = arith.constant dense<0.000000e+00> : vector<8x384xf32>
      %23 = tpu.matmul %21, %22, %cst_18 {dimension_numbers = #tpu.dot_dimension_numbers<[1], [0], [0], [1], [0, 0, 1, 1], [], []>} : vector<8x128xbf16>, vector<128x384xbf16>, vector<8x384xf32> -> vector<8x384xf32>
      %c0_19 = arith.constant 0 : index
      %c0_20 = arith.constant 0 : index
      %24 = vector.load %arg6[%c0_19, %c0_20] : memref<1x384xf32, #tpu.memory_space<vmem>>, vector<1x384xf32>
      %25 = vector.broadcast %24 : vector<1x384xf32> to vector<8x384xf32>
      %26 = arith.addf %23, %25 : vector<8x384xf32>
      %c0_21 = arith.constant 0 : index
      %c0_22 = arith.constant 0 : index
      %27 = vector.load %arg12[%c0_21, %c0_22] : memref<1x128xf32, #tpu.memory_space<vmem>>, vector<1x128xf32>
      %28 = arith.truncf %27 : vector<1x128xf32> to vector<1x128xbf16>
      %c0_23 = arith.constant 0 : index
      %c0_24 = arith.constant 0 : index
      %29 = vector.load %arg5[%c0_23, %c0_24] : memref<128x384xbf16, #tpu.memory_space<vmem>>, vector<128x384xbf16>
      %cst_25 = arith.constant dense<0.000000e+00> : vector<1x384xf32>
      %30 = tpu.matmul %28, %29, %cst_25 {dimension_numbers = #tpu.dot_dimension_numbers<[1], [0], [0], [1], [0, 0, 1, 1], [], []>} : vector<1x128xbf16>, vector<128x384xbf16>, vector<1x384xf32> -> vector<1x384xf32>
      %c0_26 = arith.constant 0 : index
      %c0_27 = arith.constant 0 : index
      %31 = vector.load %arg7[%c0_26, %c0_27] : memref<1x384xf32, #tpu.memory_space<vmem>>, vector<1x384xf32>
      %32 = arith.addf %30, %31 : vector<1x384xf32>
      %33 = vector.extract_strided_slice %26 {offsets = [0, 0], sizes = [1, 384], strides = [1, 1]} : vector<8x384xf32> to vector<1x384xf32>
      %34 = vector.extract_strided_slice %33 {offsets = [0, 0], sizes = [1, 128], strides = [1, 1]} : vector<1x384xf32> to vector<1x128xf32>
      %35 = vector.extract_strided_slice %32 {offsets = [0, 0], sizes = [1, 128], strides = [1, 1]} : vector<1x384xf32> to vector<1x128xf32>
      %36 = arith.addf %34, %35 : vector<1x128xf32>
      %37 = arith.negf %36 : vector<1x128xf32>
      %38 = math.exp %37 : vector<1x128xf32>
      %cst_28 = arith.constant 1.000000e+00 : f32
      %39 = vector.broadcast %cst_28 : f32 to vector<1x128xf32>
      %40 = arith.addf %39, %38 : vector<1x128xf32>
      %41 = arith.divf %39, %40 : vector<1x128xf32>
      %42 = vector.extract_strided_slice %33 {offsets = [0, 128], sizes = [1, 128], strides = [1, 1]} : vector<1x384xf32> to vector<1x128xf32>
      %43 = vector.extract_strided_slice %32 {offsets = [0, 128], sizes = [1, 128], strides = [1, 1]} : vector<1x384xf32> to vector<1x128xf32>
      %44 = arith.addf %42, %43 : vector<1x128xf32>
      %45 = arith.negf %44 : vector<1x128xf32>
      %46 = math.exp %45 : vector<1x128xf32>
      %cst_29 = arith.constant 1.000000e+00 : f32
      %47 = vector.broadcast %cst_29 : f32 to vector<1x128xf32>
      %48 = arith.addf %47, %46 : vector<1x128xf32>
      %49 = arith.divf %47, %48 : vector<1x128xf32>
      %50 = vector.extract_strided_slice %33 {offsets = [0, 256], sizes = [1, 128], strides = [1, 1]} : vector<1x384xf32> to vector<1x128xf32>
      %51 = vector.extract_strided_slice %32 {offsets = [0, 256], sizes = [1, 128], strides = [1, 1]} : vector<1x384xf32> to vector<1x128xf32>
      %52 = arith.mulf %41, %51 : vector<1x128xf32>
      %53 = arith.addf %50, %52 : vector<1x128xf32>
      %54 = math.tanh %53 : vector<1x128xf32>
      %cst_30 = arith.constant 1.000000e+00 : f32
      %55 = vector.broadcast %cst_30 : f32 to vector<1x128xf32>
      %56 = arith.subf %55, %49 : vector<1x128xf32>
      %57 = arith.mulf %56, %54 : vector<1x128xf32>
      %58 = arith.mulf %49, %27 : vector<1x128xf32>
      %59 = arith.addf %57, %58 : vector<1x128xf32>
      %c0_31 = arith.constant 0 : index
      %c0_32 = arith.constant 0 : index
      %60 = vector.load %arg11[%c0_31, %c0_32] : memref<8x128xf32, #tpu.memory_space<vmem>>, vector<1x128xf32>
      tpu.vector_store %arg11[%c0_31, %c0_32], %59 {strides = array<i32>} : memref<8x128xf32, #tpu.memory_space<vmem>>, vector<1x128xf32>,
      %61 = arith.truncf %59 : vector<1x128xf32> to vector<1x128xbf16>
      %c0_33 = arith.constant 0 : index
      %c0_34 = arith.constant 0 : index
      %62 = vector.load %arg5[%c0_33, %c0_34] : memref<128x384xbf16, #tpu.memory_space<vmem>>, vector<128x384xbf16>
      %cst_35 = arith.constant dense<0.000000e+00> : vector<1x384xf32>
      %63 = tpu.matmul %61, %62, %cst_35 {dimension_numbers = #tpu.dot_dimension_numbers<[1], [0], [0], [1], [0, 0, 1, 1], [], []>} : vector<1x128xbf16>, vector<128x384xbf16>, vector<1x384xf32> -> vector<1x384xf32>
      %c0_36 = arith.constant 0 : index
      %c0_37 = arith.constant 0 : index
      %64 = vector.load %arg7[%c0_36, %c0_37] : memref<1x384xf32, #tpu.memory_space<vmem>>, vector<1x384xf32>
      %65 = arith.addf %63, %64 : vector<1x384xf32>
      %66 = vector.extract_strided_slice %26 {offsets = [1, 0], sizes = [1, 384], strides = [1, 1]} : vector<8x384xf32> to vector<1x384xf32>
      %67 = vector.extract_strided_slice %66 {offsets = [0, 0], sizes = [1, 128], strides = [1, 1]} : vector<1x384xf32> to vector<1x128xf32>
      %68 = vector.extract_strided_slice %65 {offsets = [0, 0], sizes = [1, 128], strides = [1, 1]} : vector<1x384xf32> to vector<1x128xf32>
      %69 = arith.addf %67, %68 : vector<1x128xf32>
      %70 = arith.negf %69 : vector<1x128xf32>
      %71 = math.exp %70 : vector<1x128xf32>
      %cst_38 = arith.constant 1.000000e+00 : f32
      %72 = vector.broadcast %cst_38 : f32 to vector<1x128xf32>
      %73 = arith.addf %72, %71 : vector<1x128xf32>
      %74 = arith.divf %72, %73 : vector<1x128xf32>
      %75 = vector.extract_strided_slice %66 {offsets = [0, 128], sizes = [1, 128], strides = [1, 1]} : vector<1x384xf32> to vector<1x128xf32>
      %76 = vector.extract_strided_slice %65 {offsets = [0, 128], sizes = [1, 128], strides = [1, 1]} : vector<1x384xf32> to vector<1x128xf32>
      %77 = arith.addf %75, %76 : vector<1x128xf32>
      %78 = arith.negf %77 : vector<1x128xf32>
      %79 = math.exp %78 : vector<1x128xf32>
      %cst_39 = arith.constant 1.000000e+00 : f32
      %80 = vector.broadcast %cst_39 : f32 to vector<1x128xf32>
      %81 = arith.addf %80, %79 : vector<1x128xf32>
      %82 = arith.divf %80, %81 : vector<1x128xf32>
      %83 = vector.extract_strided_slice %66 {offsets = [0, 256], sizes = [1, 128], strides = [1, 1]} : vector<1x384xf32> to vector<1x128xf32>
      %84 = vector.extract_strided_slice %65 {offsets = [0, 256], sizes = [1, 128], strides = [1, 1]} : vector<1x384xf32> to vector<1x128xf32>
      %85 = arith.mulf %74, %84 : vector<1x128xf32>
      %86 = arith.addf %83, %85 : vector<1x128xf32>
      %87 = math.tanh %86 : vector<1x128xf32>
      %cst_40 = arith.constant 1.000000e+00 : f32
      %88 = vector.broadcast %cst_40 : f32 to vector<1x128xf32>
      %89 = arith.subf %88, %82 : vector<1x128xf32>
      %90 = arith.mulf %89, %87 : vector<1x128xf32>
      %91 = arith.mulf %82, %59 : vector<1x128xf32>
      %92 = arith.addf %90, %91 : vector<1x128xf32>
      %c1 = arith.constant 1 : index
      %c0_41 = arith.constant 0 : index
      %93 = vector.load %arg11[%c1, %c0_41] : memref<8x128xf32, #tpu.memory_space<vmem>>, vector<1x128xf32>
      tpu.vector_store %arg11[%c1, %c0_41], %92 {strides = array<i32>} : memref<8x128xf32, #tpu.memory_space<vmem>>, vector<1x128xf32>,
      %94 = arith.truncf %92 : vector<1x128xf32> to vector<1x128xbf16>
      %c0_42 = arith.constant 0 : index
      %c0_43 = arith.constant 0 : index
      %95 = vector.load %arg5[%c0_42, %c0_43] : memref<128x384xbf16, #tpu.memory_space<vmem>>, vector<128x384xbf16>
      %cst_44 = arith.constant dense<0.000000e+00> : vector<1x384xf32>
      %96 = tpu.matmul %94, %95, %cst_44 {dimension_numbers = #tpu.dot_dimension_numbers<[1], [0], [0], [1], [0, 0, 1, 1], [], []>} : vector<1x128xbf16>, vector<128x384xbf16>, vector<1x384xf32> -> vector<1x384xf32>
      %c0_45 = arith.constant 0 : index
      %c0_46 = arith.constant 0 : index
      %97 = vector.load %arg7[%c0_45, %c0_46] : memref<1x384xf32, #tpu.memory_space<vmem>>, vector<1x384xf32>
      %98 = arith.addf %96, %97 : vector<1x384xf32>
      %99 = vector.extract_strided_slice %26 {offsets = [2, 0], sizes = [1, 384], strides = [1, 1]} : vector<8x384xf32> to vector<1x384xf32>
      %100 = vector.extract_strided_slice %99 {offsets = [0, 0], sizes = [1, 128], strides = [1, 1]} : vector<1x384xf32> to vector<1x128xf32>
      %101 = vector.extract_strided_slice %98 {offsets = [0, 0], sizes = [1, 128], strides = [1, 1]} : vector<1x384xf32> to vector<1x128xf32>
      %102 = arith.addf %100, %101 : vector<1x128xf32>
      %103 = arith.negf %102 : vector<1x128xf32>
      %104 = math.exp %103 : vector<1x128xf32>
      %cst_47 = arith.constant 1.000000e+00 : f32
      %105 = vector.broadcast %cst_47 : f32 to vector<1x128xf32>
      %106 = arith.addf %105, %104 : vector<1x128xf32>
      %107 = arith.divf %105, %106 : vector<1x128xf32>
      %108 = vector.extract_strided_slice %99 {offsets = [0, 128], sizes = [1, 128], strides = [1, 1]} : vector<1x384xf32> to vector<1x128xf32>
      %109 = vector.extract_strided_slice %98 {offsets = [0, 128], sizes = [1, 128], strides = [1, 1]} : vector<1x384xf32> to vector<1x128xf32>
      %110 = arith.addf %108, %109 : vector<1x128xf32>
      %111 = arith.negf %110 : vector<1x128xf32>
      %112 = math.exp %111 : vector<1x128xf32>
      %cst_48 = arith.constant 1.000000e+00 : f32
      %113 = vector.broadcast %cst_48 : f32 to vector<1x128xf32>
      %114 = arith.addf %113, %112 : vector<1x128xf32>
      %115 = arith.divf %113, %114 : vector<1x128xf32>
      %116 = vector.extract_strided_slice %99 {offsets = [0, 256], sizes = [1, 128], strides = [1, 1]} : vector<1x384xf32> to vector<1x128xf32>
      %117 = vector.extract_strided_slice %98 {offsets = [0, 256], sizes = [1, 128], strides = [1, 1]} : vector<1x384xf32> to vector<1x128xf32>
      %118 = arith.mulf %107, %117 : vector<1x128xf32>
      %119 = arith.addf %116, %118 : vector<1x128xf32>
      %120 = math.tanh %119 : vector<1x128xf32>
      %cst_49 = arith.constant 1.000000e+00 : f32
      %121 = vector.broadcast %cst_49 : f32 to vector<1x128xf32>
      %122 = arith.subf %121, %115 : vector<1x128xf32>
      %123 = arith.mulf %122, %120 : vector<1x128xf32>
      %124 = arith.mulf %115, %92 : vector<1x128xf32>
      %125 = arith.addf %123, %124 : vector<1x128xf32>
      %c2 = arith.constant 2 : index
      %c0_50 = arith.constant 0 : index
      %126 = vector.load %arg11[%c2, %c0_50] : memref<8x128xf32, #tpu.memory_space<vmem>>, vector<1x128xf32>
      tpu.vector_store %arg11[%c2, %c0_50], %125 {strides = array<i32>} : memref<8x128xf32, #tpu.memory_space<vmem>>, vector<1x128xf32>,
      %127 = arith.truncf %125 : vector<1x128xf32> to vector<1x128xbf16>
      %c0_51 = arith.constant 0 : index
      %c0_52 = arith.constant 0 : index
      %128 = vector.load %arg5[%c0_51, %c0_52] : memref<128x384xbf16, #tpu.memory_space<vmem>>, vector<128x384xbf16>
      %cst_53 = arith.constant dense<0.000000e+00> : vector<1x384xf32>
      %129 = tpu.matmul %127, %128, %cst_53 {dimension_numbers = #tpu.dot_dimension_numbers<[1], [0], [0], [1], [0, 0, 1, 1], [], []>} : vector<1x128xbf16>, vector<128x384xbf16>, vector<1x384xf32> -> vector<1x384xf32>
      %c0_54 = arith.constant 0 : index
      %c0_55 = arith.constant 0 : index
      %130 = vector.load %arg7[%c0_54, %c0_55] : memref<1x384xf32, #tpu.memory_space<vmem>>, vector<1x384xf32>
      %131 = arith.addf %129, %130 : vector<1x384xf32>
      %132 = vector.extract_strided_slice %26 {offsets = [3, 0], sizes = [1, 384], strides = [1, 1]} : vector<8x384xf32> to vector<1x384xf32>
      %133 = vector.extract_strided_slice %132 {offsets = [0, 0], sizes = [1, 128], strides = [1, 1]} : vector<1x384xf32> to vector<1x128xf32>
      %134 = vector.extract_strided_slice %131 {offsets = [0, 0], sizes = [1, 128], strides = [1, 1]} : vector<1x384xf32> to vector<1x128xf32>
      %135 = arith.addf %133, %134 : vector<1x128xf32>
      %136 = arith.negf %135 : vector<1x128xf32>
      %137 = math.exp %136 : vector<1x128xf32>
      %cst_56 = arith.constant 1.000000e+00 : f32
      %138 = vector.broadcast %cst_56 : f32 to vector<1x128xf32>
      %139 = arith.addf %138, %137 : vector<1x128xf32>
      %140 = arith.divf %138, %139 : vector<1x128xf32>
      %141 = vector.extract_strided_slice %132 {offsets = [0, 128], sizes = [1, 128], strides = [1, 1]} : vector<1x384xf32> to vector<1x128xf32>
      %142 = vector.extract_strided_slice %131 {offsets = [0, 128], sizes = [1, 128], strides = [1, 1]} : vector<1x384xf32> to vector<1x128xf32>
      %143 = arith.addf %141, %142 : vector<1x128xf32>
      %144 = arith.negf %143 : vector<1x128xf32>
      %145 = math.exp %144 : vector<1x128xf32>
      %cst_57 = arith.constant 1.000000e+00 : f32
      %146 = vector.broadcast %cst_57 : f32 to vector<1x128xf32>
      %147 = arith.addf %146, %145 : vector<1x128xf32>
      %148 = arith.divf %146, %147 : vector<1x128xf32>
      %149 = vector.extract_strided_slice %132 {offsets = [0, 256], sizes = [1, 128], strides = [1, 1]} : vector<1x384xf32> to vector<1x128xf32>
      %150 = vector.extract_strided_slice %131 {offsets = [0, 256], sizes = [1, 128], strides = [1, 1]} : vector<1x384xf32> to vector<1x128xf32>
      %151 = arith.mulf %140, %150 : vector<1x128xf32>
      %152 = arith.addf %149, %151 : vector<1x128xf32>
      %153 = math.tanh %152 : vector<1x128xf32>
      %cst_58 = arith.constant 1.000000e+00 : f32
      %154 = vector.broadcast %cst_58 : f32 to vector<1x128xf32>
      %155 = arith.subf %154, %148 : vector<1x128xf32>
      %156 = arith.mulf %155, %153 : vector<1x128xf32>
      %157 = arith.mulf %148, %125 : vector<1x128xf32>
      %158 = arith.addf %156, %157 : vector<1x128xf32>
      %c3 = arith.constant 3 : index
      %c0_59 = arith.constant 0 : index
      %159 = vector.load %arg11[%c3, %c0_59] : memref<8x128xf32, #tpu.memory_space<vmem>>, vector<1x128xf32>
      tpu.vector_store %arg11[%c3, %c0_59], %158 {strides = array<i32>} : memref<8x128xf32, #tpu.memory_space<vmem>>, vector<1x128xf32>,
      %160 = arith.truncf %158 : vector<1x128xf32> to vector<1x128xbf16>
      %c0_60 = arith.constant 0 : index
      %c0_61 = arith.constant 0 : index
      %161 = vector.load %arg5[%c0_60, %c0_61] : memref<128x384xbf16, #tpu.memory_space<vmem>>, vector<128x384xbf16>
      %cst_62 = arith.constant dense<0.000000e+00> : vector<1x384xf32>
      %162 = tpu.matmul %160, %161, %cst_62 {dimension_numbers = #tpu.dot_dimension_numbers<[1], [0], [0], [1], [0, 0, 1, 1], [], []>} : vector<1x128xbf16>, vector<128x384xbf16>, vector<1x384xf32> -> vector<1x384xf32>
      %c0_63 = arith.constant 0 : index
      %c0_64 = arith.constant 0 : index
      %163 = vector.load %arg7[%c0_63, %c0_64] : memref<1x384xf32, #tpu.memory_space<vmem>>, vector<1x384xf32>
      %164 = arith.addf %162, %163 : vector<1x384xf32>
      %165 = vector.extract_strided_slice %26 {offsets = [4, 0], sizes = [1, 384], strides = [1, 1]} : vector<8x384xf32> to vector<1x384xf32>
      %166 = vector.extract_strided_slice %165 {offsets = [0, 0], sizes = [1, 128], strides = [1, 1]} : vector<1x384xf32> to vector<1x128xf32>
      %167 = vector.extract_strided_slice %164 {offsets = [0, 0], sizes = [1, 128], strides = [1, 1]} : vector<1x384xf32> to vector<1x128xf32>
      %168 = arith.addf %166, %167 : vector<1x128xf32>
      %169 = arith.negf %168 : vector<1x128xf32>
      %170 = math.exp %169 : vector<1x128xf32>
      %cst_65 = arith.constant 1.000000e+00 : f32
      %171 = vector.broadcast %cst_65 : f32 to vector<1x128xf32>
      %172 = arith.addf %171, %170 : vector<1x128xf32>
      %173 = arith.divf %171, %172 : vector<1x128xf32>
      %174 = vector.extract_strided_slice %165 {offsets = [0, 128], sizes = [1, 128], strides = [1, 1]} : vector<1x384xf32> to vector<1x128xf32>
      %175 = vector.extract_strided_slice %164 {offsets = [0, 128], sizes = [1, 128], strides = [1, 1]} : vector<1x384xf32> to vector<1x128xf32>
      %176 = arith.addf %174, %175 : vector<1x128xf32>
      %177 = arith.negf %176 : vector<1x128xf32>
      %178 = math.exp %177 : vector<1x128xf32>
      %cst_66 = arith.constant 1.000000e+00 : f32
      %179 = vector.broadcast %cst_66 : f32 to vector<1x128xf32>
      %180 = arith.addf %179, %178 : vector<1x128xf32>
      %181 = arith.divf %179, %180 : vector<1x128xf32>
      %182 = vector.extract_strided_slice %165 {offsets = [0, 256], sizes = [1, 128], strides = [1, 1]} : vector<1x384xf32> to vector<1x128xf32>
      %183 = vector.extract_strided_slice %164 {offsets = [0, 256], sizes = [1, 128], strides = [1, 1]} : vector<1x384xf32> to vector<1x128xf32>
      %184 = arith.mulf %173, %183 : vector<1x128xf32>
      %185 = arith.addf %182, %184 : vector<1x128xf32>
      %186 = math.tanh %185 : vector<1x128xf32>
      %cst_67 = arith.constant 1.000000e+00 : f32
      %187 = vector.broadcast %cst_67 : f32 to vector<1x128xf32>
      %188 = arith.subf %187, %181 : vector<1x128xf32>
      %189 = arith.mulf %188, %186 : vector<1x128xf32>
      %190 = arith.mulf %181, %158 : vector<1x128xf32>
      %191 = arith.addf %189, %190 : vector<1x128xf32>
      %c4 = arith.constant 4 : index
      %c0_68 = arith.constant 0 : index
      %192 = vector.load %arg11[%c4, %c0_68] : memref<8x128xf32, #tpu.memory_space<vmem>>, vector<1x128xf32>
      tpu.vector_store %arg11[%c4, %c0_68], %191 {strides = array<i32>} : memref<8x128xf32, #tpu.memory_space<vmem>>, vector<1x128xf32>,
      %193 = arith.truncf %191 : vector<1x128xf32> to vector<1x128xbf16>
      %c0_69 = arith.constant 0 : index
      %c0_70 = arith.constant 0 : index
      %194 = vector.load %arg5[%c0_69, %c0_70] : memref<128x384xbf16, #tpu.memory_space<vmem>>, vector<128x384xbf16>
      %cst_71 = arith.constant dense<0.000000e+00> : vector<1x384xf32>
      %195 = tpu.matmul %193, %194, %cst_71 {dimension_numbers = #tpu.dot_dimension_numbers<[1], [0], [0], [1], [0, 0, 1, 1], [], []>} : vector<1x128xbf16>, vector<128x384xbf16>, vector<1x384xf32> -> vector<1x384xf32>
      %c0_72 = arith.constant 0 : index
      %c0_73 = arith.constant 0 : index
      %196 = vector.load %arg7[%c0_72, %c0_73] : memref<1x384xf32, #tpu.memory_space<vmem>>, vector<1x384xf32>
      %197 = arith.addf %195, %196 : vector<1x384xf32>
      %198 = vector.extract_strided_slice %26 {offsets = [5, 0], sizes = [1, 384], strides = [1, 1]} : vector<8x384xf32> to vector<1x384xf32>
      %199 = vector.extract_strided_slice %198 {offsets = [0, 0], sizes = [1, 128], strides = [1, 1]} : vector<1x384xf32> to vector<1x128xf32>
      %200 = vector.extract_strided_slice %197 {offsets = [0, 0], sizes = [1, 128], strides = [1, 1]} : vector<1x384xf32> to vector<1x128xf32>
      %201 = arith.addf %199, %200 : vector<1x128xf32>
      %202 = arith.negf %201 : vector<1x128xf32>
      %203 = math.exp %202 : vector<1x128xf32>
      %cst_74 = arith.constant 1.000000e+00 : f32
      %204 = vector.broadcast %cst_74 : f32 to vector<1x128xf32>
      %205 = arith.addf %204, %203 : vector<1x128xf32>
      %206 = arith.divf %204, %205 : vector<1x128xf32>
      %207 = vector.extract_strided_slice %198 {offsets = [0, 128], sizes = [1, 128], strides = [1, 1]} : vector<1x384xf32> to vector<1x128xf32>
      %208 = vector.extract_strided_slice %197 {offsets = [0, 128], sizes = [1, 128], strides = [1, 1]} : vector<1x384xf32> to vector<1x128xf32>
      %209 = arith.addf %207, %208 : vector<1x128xf32>
      %210 = arith.negf %209 : vector<1x128xf32>
      %211 = math.exp %210 : vector<1x128xf32>
      %cst_75 = arith.constant 1.000000e+00 : f32
      %212 = vector.broadcast %cst_75 : f32 to vector<1x128xf32>
      %213 = arith.addf %212, %211 : vector<1x128xf32>
      %214 = arith.divf %212, %213 : vector<1x128xf32>
      %215 = vector.extract_strided_slice %198 {offsets = [0, 256], sizes = [1, 128], strides = [1, 1]} : vector<1x384xf32> to vector<1x128xf32>
      %216 = vector.extract_strided_slice %197 {offsets = [0, 256], sizes = [1, 128], strides = [1, 1]} : vector<1x384xf32> to vector<1x128xf32>
      %217 = arith.mulf %206, %216 : vector<1x128xf32>
      %218 = arith.addf %215, %217 : vector<1x128xf32>
      %219 = math.tanh %218 : vector<1x128xf32>
      %cst_76 = arith.constant 1.000000e+00 : f32
      %220 = vector.broadcast %cst_76 : f32 to vector<1x128xf32>
      %221 = arith.subf %220, %214 : vector<1x128xf32>
      %222 = arith.mulf %221, %219 : vector<1x128xf32>
      %223 = arith.mulf %214, %191 : vector<1x128xf32>
      %224 = arith.addf %222, %223 : vector<1x128xf32>
      %c5 = arith.constant 5 : index
      %c0_77 = arith.constant 0 : index
      %225 = vector.load %arg11[%c5, %c0_77] : memref<8x128xf32, #tpu.memory_space<vmem>>, vector<1x128xf32>
      tpu.vector_store %arg11[%c5, %c0_77], %224 {strides = array<i32>} : memref<8x128xf32, #tpu.memory_space<vmem>>, vector<1x128xf32>,
      %226 = arith.truncf %224 : vector<1x128xf32> to vector<1x128xbf16>
      %c0_78 = arith.constant 0 : index
      %c0_79 = arith.constant 0 : index
      %227 = vector.load %arg5[%c0_78, %c0_79] : memref<128x384xbf16, #tpu.memory_space<vmem>>, vector<128x384xbf16>
      %cst_80 = arith.constant dense<0.000000e+00> : vector<1x384xf32>
      %228 = tpu.matmul %226, %227, %cst_80 {dimension_numbers = #tpu.dot_dimension_numbers<[1], [0], [0], [1], [0, 0, 1, 1], [], []>} : vector<1x128xbf16>, vector<128x384xbf16>, vector<1x384xf32> -> vector<1x384xf32>
      %c0_81 = arith.constant 0 : index
      %c0_82 = arith.constant 0 : index
      %229 = vector.load %arg7[%c0_81, %c0_82] : memref<1x384xf32, #tpu.memory_space<vmem>>, vector<1x384xf32>
      %230 = arith.addf %228, %229 : vector<1x384xf32>
      %231 = vector.extract_strided_slice %26 {offsets = [6, 0], sizes = [1, 384], strides = [1, 1]} : vector<8x384xf32> to vector<1x384xf32>
      %232 = vector.extract_strided_slice %231 {offsets = [0, 0], sizes = [1, 128], strides = [1, 1]} : vector<1x384xf32> to vector<1x128xf32>
      %233 = vector.extract_strided_slice %230 {offsets = [0, 0], sizes = [1, 128], strides = [1, 1]} : vector<1x384xf32> to vector<1x128xf32>
      %234 = arith.addf %232, %233 : vector<1x128xf32>
      %235 = arith.negf %234 : vector<1x128xf32>
      %236 = math.exp %235 : vector<1x128xf32>
      %cst_83 = arith.constant 1.000000e+00 : f32
      %237 = vector.broadcast %cst_83 : f32 to vector<1x128xf32>
      %238 = arith.addf %237, %236 : vector<1x128xf32>
      %239 = arith.divf %237, %238 : vector<1x128xf32>
      %240 = vector.extract_strided_slice %231 {offsets = [0, 128], sizes = [1, 128], strides = [1, 1]} : vector<1x384xf32> to vector<1x128xf32>
      %241 = vector.extract_strided_slice %230 {offsets = [0, 128], sizes = [1, 128], strides = [1, 1]} : vector<1x384xf32> to vector<1x128xf32>
      %242 = arith.addf %240, %241 : vector<1x128xf32>
      %243 = arith.negf %242 : vector<1x128xf32>
      %244 = math.exp %243 : vector<1x128xf32>
      %cst_84 = arith.constant 1.000000e+00 : f32
      %245 = vector.broadcast %cst_84 : f32 to vector<1x128xf32>
      %246 = arith.addf %245, %244 : vector<1x128xf32>
      %247 = arith.divf %245, %246 : vector<1x128xf32>
      %248 = vector.extract_strided_slice %231 {offsets = [0, 256], sizes = [1, 128], strides = [1, 1]} : vector<1x384xf32> to vector<1x128xf32>
      %249 = vector.extract_strided_slice %230 {offsets = [0, 256], sizes = [1, 128], strides = [1, 1]} : vector<1x384xf32> to vector<1x128xf32>
      %250 = arith.mulf %239, %249 : vector<1x128xf32>
      %251 = arith.addf %248, %250 : vector<1x128xf32>
      %252 = math.tanh %251 : vector<1x128xf32>
      %cst_85 = arith.constant 1.000000e+00 : f32
      %253 = vector.broadcast %cst_85 : f32 to vector<1x128xf32>
      %254 = arith.subf %253, %247 : vector<1x128xf32>
      %255 = arith.mulf %254, %252 : vector<1x128xf32>
      %256 = arith.mulf %247, %224 : vector<1x128xf32>
      %257 = arith.addf %255, %256 : vector<1x128xf32>
      %c6 = arith.constant 6 : index
      %c0_86 = arith.constant 0 : index
      %258 = vector.load %arg11[%c6, %c0_86] : memref<8x128xf32, #tpu.memory_space<vmem>>, vector<1x128xf32>
      tpu.vector_store %arg11[%c6, %c0_86], %257 {strides = array<i32>} : memref<8x128xf32, #tpu.memory_space<vmem>>, vector<1x128xf32>,
      %259 = arith.truncf %257 : vector<1x128xf32> to vector<1x128xbf16>
      %c0_87 = arith.constant 0 : index
      %c0_88 = arith.constant 0 : index
      %260 = vector.load %arg5[%c0_87, %c0_88] : memref<128x384xbf16, #tpu.memory_space<vmem>>, vector<128x384xbf16>
      %cst_89 = arith.constant dense<0.000000e+00> : vector<1x384xf32>
      %261 = tpu.matmul %259, %260, %cst_89 {dimension_numbers = #tpu.dot_dimension_numbers<[1], [0], [0], [1], [0, 0, 1, 1], [], []>} : vector<1x128xbf16>, vector<128x384xbf16>, vector<1x384xf32> -> vector<1x384xf32>
      %c0_90 = arith.constant 0 : index
      %c0_91 = arith.constant 0 : index
      %262 = vector.load %arg7[%c0_90, %c0_91] : memref<1x384xf32, #tpu.memory_space<vmem>>, vector<1x384xf32>
      %263 = arith.addf %261, %262 : vector<1x384xf32>
      %264 = vector.extract_strided_slice %26 {offsets = [7, 0], sizes = [1, 384], strides = [1, 1]} : vector<8x384xf32> to vector<1x384xf32>
      %265 = vector.extract_strided_slice %264 {offsets = [0, 0], sizes = [1, 128], strides = [1, 1]} : vector<1x384xf32> to vector<1x128xf32>
      %266 = vector.extract_strided_slice %263 {offsets = [0, 0], sizes = [1, 128], strides = [1, 1]} : vector<1x384xf32> to vector<1x128xf32>
      %267 = arith.addf %265, %266 : vector<1x128xf32>
      %268 = arith.negf %267 : vector<1x128xf32>
      %269 = math.exp %268 : vector<1x128xf32>
      %cst_92 = arith.constant 1.000000e+00 : f32
      %270 = vector.broadcast %cst_92 : f32 to vector<1x128xf32>
      %271 = arith.addf %270, %269 : vector<1x128xf32>
      %272 = arith.divf %270, %271 : vector<1x128xf32>
      %273 = vector.extract_strided_slice %264 {offsets = [0, 128], sizes = [1, 128], strides = [1, 1]} : vector<1x384xf32> to vector<1x128xf32>
      %274 = vector.extract_strided_slice %263 {offsets = [0, 128], sizes = [1, 128], strides = [1, 1]} : vector<1x384xf32> to vector<1x128xf32>
      %275 = arith.addf %273, %274 : vector<1x128xf32>
      %276 = arith.negf %275 : vector<1x128xf32>
      %277 = math.exp %276 : vector<1x128xf32>
      %cst_93 = arith.constant 1.000000e+00 : f32
      %278 = vector.broadcast %cst_93 : f32 to vector<1x128xf32>
      %279 = arith.addf %278, %277 : vector<1x128xf32>
      %280 = arith.divf %278, %279 : vector<1x128xf32>
      %281 = vector.extract_strided_slice %264 {offsets = [0, 256], sizes = [1, 128], strides = [1, 1]} : vector<1x384xf32> to vector<1x128xf32>
      %282 = vector.extract_strided_slice %263 {offsets = [0, 256], sizes = [1, 128], strides = [1, 1]} : vector<1x384xf32> to vector<1x128xf32>
      %283 = arith.mulf %272, %282 : vector<1x128xf32>
      %284 = arith.addf %281, %283 : vector<1x128xf32>
      %285 = math.tanh %284 : vector<1x128xf32>
      %cst_94 = arith.constant 1.000000e+00 : f32
      %286 = vector.broadcast %cst_94 : f32 to vector<1x128xf32>
      %287 = arith.subf %286, %280 : vector<1x128xf32>
      %288 = arith.mulf %287, %285 : vector<1x128xf32>
      %289 = arith.mulf %280, %257 : vector<1x128xf32>
      %290 = arith.addf %288, %289 : vector<1x128xf32>
      %c7 = arith.constant 7 : index
      %c0_95 = arith.constant 0 : index
      %291 = vector.load %arg11[%c7, %c0_95] : memref<8x128xf32, #tpu.memory_space<vmem>>, vector<1x128xf32>
      tpu.vector_store %arg11[%c7, %c0_95], %290 {strides = array<i32>} : memref<8x128xf32, #tpu.memory_space<vmem>>, vector<1x128xf32>,
      %c0_96 = arith.constant 0 : index
      %c0_97 = arith.constant 0 : index
      %292 = vector.load %arg12[%c0_96, %c0_97] : memref<1x128xf32, #tpu.memory_space<vmem>>, vector<1x128xf32>
      tpu.vector_store %arg12[%c0_96, %c0_97], %290 {strides = array<i32>} : memref<1x128xf32, #tpu.memory_space<vmem>>, vector<1x128xf32>,
    } else {
    }
    %c0 = arith.constant 0 : index
    %c0_4 = arith.constant 0 : index
    %8 = vector.load %arg11[%c0, %c0_4] : memref<8x128xf32, #tpu.memory_space<vmem>>, vector<8x128xf32>
    %9 = arith.truncf %8 : vector<8x128xf32> to vector<8x128xbf16>
    %c0_5 = arith.constant 0 : index
    %c0_6 = arith.constant 0 : index
    %10 = vector.load %arg8[%c0_5, %c0_6] : memref<128x128xbf16, #tpu.memory_space<vmem>>, vector<128x128xbf16>
    %cst = arith.constant dense<0.000000e+00> : vector<8x128xf32>
    %11 = tpu.matmul %9, %10, %cst {dimension_numbers = #tpu.dot_dimension_numbers<[1], [0], [0], [1], [0, 0, 1, 1], [], []>} : vector<8x128xbf16>, vector<128x128xbf16>, vector<8x128xf32> -> vector<8x128xf32>
    %c0_7 = arith.constant 0 : index
    %c0_8 = arith.constant 0 : index
    %12 = vector.load %arg9[%c0_7, %c0_8] : memref<1x128xf32, #tpu.memory_space<vmem>>, vector<1x128xf32>
    %13 = vector.broadcast %12 : vector<1x128xf32> to vector<8x128xf32>
    %14 = arith.addf %11, %13 : vector<8x128xf32>
    %c0_9 = arith.constant 0 : index
    %c0_10 = arith.constant 0 : index
    %15 = vector.load %arg10[%c0_9, %c0_10] : memref<8x128xf32, #tpu.memory_space<vmem>>, vector<8x128xf32>
    tpu.vector_store %arg10[%c0_9, %c0_10], %14 {strides = array<i32>} : memref<8x128xf32, #tpu.memory_space<vmem>>, vector<8x128xf32>,
    %c0_i32_11 = arith.constant 0 : i32
    %16 = arith.cmpi eq, %arg1, %c0_i32_11 : i32
    %17 = arith.extui %16 : i1 to i32
    %c0_i32_12 = arith.constant 0 : i32
    %18 = arith.cmpi ne, %17, %c0_i32_12 : i32
    scf.if %18 {
      %c0_13 = arith.constant 0 : index
      %c0_14 = arith.constant 0 : index
      %19 = vector.load %arg10[%c0_13, %c0_14] : memref<8x128xf32, #tpu.memory_space<vmem>>, vector<8x128xf32>
      %cst_15 = arith.constant dense<0xFF800000> : vector<8xf32>
      %20 = vector.multi_reduction <maximumf>, %19, %cst_15 [1] : vector<8x128xf32> to vector<8xf32>
      %21 = vector.shape_cast %20 : vector<8xf32> to vector<8x1xf32>
      %22 = vector.broadcast %21 : vector<8x1xf32> to vector<8x128xf32>
      %23 = arith.subf %19, %22 : vector<8x128xf32>
      %24 = math.exp %23 : vector<8x128xf32>
      %cst_16 = arith.constant dense<0.000000e+00> : vector<8xf32>
      %25 = vector.multi_reduction <add>, %24, %cst_16 [1] : vector<8x128xf32> to vector<8xf32>
      %26 = vector.shape_cast %25 : vector<8xf32> to vector<8x1xf32>
      %27 = math.log %26 : vector<8x1xf32>
      %28 = arith.addf %21, %27 : vector<8x1xf32>
      %29 = vector.broadcast %28 : vector<8x1xf32> to vector<8x128xf32>
      %30 = arith.subf %19, %29 : vector<8x128xf32>
      %c0_17 = arith.constant 0 : index
      %c0_18 = arith.constant 0 : index
      %31 = vector.load %arg10[%c0_17, %c0_18] : memref<8x128xf32, #tpu.memory_space<vmem>>, vector<8x128xf32>
      tpu.vector_store %arg10[%c0_17, %c0_18], %30 {strides = array<i32>} : memref<8x128xf32, #tpu.memory_space<vmem>>, vector<8x128xf32>,
    } else {
    }
    return
  }
  func.func @transform_0(%arg0: i32, %arg1: i32) -> (i32, i32) {
    %c0_i32 = arith.constant 0 : i32
    %c0_i32_0 = arith.constant 0 : i32
    return %arg0, %c0_i32 : i32, i32
  }
  func.func @transform_1(%arg0: i32, %arg1: i32) -> (i32, i32) {
    %c0_i32 = arith.constant 0 : i32
    %c0_i32_0 = arith.constant 0 : i32
    %c0_i32_1 = arith.constant 0 : i32
    return %c0_i32, %c0_i32_0 : i32, i32
  }
  func.func @transform_2(%arg0: i32, %arg1: i32) -> (i32, i32) {
    %c0_i32 = arith.constant 0 : i32
    %c0_i32_0 = arith.constant 0 : i32
    %c0_i32_1 = arith.constant 0 : i32
    return %c0_i32, %c0_i32_0 : i32, i32
  }
  func.func @transform_3(%arg0: i32, %arg1: i32) -> (i32, i32) {
    %c0_i32 = arith.constant 0 : i32
    %c0_i32_0 = arith.constant 0 : i32
    %c0_i32_1 = arith.constant 0 : i32
    return %c0_i32, %c0_i32_0 : i32, i32
  }
  func.func @transform_4(%arg0: i32, %arg1: i32) -> (i32, i32) {
    %c0_i32 = arith.constant 0 : i32
    %c0_i32_0 = arith.constant 0 : i32
    %c0_i32_1 = arith.constant 0 : i32
    return %c0_i32, %c0_i32_0 : i32, i32
  }
  func.func @transform_5(%arg0: i32, %arg1: i32) -> (i32, i32) {
    %c0_i32 = arith.constant 0 : i32
    %c0_i32_0 = arith.constant 0 : i32
    %c0_i32_1 = arith.constant 0 : i32
    return %c0_i32, %c0_i32_0 : i32, i32
  }
  func.func @transform_6(%arg0: i32, %arg1: i32) -> (i32, i32) {
    %c0_i32 = arith.constant 0 : i32
    %c0_i32_0 = arith.constant 0 : i32
    %c0_i32_1 = arith.constant 0 : i32
    return %c0_i32, %c0_i32_0 : i32, i32
  }
  func.func @transform_7(%arg0: i32, %arg1: i32) -> (i32, i32) {
    %c0_i32 = arith.constant 0 : i32
    %c0_i32_0 = arith.constant 0 : i32
    %c0_i32_1 = arith.constant 0 : i32
    return %c0_i32, %c0_i32_0 : i32, i32
  }
  func.func @transform_8(%arg0: i32, %arg1: i32) -> (i32, i32) {
    %c0_i32 = arith.constant 0 : i32
    %c0_i32_0 = arith.constant 0 : i32
    return %arg0, %c0_i32 : i32, i32
  }
  func.func @transform_9(%arg0: i32, %arg1: i32) -> (i32, i32) {
    %c0_i32 = arith.constant 0 : i32
    %c0_i32_0 = arith.constant 0 : i32
    return %arg0, %c0_i32 : i32, i32
  }
}

module attributes {stable_mosaic.version = 11 : i64} {
  func.func @_decoder_decode_kernel(%arg0: i32, %arg1: i32, %arg2: memref<8x128xbf16, #tpu.memory_space<vmem>>, %arg3: memref<1x128xf32, #tpu.memory_space<vmem>>, %arg4: memref<128x384xbf16, #tpu.memory_space<vmem>>, %arg5: memref<128x384xbf16, #tpu.memory_space<vmem>>, %arg6: memref<1x384xf32, #tpu.memory_space<vmem>>, %arg7: memref<1x384xf32, #tpu.memory_space<vmem>>, %arg8: memref<128x128xbf16, #tpu.memory_space<vmem>>, %arg9: memref<1x128xf32, #tpu.memory_space<vmem>>, %arg10: memref<8x128xf32, #tpu.memory_space<vmem>>, %arg11: memref<8x128xf32, #tpu.memory_space<vmem>>, %arg12: memref<1x128xf32, #tpu.memory_space<vmem>>) attributes {dimension_semantics = [#tpu.dimension_semantics<arbitrary>, #tpu.dimension_semantics<arbitrary>], iteration_bounds = array<i64: 1, 1>, scalar_prefetch = 0 : i64, scratch_operands = 1 : i64, tpu.core_type = #tpu.core_type<tc>, window_params = [{transform_indices = @transform_0, window_bounds = array<i64: 8, 128>}, {pipeline_mode = #tpu.pipeline_mode<synchronous>, transform_indices = @transform_1, window_bounds = array<i64: 1, 128>}, {pipeline_mode = #tpu.pipeline_mode<synchronous>, transform_indices = @transform_2, window_bounds = array<i64: 128, 384>}, {pipeline_mode = #tpu.pipeline_mode<synchronous>, transform_indices = @transform_3, window_bounds = array<i64: 128, 384>}, {pipeline_mode = #tpu.pipeline_mode<synchronous>, transform_indices = @transform_4, window_bounds = array<i64: 1, 384>}, {pipeline_mode = #tpu.pipeline_mode<synchronous>, transform_indices = @transform_5, window_bounds = array<i64: 1, 384>}, {transform_indices = @transform_6, window_bounds = array<i64: 128, 128>}, {transform_indices = @transform_7, window_bounds = array<i64: 1, 128>}, {transform_indices = @transform_8, window_bounds = array<i64: 8, 128>}, {transform_indices = @transform_9, window_bounds = array<i64: 8, 128>}]} {
    %c0_i32 = arith.constant 0 : i32
    %0 = arith.cmpi eq, %arg0, %c0_i32 : i32
    %c0_i32_0 = arith.constant 0 : i32
    %1 = arith.cmpi eq, %arg1, %c0_i32_0 : i32
    %2 = arith.andi %0, %1 : i1
    %3 = arith.extui %2 : i1 to i32
    %c0_i32_1 = arith.constant 0 : i32
    %4 = arith.cmpi ne, %3, %c0_i32_1 : i32
    scf.if %4 {
      %c0_13 = arith.constant 0 : index
      %c0_14 = arith.constant 0 : index
      %19 = vector.load %arg3[%c0_13, %c0_14] : memref<1x128xf32, #tpu.memory_space<vmem>>, vector<1x128xf32>
      %c0_15 = arith.constant 0 : index
      %c0_16 = arith.constant 0 : index
      %20 = vector.load %arg12[%c0_15, %c0_16] : memref<1x128xf32, #tpu.memory_space<vmem>>, vector<1x128xf32>
      tpu.vector_store %arg12[%c0_15, %c0_16], %19 {strides = array<i32>} : memref<1x128xf32, #tpu.memory_space<vmem>>, vector<1x128xf32>,
    } else {
    }
    %c0_i32_2 = arith.constant 0 : i32
    %5 = arith.cmpi eq, %arg1, %c0_i32_2 : i32
    %6 = arith.extui %5 : i1 to i32
    %c0_i32_3 = arith.constant 0 : i32
    %7 = arith.cmpi ne, %6, %c0_i32_3 : i32
    scf.if %7 {
      %c0_13 = arith.constant 0 : index
      %c0_14 = arith.constant 0 : index
      %19 = vector.load %arg2[%c0_13, %c0_14] : memref<8x128xbf16, #tpu.memory_space<vmem>>, vector<8x128xbf16>
      %cst_15 = arith.constant 0.000000e+00 : bf16
      %20 = vector.broadcast %cst_15 : bf16 to vector<8x128xbf16>
      %21 = arith.maximumf %19, %20 : vector<8x128xbf16>
      %c0_16 = arith.constant 0 : index
      %c0_17 = arith.constant 0 : index
      %22 = vector.load %arg4[%c0_16, %c0_17] : memref<128x384xbf16, #tpu.memory_space<vmem>>, vector<128x384xbf16>
      %cst_18 = arith.constant dense<0.000000e+00> : vector<8x384xf32>
      %23 = tpu.matmul %21, %22, %cst_18 {dimension_numbers = #tpu.dot_dimension_numbers<[1], [0], [0], [1], [0, 0, 1, 1], [], []>} : vector<8x128xbf16>, vector<128x384xbf16>, vector<8x384xf32> -> vector<8x384xf32>
      %c0_19 = arith.constant 0 : index
      %c0_20 = arith.constant 0 : index
      %24 = vector.load %arg6[%c0_19, %c0_20] : memref<1x384xf32, #tpu.memory_space<vmem>>, vector<1x384xf32>
      %25 = vector.broadcast %24 : vector<1x384xf32> to vector<8x384xf32>
      %26 = arith.addf %23, %25 : vector<8x384xf32>
      %c0_21 = arith.constant 0 : index
      %c0_22 = arith.constant 0 : index
      %27 = vector.load %arg12[%c0_21, %c0_22] : memref<1x128xf32, #tpu.memory_space<vmem>>, vector<1x128xf32>
      %28 = arith.truncf %27 : vector<1x128xf32> to vector<1x128xbf16>
      %c0_23 = arith.constant 0 : index
      %c0_24 = arith.constant 0 : index
      %29 = vector.load %arg5[%c0_23, %c0_24] : memref<128x384xbf16, #tpu.memory_space<vmem>>, vector<128x384xbf16>
      %cst_25 = arith.constant dense<0.000000e+00> : vector<1x384xf32>
      %30 = tpu.matmul %28, %29, %cst_25 {dimension_numbers = #tpu.dot_dimension_numbers<[1], [0], [0], [1], [0, 0, 1, 1], [], []>} : vector<1x128xbf16>, vector<128x384xbf16>, vector<1x384xf32> -> vector<1x384xf32>
      %c0_26 = arith.constant 0 : index
      %c0_27 = arith.constant 0 : index
      %31 = vector.load %arg7[%c0_26, %c0_27] : memref<1x384xf32, #tpu.memory_space<vmem>>, vector<1x384xf32>
      %32 = arith.addf %30, %31 : vector<1x384xf32>
      %33 = vector.extract_strided_slice %26 {offsets = [0, 0], sizes = [1, 384], strides = [1, 1]} : vector<8x384xf32> to vector<1x384xf32>
      %34 = vector.extract_strided_slice %33 {offsets = [0, 0], sizes = [1, 128], strides = [1, 1]} : vector<1x384xf32> to vector<1x128xf32>
      %35 = vector.extract_strided_slice %32 {offsets = [0, 0], sizes = [1, 128], strides = [1, 1]} : vector<1x384xf32> to vector<1x128xf32>
      %36 = arith.addf %34, %35 : vector<1x128xf32>
      %37 = arith.negf %36 : vector<1x128xf32>
      %38 = math.exp %37 : vector<1x128xf32>
      %cst_28 = arith.constant 1.000000e+00 : f32
      %39 = vector.broadcast %cst_28 : f32 to vector<1x128xf32>
      %40 = arith.addf %39, %38 : vector<1x128xf32>
      %41 = arith.divf %39, %40 : vector<1x128xf32>
      %42 = vector.extract_strided_slice %33 {offsets = [0, 128], sizes = [1, 128], strides = [1, 1]} : vector<1x384xf32> to vector<1x128xf32>
      %43 = vector.extract_strided_slice %32 {offsets = [0, 128], sizes = [1, 128], strides = [1, 1]} : vector<1x384xf32> to vector<1x128xf32>
      %44 = arith.addf %42, %43 : vector<1x128xf32>
      %45 = arith.negf %44 : vector<1x128xf32>
      %46 = math.exp %45 : vector<1x128xf32>
      %cst_29 = arith.constant 1.000000e+00 : f32
      %47 = vector.broadcast %cst_29 : f32 to vector<1x128xf32>
      %48 = arith.addf %47, %46 : vector<1x128xf32>
      %49 = arith.divf %47, %48 : vector<1x128xf32>
      %50 = vector.extract_strided_slice %33 {offsets = [0, 256], sizes = [1, 128], strides = [1, 1]} : vector<1x384xf32> to vector<1x128xf32>
      %51 = vector.extract_strided_slice %32 {offsets = [0, 256], sizes = [1, 128], strides = [1, 1]} : vector<1x384xf32> to vector<1x128xf32>
      %52 = arith.mulf %41, %51 : vector<1x128xf32>
      %53 = arith.addf %50, %52 : vector<1x128xf32>
      %54 = math.tanh %53 : vector<1x128xf32>
      %cst_30 = arith.constant 1.000000e+00 : f32
      %55 = vector.broadcast %cst_30 : f32 to vector<1x128xf32>
      %56 = arith.subf %55, %49 : vector<1x128xf32>
      %57 = arith.mulf %56, %54 : vector<1x128xf32>
      %58 = arith.mulf %49, %27 : vector<1x128xf32>
      %59 = arith.addf %57, %58 : vector<1x128xf32>
      %c0_31 = arith.constant 0 : index
      %c0_32 = arith.constant 0 : index
      %60 = vector.load %arg11[%c0_31, %c0_32] : memref<8x128xf32, #tpu.memory_space<vmem>>, vector<1x128xf32>
      tpu.vector_store %arg11[%c0_31, %c0_32], %59 {strides = array<i32>} : memref<8x128xf32, #tpu.memory_space<vmem>>, vector<1x128xf32>,
      %61 = arith.truncf %59 : vector<1x128xf32> to vector<1x128xbf16>
      %c0_33 = arith.constant 0 : index
      %c0_34 = arith.constant 0 : index
      %62 = vector.load %arg5[%c0_33, %c0_34] : memref<128x384xbf16, #tpu.memory_space<vmem>>, vector<128x384xbf16>
      %cst_35 = arith.constant dense<0.000000e+00> : vector<1x384xf32>
      %63 = tpu.matmul %61, %62, %cst_35 {dimension_numbers = #tpu.dot_dimension_numbers<[1], [0], [0], [1], [0, 0, 1, 1], [], []>} : vector<1x128xbf16>, vector<128x384xbf16>, vector<1x384xf32> -> vector<1x384xf32>
      %c0_36 = arith.constant 0 : index
      %c0_37 = arith.constant 0 : index
      %64 = vector.load %arg7[%c0_36, %c0_37] : memref<1x384xf32, #tpu.memory_space<vmem>>, vector<1x384xf32>
      %65 = arith.addf %63, %64 : vector<1x384xf32>
      %66 = vector.extract_strided_slice %26 {offsets = [1, 0], sizes = [1, 384], strides = [1, 1]} : vector<8x384xf32> to vector<1x384xf32>
      %67 = vector.extract_strided_slice %66 {offsets = [0, 0], sizes = [1, 128], strides = [1, 1]} : vector<1x384xf32> to vector<1x128xf32>
      %68 = vector.extract_strided_slice %65 {offsets = [0, 0], sizes = [1, 128], strides = [1, 1]} : vector<1x384xf32> to vector<1x128xf32>
      %69 = arith.addf %67, %68 : vector<1x128xf32>
      %70 = arith.negf %69 : vector<1x128xf32>
      %71 = math.exp %70 : vector<1x128xf32>
      %cst_38 = arith.constant 1.000000e+00 : f32
      %72 = vector.broadcast %cst_38 : f32 to vector<1x128xf32>
      %73 = arith.addf %72, %71 : vector<1x128xf32>
      %74 = arith.divf %72, %73 : vector<1x128xf32>
      %75 = vector.extract_strided_slice %66 {offsets = [0, 128], sizes = [1, 128], strides = [1, 1]} : vector<1x384xf32> to vector<1x128xf32>
      %76 = vector.extract_strided_slice %65 {offsets = [0, 128], sizes = [1, 128], strides = [1, 1]} : vector<1x384xf32> to vector<1x128xf32>
      %77 = arith.addf %75, %76 : vector<1x128xf32>
      %78 = arith.negf %77 : vector<1x128xf32>
      %79 = math.exp %78 : vector<1x128xf32>
      %cst_39 = arith.constant 1.000000e+00 : f32
      %80 = vector.broadcast %cst_39 : f32 to vector<1x128xf32>
      %81 = arith.addf %80, %79 : vector<1x128xf32>
      %82 = arith.divf %80, %81 : vector<1x128xf32>
      %83 = vector.extract_strided_slice %66 {offsets = [0, 256], sizes = [1, 128], strides = [1, 1]} : vector<1x384xf32> to vector<1x128xf32>
      %84 = vector.extract_strided_slice %65 {offsets = [0, 256], sizes = [1, 128], strides = [1, 1]} : vector<1x384xf32> to vector<1x128xf32>
      %85 = arith.mulf %74, %84 : vector<1x128xf32>
      %86 = arith.addf %83, %85 : vector<1x128xf32>
      %87 = math.tanh %86 : vector<1x128xf32>
      %cst_40 = arith.constant 1.000000e+00 : f32
      %88 = vector.broadcast %cst_40 : f32 to vector<1x128xf32>
      %89 = arith.subf %88, %82 : vector<1x128xf32>
      %90 = arith.mulf %89, %87 : vector<1x128xf32>
      %91 = arith.mulf %82, %59 : vector<1x128xf32>
      %92 = arith.addf %90, %91 : vector<1x128xf32>
      %c1 = arith.constant 1 : index
      %c0_41 = arith.constant 0 : index
      %93 = vector.load %arg11[%c1, %c0_41] : memref<8x128xf32, #tpu.memory_space<vmem>>, vector<1x128xf32>
      tpu.vector_store %arg11[%c1, %c0_41], %92 {strides = array<i32>} : memref<8x128xf32, #tpu.memory_space<vmem>>, vector<1x128xf32>,
      %94 = arith.truncf %92 : vector<1x128xf32> to vector<1x128xbf16>
      %c0_42 = arith.constant 0 : index
      %c0_43 = arith.constant 0 : index
      %95 = vector.load %arg5[%c0_42, %c0_43] : memref<128x384xbf16, #tpu.memory_space<vmem>>, vector<128x384xbf16>
      %cst_44 = arith.constant dense<0.000000e+00> : vector<1x384xf32>
      %96 = tpu.matmul %94, %95, %cst_44 {dimension_numbers = #tpu.dot_dimension_numbers<[1], [0], [0], [1], [0, 0, 1, 1], [], []>} : vector<1x128xbf16>, vector<128x384xbf16>, vector<1x384xf32> -> vector<1x384xf32>
      %c0_45 = arith.constant 0 : index
      %c0_46 = arith.constant 0 : index
      %97 = vector.load %arg7[%c0_45, %c0_46] : memref<1x384xf32, #tpu.memory_space<vmem>>, vector<1x384xf32>
      %98 = arith.addf %96, %97 : vector<1x384xf32>
      %99 = vector.extract_strided_slice %26 {offsets = [2, 0], sizes = [1, 384], strides = [1, 1]} : vector<8x384xf32> to vector<1x384xf32>
      %100 = vector.extract_strided_slice %99 {offsets = [0, 0], sizes = [1, 128], strides = [1, 1]} : vector<1x384xf32> to vector<1x128xf32>
      %101 = vector.extract_strided_slice %98 {offsets = [0, 0], sizes = [1, 128], strides = [1, 1]} : vector<1x384xf32> to vector<1x128xf32>
      %102 = arith.addf %100, %101 : vector<1x128xf32>
      %103 = arith.negf %102 : vector<1x128xf32>
      %104 = math.exp %103 : vector<1x128xf32>
      %cst_47 = arith.constant 1.000000e+00 : f32
      %105 = vector.broadcast %cst_47 : f32 to vector<1x128xf32>
      %106 = arith.addf %105, %104 : vector<1x128xf32>
      %107 = arith.divf %105, %106 : vector<1x128xf32>
      %108 = vector.extract_strided_slice %99 {offsets = [0, 128], sizes = [1, 128], strides = [1, 1]} : vector<1x384xf32> to vector<1x128xf32>
      %109 = vector.extract_strided_slice %98 {offsets = [0, 128], sizes = [1, 128], strides = [1, 1]} : vector<1x384xf32> to vector<1x128xf32>
      %110 = arith.addf %108, %109 : vector<1x128xf32>
      %111 = arith.negf %110 : vector<1x128xf32>
      %112 = math.exp %111 : vector<1x128xf32>
      %cst_48 = arith.constant 1.000000e+00 : f32
      %113 = vector.broadcast %cst_48 : f32 to vector<1x128xf32>
      %114 = arith.addf %113, %112 : vector<1x128xf32>
      %115 = arith.divf %113, %114 : vector<1x128xf32>
      %116 = vector.extract_strided_slice %99 {offsets = [0, 256], sizes = [1, 128], strides = [1, 1]} : vector<1x384xf32> to vector<1x128xf32>
      %117 = vector.extract_strided_slice %98 {offsets = [0, 256], sizes = [1, 128], strides = [1, 1]} : vector<1x384xf32> to vector<1x128xf32>
      %118 = arith.mulf %107, %117 : vector<1x128xf32>
      %119 = arith.addf %116, %118 : vector<1x128xf32>
      %120 = math.tanh %119 : vector<1x128xf32>
      %cst_49 = arith.constant 1.000000e+00 : f32
      %121 = vector.broadcast %cst_49 : f32 to vector<1x128xf32>
      %122 = arith.subf %121, %115 : vector<1x128xf32>
      %123 = arith.mulf %122, %120 : vector<1x128xf32>
      %124 = arith.mulf %115, %92 : vector<1x128xf32>
      %125 = arith.addf %123, %124 : vector<1x128xf32>
      %c2 = arith.constant 2 : index
      %c0_50 = arith.constant 0 : index
      %126 = vector.load %arg11[%c2, %c0_50] : memref<8x128xf32, #tpu.memory_space<vmem>>, vector<1x128xf32>
      tpu.vector_store %arg11[%c2, %c0_50], %125 {strides = array<i32>} : memref<8x128xf32, #tpu.memory_space<vmem>>, vector<1x128xf32>,
      %127 = arith.truncf %125 : vector<1x128xf32> to vector<1x128xbf16>
      %c0_51 = arith.constant 0 : index
      %c0_52 = arith.constant 0 : index
      %128 = vector.load %arg5[%c0_51, %c0_52] : memref<128x384xbf16, #tpu.memory_space<vmem>>, vector<128x384xbf16>
      %cst_53 = arith.constant dense<0.000000e+00> : vector<1x384xf32>
      %129 = tpu.matmul %127, %128, %cst_53 {dimension_numbers = #tpu.dot_dimension_numbers<[1], [0], [0], [1], [0, 0, 1, 1], [], []>} : vector<1x128xbf16>, vector<128x384xbf16>, vector<1x384xf32> -> vector<1x384xf32>
      %c0_54 = arith.constant 0 : index
      %c0_55 = arith.constant 0 : index
      %130 = vector.load %arg7[%c0_54, %c0_55] : memref<1x384xf32, #tpu.memory_space<vmem>>, vector<1x384xf32>
      %131 = arith.addf %129, %130 : vector<1x384xf32>
      %132 = vector.extract_strided_slice %26 {offsets = [3, 0], sizes = [1, 384], strides = [1, 1]} : vector<8x384xf32> to vector<1x384xf32>
      %133 = vector.extract_strided_slice %132 {offsets = [0, 0], sizes = [1, 128], strides = [1, 1]} : vector<1x384xf32> to vector<1x128xf32>
      %134 = vector.extract_strided_slice %131 {offsets = [0, 0], sizes = [1, 128], strides = [1, 1]} : vector<1x384xf32> to vector<1x128xf32>
      %135 = arith.addf %133, %134 : vector<1x128xf32>
      %136 = arith.negf %135 : vector<1x128xf32>
      %137 = math.exp %136 : vector<1x128xf32>
      %cst_56 = arith.constant 1.000000e+00 : f32
      %138 = vector.broadcast %cst_56 : f32 to vector<1x128xf32>
      %139 = arith.addf %138, %137 : vector<1x128xf32>
      %140 = arith.divf %138, %139 : vector<1x128xf32>
      %141 = vector.extract_strided_slice %132 {offsets = [0, 128], sizes = [1, 128], strides = [1, 1]} : vector<1x384xf32> to vector<1x128xf32>
      %142 = vector.extract_strided_slice %131 {offsets = [0, 128], sizes = [1, 128], strides = [1, 1]} : vector<1x384xf32> to vector<1x128xf32>
      %143 = arith.addf %141, %142 : vector<1x128xf32>
      %144 = arith.negf %143 : vector<1x128xf32>
      %145 = math.exp %144 : vector<1x128xf32>
      %cst_57 = arith.constant 1.000000e+00 : f32
      %146 = vector.broadcast %cst_57 : f32 to vector<1x128xf32>
      %147 = arith.addf %146, %145 : vector<1x128xf32>
      %148 = arith.divf %146, %147 : vector<1x128xf32>
      %149 = vector.extract_strided_slice %132 {offsets = [0, 256], sizes = [1, 128], strides = [1, 1]} : vector<1x384xf32> to vector<1x128xf32>
      %150 = vector.extract_strided_slice %131 {offsets = [0, 256], sizes = [1, 128], strides = [1, 1]} : vector<1x384xf32> to vector<1x128xf32>
      %151 = arith.mulf %140, %150 : vector<1x128xf32>
      %152 = arith.addf %149, %151 : vector<1x128xf32>
      %153 = math.tanh %152 : vector<1x128xf32>
      %cst_58 = arith.constant 1.000000e+00 : f32
      %154 = vector.broadcast %cst_58 : f32 to vector<1x128xf32>
      %155 = arith.subf %154, %148 : vector<1x128xf32>
      %156 = arith.mulf %155, %153 : vector<1x128xf32>
      %157 = arith.mulf %148, %125 : vector<1x128xf32>
      %158 = arith.addf %156, %157 : vector<1x128xf32>
      %c3 = arith.constant 3 : index
      %c0_59 = arith.constant 0 : index
      %159 = vector.load %arg11[%c3, %c0_59] : memref<8x128xf32, #tpu.memory_space<vmem>>, vector<1x128xf32>
      tpu.vector_store %arg11[%c3, %c0_59], %158 {strides = array<i32>} : memref<8x128xf32, #tpu.memory_space<vmem>>, vector<1x128xf32>,
      %160 = arith.truncf %158 : vector<1x128xf32> to vector<1x128xbf16>
      %c0_60 = arith.constant 0 : index
      %c0_61 = arith.constant 0 : index
      %161 = vector.load %arg5[%c0_60, %c0_61] : memref<128x384xbf16, #tpu.memory_space<vmem>>, vector<128x384xbf16>
      %cst_62 = arith.constant dense<0.000000e+00> : vector<1x384xf32>
      %162 = tpu.matmul %160, %161, %cst_62 {dimension_numbers = #tpu.dot_dimension_numbers<[1], [0], [0], [1], [0, 0, 1, 1], [], []>} : vector<1x128xbf16>, vector<128x384xbf16>, vector<1x384xf32> -> vector<1x384xf32>
      %c0_63 = arith.constant 0 : index
      %c0_64 = arith.constant 0 : index
      %163 = vector.load %arg7[%c0_63, %c0_64] : memref<1x384xf32, #tpu.memory_space<vmem>>, vector<1x384xf32>
      %164 = arith.addf %162, %163 : vector<1x384xf32>
      %165 = vector.extract_strided_slice %26 {offsets = [4, 0], sizes = [1, 384], strides = [1, 1]} : vector<8x384xf32> to vector<1x384xf32>
      %166 = vector.extract_strided_slice %165 {offsets = [0, 0], sizes = [1, 128], strides = [1, 1]} : vector<1x384xf32> to vector<1x128xf32>
      %167 = vector.extract_strided_slice %164 {offsets = [0, 0], sizes = [1, 128], strides = [1, 1]} : vector<1x384xf32> to vector<1x128xf32>
      %168 = arith.addf %166, %167 : vector<1x128xf32>
      %169 = arith.negf %168 : vector<1x128xf32>
      %170 = math.exp %169 : vector<1x128xf32>
      %cst_65 = arith.constant 1.000000e+00 : f32
      %171 = vector.broadcast %cst_65 : f32 to vector<1x128xf32>
      %172 = arith.addf %171, %170 : vector<1x128xf32>
      %173 = arith.divf %171, %172 : vector<1x128xf32>
      %174 = vector.extract_strided_slice %165 {offsets = [0, 128], sizes = [1, 128], strides = [1, 1]} : vector<1x384xf32> to vector<1x128xf32>
      %175 = vector.extract_strided_slice %164 {offsets = [0, 128], sizes = [1, 128], strides = [1, 1]} : vector<1x384xf32> to vector<1x128xf32>
      %176 = arith.addf %174, %175 : vector<1x128xf32>
      %177 = arith.negf %176 : vector<1x128xf32>
      %178 = math.exp %177 : vector<1x128xf32>
      %cst_66 = arith.constant 1.000000e+00 : f32
      %179 = vector.broadcast %cst_66 : f32 to vector<1x128xf32>
      %180 = arith.addf %179, %178 : vector<1x128xf32>
      %181 = arith.divf %179, %180 : vector<1x128xf32>
      %182 = vector.extract_strided_slice %165 {offsets = [0, 256], sizes = [1, 128], strides = [1, 1]} : vector<1x384xf32> to vector<1x128xf32>
      %183 = vector.extract_strided_slice %164 {offsets = [0, 256], sizes = [1, 128], strides = [1, 1]} : vector<1x384xf32> to vector<1x128xf32>
      %184 = arith.mulf %173, %183 : vector<1x128xf32>
      %185 = arith.addf %182, %184 : vector<1x128xf32>
      %186 = math.tanh %185 : vector<1x128xf32>
      %cst_67 = arith.constant 1.000000e+00 : f32
      %187 = vector.broadcast %cst_67 : f32 to vector<1x128xf32>
      %188 = arith.subf %187, %181 : vector<1x128xf32>
      %189 = arith.mulf %188, %186 : vector<1x128xf32>
      %190 = arith.mulf %181, %158 : vector<1x128xf32>
      %191 = arith.addf %189, %190 : vector<1x128xf32>
      %c4 = arith.constant 4 : index
      %c0_68 = arith.constant 0 : index
      %192 = vector.load %arg11[%c4, %c0_68] : memref<8x128xf32, #tpu.memory_space<vmem>>, vector<1x128xf32>
      tpu.vector_store %arg11[%c4, %c0_68], %191 {strides = array<i32>} : memref<8x128xf32, #tpu.memory_space<vmem>>, vector<1x128xf32>,
      %193 = arith.truncf %191 : vector<1x128xf32> to vector<1x128xbf16>
      %c0_69 = arith.constant 0 : index
      %c0_70 = arith.constant 0 : index
      %194 = vector.load %arg5[%c0_69, %c0_70] : memref<128x384xbf16, #tpu.memory_space<vmem>>, vector<128x384xbf16>
      %cst_71 = arith.constant dense<0.000000e+00> : vector<1x384xf32>
      %195 = tpu.matmul %193, %194, %cst_71 {dimension_numbers = #tpu.dot_dimension_numbers<[1], [0], [0], [1], [0, 0, 1, 1], [], []>} : vector<1x128xbf16>, vector<128x384xbf16>, vector<1x384xf32> -> vector<1x384xf32>
      %c0_72 = arith.constant 0 : index
      %c0_73 = arith.constant 0 : index
      %196 = vector.load %arg7[%c0_72, %c0_73] : memref<1x384xf32, #tpu.memory_space<vmem>>, vector<1x384xf32>
      %197 = arith.addf %195, %196 : vector<1x384xf32>
      %198 = vector.extract_strided_slice %26 {offsets = [5, 0], sizes = [1, 384], strides = [1, 1]} : vector<8x384xf32> to vector<1x384xf32>
      %199 = vector.extract_strided_slice %198 {offsets = [0, 0], sizes = [1, 128], strides = [1, 1]} : vector<1x384xf32> to vector<1x128xf32>
      %200 = vector.extract_strided_slice %197 {offsets = [0, 0], sizes = [1, 128], strides = [1, 1]} : vector<1x384xf32> to vector<1x128xf32>
      %201 = arith.addf %199, %200 : vector<1x128xf32>
      %202 = arith.negf %201 : vector<1x128xf32>
      %203 = math.exp %202 : vector<1x128xf32>
      %cst_74 = arith.constant 1.000000e+00 : f32
      %204 = vector.broadcast %cst_74 : f32 to vector<1x128xf32>
      %205 = arith.addf %204, %203 : vector<1x128xf32>
      %206 = arith.divf %204, %205 : vector<1x128xf32>
      %207 = vector.extract_strided_slice %198 {offsets = [0, 128], sizes = [1, 128], strides = [1, 1]} : vector<1x384xf32> to vector<1x128xf32>
      %208 = vector.extract_strided_slice %197 {offsets = [0, 128], sizes = [1, 128], strides = [1, 1]} : vector<1x384xf32> to vector<1x128xf32>
      %209 = arith.addf %207, %208 : vector<1x128xf32>
      %210 = arith.negf %209 : vector<1x128xf32>
      %211 = math.exp %210 : vector<1x128xf32>
      %cst_75 = arith.constant 1.000000e+00 : f32
      %212 = vector.broadcast %cst_75 : f32 to vector<1x128xf32>
      %213 = arith.addf %212, %211 : vector<1x128xf32>
      %214 = arith.divf %212, %213 : vector<1x128xf32>
      %215 = vector.extract_strided_slice %198 {offsets = [0, 256], sizes = [1, 128], strides = [1, 1]} : vector<1x384xf32> to vector<1x128xf32>
      %216 = vector.extract_strided_slice %197 {offsets = [0, 256], sizes = [1, 128], strides = [1, 1]} : vector<1x384xf32> to vector<1x128xf32>
      %217 = arith.mulf %206, %216 : vector<1x128xf32>
      %218 = arith.addf %215, %217 : vector<1x128xf32>
      %219 = math.tanh %218 : vector<1x128xf32>
      %cst_76 = arith.constant 1.000000e+00 : f32
      %220 = vector.broadcast %cst_76 : f32 to vector<1x128xf32>
      %221 = arith.subf %220, %214 : vector<1x128xf32>
      %222 = arith.mulf %221, %219 : vector<1x128xf32>
      %223 = arith.mulf %214, %191 : vector<1x128xf32>
      %224 = arith.addf %222, %223 : vector<1x128xf32>
      %c5 = arith.constant 5 : index
      %c0_77 = arith.constant 0 : index
      %225 = vector.load %arg11[%c5, %c0_77] : memref<8x128xf32, #tpu.memory_space<vmem>>, vector<1x128xf32>
      tpu.vector_store %arg11[%c5, %c0_77], %224 {strides = array<i32>} : memref<8x128xf32, #tpu.memory_space<vmem>>, vector<1x128xf32>,
      %226 = arith.truncf %224 : vector<1x128xf32> to vector<1x128xbf16>
      %c0_78 = arith.constant 0 : index
      %c0_79 = arith.constant 0 : index
      %227 = vector.load %arg5[%c0_78, %c0_79] : memref<128x384xbf16, #tpu.memory_space<vmem>>, vector<128x384xbf16>
      %cst_80 = arith.constant dense<0.000000e+00> : vector<1x384xf32>
      %228 = tpu.matmul %226, %227, %cst_80 {dimension_numbers = #tpu.dot_dimension_numbers<[1], [0], [0], [1], [0, 0, 1, 1], [], []>} : vector<1x128xbf16>, vector<128x384xbf16>, vector<1x384xf32> -> vector<1x384xf32>
      %c0_81 = arith.constant 0 : index
      %c0_82 = arith.constant 0 : index
      %229 = vector.load %arg7[%c0_81, %c0_82] : memref<1x384xf32, #tpu.memory_space<vmem>>, vector<1x384xf32>
      %230 = arith.addf %228, %229 : vector<1x384xf32>
      %231 = vector.extract_strided_slice %26 {offsets = [6, 0], sizes = [1, 384], strides = [1, 1]} : vector<8x384xf32> to vector<1x384xf32>
      %232 = vector.extract_strided_slice %231 {offsets = [0, 0], sizes = [1, 128], strides = [1, 1]} : vector<1x384xf32> to vector<1x128xf32>
      %233 = vector.extract_strided_slice %230 {offsets = [0, 0], sizes = [1, 128], strides = [1, 1]} : vector<1x384xf32> to vector<1x128xf32>
      %234 = arith.addf %232, %233 : vector<1x128xf32>
      %235 = arith.negf %234 : vector<1x128xf32>
      %236 = math.exp %235 : vector<1x128xf32>
      %cst_83 = arith.constant 1.000000e+00 : f32
      %237 = vector.broadcast %cst_83 : f32 to vector<1x128xf32>
      %238 = arith.addf %237, %236 : vector<1x128xf32>
      %239 = arith.divf %237, %238 : vector<1x128xf32>
      %240 = vector.extract_strided_slice %231 {offsets = [0, 128], sizes = [1, 128], strides = [1, 1]} : vector<1x384xf32> to vector<1x128xf32>
      %241 = vector.extract_strided_slice %230 {offsets = [0, 128], sizes = [1, 128], strides = [1, 1]} : vector<1x384xf32> to vector<1x128xf32>
      %242 = arith.addf %240, %241 : vector<1x128xf32>
      %243 = arith.negf %242 : vector<1x128xf32>
      %244 = math.exp %243 : vector<1x128xf32>
      %cst_84 = arith.constant 1.000000e+00 : f32
      %245 = vector.broadcast %cst_84 : f32 to vector<1x128xf32>
      %246 = arith.addf %245, %244 : vector<1x128xf32>
      %247 = arith.divf %245, %246 : vector<1x128xf32>
      %248 = vector.extract_strided_slice %231 {offsets = [0, 256], sizes = [1, 128], strides = [1, 1]} : vector<1x384xf32> to vector<1x128xf32>
      %249 = vector.extract_strided_slice %230 {offsets = [0, 256], sizes = [1, 128], strides = [1, 1]} : vector<1x384xf32> to vector<1x128xf32>
      %250 = arith.mulf %239, %249 : vector<1x128xf32>
      %251 = arith.addf %248, %250 : vector<1x128xf32>
      %252 = math.tanh %251 : vector<1x128xf32>
      %cst_85 = arith.constant 1.000000e+00 : f32
      %253 = vector.broadcast %cst_85 : f32 to vector<1x128xf32>
      %254 = arith.subf %253, %247 : vector<1x128xf32>
      %255 = arith.mulf %254, %252 : vector<1x128xf32>
      %256 = arith.mulf %247, %224 : vector<1x128xf32>
      %257 = arith.addf %255, %256 : vector<1x128xf32>
      %c6 = arith.constant 6 : index
      %c0_86 = arith.constant 0 : index
      %258 = vector.load %arg11[%c6, %c0_86] : memref<8x128xf32, #tpu.memory_space<vmem>>, vector<1x128xf32>
      tpu.vector_store %arg11[%c6, %c0_86], %257 {strides = array<i32>} : memref<8x128xf32, #tpu.memory_space<vmem>>, vector<1x128xf32>,
      %259 = arith.truncf %257 : vector<1x128xf32> to vector<1x128xbf16>
      %c0_87 = arith.constant 0 : index
      %c0_88 = arith.constant 0 : index
      %260 = vector.load %arg5[%c0_87, %c0_88] : memref<128x384xbf16, #tpu.memory_space<vmem>>, vector<128x384xbf16>
      %cst_89 = arith.constant dense<0.000000e+00> : vector<1x384xf32>
      %261 = tpu.matmul %259, %260, %cst_89 {dimension_numbers = #tpu.dot_dimension_numbers<[1], [0], [0], [1], [0, 0, 1, 1], [], []>} : vector<1x128xbf16>, vector<128x384xbf16>, vector<1x384xf32> -> vector<1x384xf32>
      %c0_90 = arith.constant 0 : index
      %c0_91 = arith.constant 0 : index
      %262 = vector.load %arg7[%c0_90, %c0_91] : memref<1x384xf32, #tpu.memory_space<vmem>>, vector<1x384xf32>
      %263 = arith.addf %261, %262 : vector<1x384xf32>
      %264 = vector.extract_strided_slice %26 {offsets = [7, 0], sizes = [1, 384], strides = [1, 1]} : vector<8x384xf32> to vector<1x384xf32>
      %265 = vector.extract_strided_slice %264 {offsets = [0, 0], sizes = [1, 128], strides = [1, 1]} : vector<1x384xf32> to vector<1x128xf32>
      %266 = vector.extract_strided_slice %263 {offsets = [0, 0], sizes = [1, 128], strides = [1, 1]} : vector<1x384xf32> to vector<1x128xf32>
      %267 = arith.addf %265, %266 : vector<1x128xf32>
      %268 = arith.negf %267 : vector<1x128xf32>
      %269 = math.exp %268 : vector<1x128xf32>
      %cst_92 = arith.constant 1.000000e+00 : f32
      %270 = vector.broadcast %cst_92 : f32 to vector<1x128xf32>
      %271 = arith.addf %270, %269 : vector<1x128xf32>
      %272 = arith.divf %270, %271 : vector<1x128xf32>
      %273 = vector.extract_strided_slice %264 {offsets = [0, 128], sizes = [1, 128], strides = [1, 1]} : vector<1x384xf32> to vector<1x128xf32>
      %274 = vector.extract_strided_slice %263 {offsets = [0, 128], sizes = [1, 128], strides = [1, 1]} : vector<1x384xf32> to vector<1x128xf32>
      %275 = arith.addf %273, %274 : vector<1x128xf32>
      %276 = arith.negf %275 : vector<1x128xf32>
      %277 = math.exp %276 : vector<1x128xf32>
      %cst_93 = arith.constant 1.000000e+00 : f32
      %278 = vector.broadcast %cst_93 : f32 to vector<1x128xf32>
      %279 = arith.addf %278, %277 : vector<1x128xf32>
      %280 = arith.divf %278, %279 : vector<1x128xf32>
      %281 = vector.extract_strided_slice %264 {offsets = [0, 256], sizes = [1, 128], strides = [1, 1]} : vector<1x384xf32> to vector<1x128xf32>
      %282 = vector.extract_strided_slice %263 {offsets = [0, 256], sizes = [1, 128], strides = [1, 1]} : vector<1x384xf32> to vector<1x128xf32>
      %283 = arith.mulf %272, %282 : vector<1x128xf32>
      %284 = arith.addf %281, %283 : vector<1x128xf32>
      %285 = math.tanh %284 : vector<1x128xf32>
      %cst_94 = arith.constant 1.000000e+00 : f32
      %286 = vector.broadcast %cst_94 : f32 to vector<1x128xf32>
      %287 = arith.subf %286, %280 : vector<1x128xf32>
      %288 = arith.mulf %287, %285 : vector<1x128xf32>
      %289 = arith.mulf %280, %257 : vector<1x128xf32>
      %290 = arith.addf %288, %289 : vector<1x128xf32>
      %c7 = arith.constant 7 : index
      %c0_95 = arith.constant 0 : index
      %291 = vector.load %arg11[%c7, %c0_95] : memref<8x128xf32, #tpu.memory_space<vmem>>, vector<1x128xf32>
      tpu.vector_store %arg11[%c7, %c0_95], %290 {strides = array<i32>} : memref<8x128xf32, #tpu.memory_space<vmem>>, vector<1x128xf32>,
      %c0_96 = arith.constant 0 : index
      %c0_97 = arith.constant 0 : index
      %292 = vector.load %arg12[%c0_96, %c0_97] : memref<1x128xf32, #tpu.memory_space<vmem>>, vector<1x128xf32>
      tpu.vector_store %arg12[%c0_96, %c0_97], %290 {strides = array<i32>} : memref<1x128xf32, #tpu.memory_space<vmem>>, vector<1x128xf32>,
    } else {
    }
    %c0 = arith.constant 0 : index
    %c0_4 = arith.constant 0 : index
    %8 = vector.load %arg11[%c0, %c0_4] : memref<8x128xf32, #tpu.memory_space<vmem>>, vector<8x128xf32>
    %9 = arith.truncf %8 : vector<8x128xf32> to vector<8x128xbf16>
    %c0_5 = arith.constant 0 : index
    %c0_6 = arith.constant 0 : index
    %10 = vector.load %arg8[%c0_5, %c0_6] : memref<128x128xbf16, #tpu.memory_space<vmem>>, vector<128x128xbf16>
    %cst = arith.constant dense<0.000000e+00> : vector<8x128xf32>
    %11 = tpu.matmul %9, %10, %cst {dimension_numbers = #tpu.dot_dimension_numbers<[1], [0], [0], [1], [0, 0, 1, 1], [], []>} : vector<8x128xbf16>, vector<128x128xbf16>, vector<8x128xf32> -> vector<8x128xf32>
    %c0_7 = arith.constant 0 : index
    %c0_8 = arith.constant 0 : index
    %12 = vector.load %arg9[%c0_7, %c0_8] : memref<1x128xf32, #tpu.memory_space<vmem>>, vector<1x128xf32>
    %13 = vector.broadcast %12 : vector<1x128xf32> to vector<8x128xf32>
    %14 = arith.addf %11, %13 : vector<8x128xf32>
    %c0_9 = arith.constant 0 : index
    %c0_10 = arith.constant 0 : index
    %15 = vector.load %arg10[%c0_9, %c0_10] : memref<8x128xf32, #tpu.memory_space<vmem>>, vector<8x128xf32>
    tpu.vector_store %arg10[%c0_9, %c0_10], %14 {strides = array<i32>} : memref<8x128xf32, #tpu.memory_space<vmem>>, vector<8x128xf32>,
    %c0_i32_11 = arith.constant 0 : i32
    %16 = arith.cmpi eq, %arg1, %c0_i32_11 : i32
    %17 = arith.extui %16 : i1 to i32
    %c0_i32_12 = arith.constant 0 : i32
    %18 = arith.cmpi ne, %17, %c0_i32_12 : i32
    scf.if %18 {
      %c0_13 = arith.constant 0 : index
      %c0_14 = arith.constant 0 : index
      %19 = vector.load %arg10[%c0_13, %c0_14] : memref<8x128xf32, #tpu.memory_space<vmem>>, vector<8x128xf32>
      %cst_15 = arith.constant dense<0xFF800000> : vector<8xf32>
      %20 = vector.multi_reduction <maximumf>, %19, %cst_15 [1] : vector<8x128xf32> to vector<8xf32>
      %21 = vector.shape_cast %20 : vector<8xf32> to vector<8x1xf32>
      %22 = vector.broadcast %21 : vector<8x1xf32> to vector<8x128xf32>
      %23 = arith.subf %19, %22 : vector<8x128xf32>
      %24 = math.exp %23 : vector<8x128xf32>
      %cst_16 = arith.constant dense<0.000000e+00> : vector<8xf32>
      %25 = vector.multi_reduction <add>, %24, %cst_16 [1] : vector<8x128xf32> to vector<8xf32>
      %26 = vector.shape_cast %25 : vector<8xf32> to vector<8x1xf32>
      %27 = math.log %26 : vector<8x1xf32>
      %28 = arith.addf %21, %27 : vector<8x1xf32>
      %29 = vector.broadcast %28 : vector<8x1xf32> to vector<8x128xf32>
      %30 = arith.subf %19, %29 : vector<8x128xf32>
      %c0_17 = arith.constant 0 : index
      %c0_18 = arith.constant 0 : index
      %31 = vector.load %arg10[%c0_17, %c0_18] : memref<8x128xf32, #tpu.memory_space<vmem>>, vector<8x128xf32>
      tpu.vector_store %arg10[%c0_17, %c0_18], %30 {strides = array<i32>} : memref<8x128xf32, #tpu.memory_space<vmem>>, vector<8x128xf32>,
    } else {
    }
    return
  }
  func.func @transform_0(%arg0: i32, %arg1: i32) -> (i32, i32) {
    %c0_i32 = arith.constant 0 : i32
    %c0_i32_0 = arith.constant 0 : i32
    return %arg0, %c0_i32 : i32, i32
  }
  func.func @transform_1(%arg0: i32, %arg1: i32) -> (i32, i32) {
    %c0_i32 = arith.constant 0 : i32
    %c0_i32_0 = arith.constant 0 : i32
    %c0_i32_1 = arith.constant 0 : i32
    return %c0_i32, %c0_i32_0 : i32, i32
  }
  func.func @transform_2(%arg0: i32, %arg1: i32) -> (i32, i32) {
    %c0_i32 = arith.constant 0 : i32
    %c0_i32_0 = arith.constant 0 : i32
    %c0_i32_1 = arith.constant 0 : i32
    return %c0_i32, %c0_i32_0 : i32, i32
  }
  func.func @transform_3(%arg0: i32, %arg1: i32) -> (i32, i32) {
    %c0_i32 = arith.constant 0 : i32
    %c0_i32_0 = arith.constant 0 : i32
    %c0_i32_1 = arith.constant 0 : i32
    return %c0_i32, %c0_i32_0 : i32, i32
  }
  func.func @transform_4(%arg0: i32, %arg1: i32) -> (i32, i32) {
    %c0_i32 = arith.constant 0 : i32
    %c0_i32_0 = arith.constant 0 : i32
    %c0_i32_1 = arith.constant 0 : i32
    return %c0_i32, %c0_i32_0 : i32, i32
  }
  func.func @transform_5(%arg0: i32, %arg1: i32) -> (i32, i32) {
    %c0_i32 = arith.constant 0 : i32
    %c0_i32_0 = arith.constant 0 : i32
    %c0_i32_1 = arith.constant 0 : i32
    return %c0_i32, %c0_i32_0 : i32, i32
  }
  func.func @transform_6(%arg0: i32, %arg1: i32) -> (i32, i32) {
    %c0_i32 = arith.constant 0 : i32
    %c0_i32_0 = arith.constant 0 : i32
    return %c0_i32, %arg1 : i32, i32
  }
  func.func @transform_7(%arg0: i32, %arg1: i32) -> (i32, i32) {
    %c0_i32 = arith.constant 0 : i32
    %c0_i32_0 = arith.constant 0 : i32
    return %c0_i32, %arg1 : i32, i32
  }
  func.func @transform_8(%arg0: i32, %arg1: i32) -> (i32, i32) {
    %c0_i32 = arith.constant 0 : i32
    %c0_i32_0 = arith.constant 0 : i32
    return %arg0, %c0_i32 : i32, i32
  }
  func.func @transform_9(%arg0: i32, %arg1: i32) -> (i32, i32) {
    %c0_i32 = arith.constant 0 : i32
    %c0_i32_0 = arith.constant 0 : i32
    return %arg0, %c0_i32 : i32, i32
  }
}

</mosaic_0001>

<bundles_post_ra>
// kernel: tpu_custom_call.1
= control target key start
LH: loop header
LB: loop body
LE: loop exit
PB: predicated region body
PF: predicated region fallthrough
CT: control target
= control target key end

     0   :  { %15 = vsyncpa [#allocation4], 0  ;;  %s4312_s0 = inlined_call_operand.hbm [shape: bf16[8,128], index: 0, kind: input, shape index: {}]   ;;  %s4313_s1 = inlined_call_operand.vmem [shape: f32[1,128], index: 1, kind: input, shape index: {}]   ;;  %s4314_s2 = inlined_call_operand.hbm [shape: bf16[128,384], index: 2, kind: input, shape index: {}]   ;;  %s4315_s3 = inlined_call_operand.hbm [shape: bf16[128,384], index: 3, kind: input, shape index: {}]   ;;  %s4316_s4 = inlined_call_operand.vmem [shape: f32[1,384], index: 4, kind: input, shape index: {}]   ;;  %s4317_s5 = inlined_call_operand.vmem [shape: f32[1,384], index: 5, kind: input, shape index: {}]   ;;  %s4318_s6 = inlined_call_operand.hbm [shape: bf16[128,128], index: 6, kind: input, shape index: {}]   ;;  %s4319_s7 = inlined_call_operand.vmem [shape: f32[1,128], index: 7, kind: input, shape index: {}]   ;;  %s4320_s8 = inlined_call_operand.hbm [shape: f32[8,128], index: 8, kind: output, shape index: {0}]   ;;  %s4321_s9 = inlined_call_operand.hbm [shape: f32[8,128], index: 9, kind: output, shape index: {1}]  }
   0x1   :  { %16 = vsyncpa [#allocation7], 0 }
   0x2   :  { %17 = vsyncpa [#allocation10], 0 }
   0x3   :  { %18 = vsyncpa [#allocation5], 0 }
   0x4   :  { %19 = vsyncpa [#allocation13], 0  ;;  %s3786_s30 = smov [#allocation6]  }
   0x5   :  { %s37_s10 = sshll.u32 %s3786_s30, 4  ;;  %s38_s10 = int_to_ptr.vmem [resolvable:$true] %s37_s10 }
   0x6   :  { %s3664_s11 = scalar_lea.vmem %s38_s10, 3072  ;;  %p3669_p1 = scmp.lt.s32.totalorder %s38_s10, %s38_s10 }
   0x7   :  { %p3665_p0 = scmp.ne.s32.totalorder %s38_s10, %s3664_s11  ;;  %p3670_p2 = scmp.lt.s32.totalorder %s3664_s11, %s3664_s11 }
   0x9   :  { %p3671_p3 = por %p3670_p2, %p3669_p1 }
   0xb   :  { %p3672_p4 = pnand %p3671_p3, %p3665_p0 }
   0xd   :  { %3675 = shalt.err (!%p3672_p4)
}
   0xe   :  { %s3787_s12 = smov 192   ;;  %s3788_s13 = smov 12  }
   0xf   :  { %43 = dma.hbm_to_vmem [thread:$0]  %s4314_s2, 3072, %s38_s10, [#allocation7], %s3787_s12, %s3787_s12, %s3788_s13  }
  0x10   :  { %s3789_s16 = smov [#allocation3]   ;;  %s3790_s18 = smov [#allocation8]  }
  0x11   :  { %s26_s17 = sshll.u32 %s3789_s16, 4  ;;  %s49_s19 = sshll.u32 %s3790_s18, 4  ;;  %s27_s17 = int_to_ptr.vmem [resolvable:$true] %s26_s17  ;;  %s50_s19 = int_to_ptr.vmem [resolvable:$true] %s49_s19 }
  0x12   :  { %s3684_s20 = scalar_lea.vmem %s27_s17, 64  ;;  %p3689_p6 = scmp.lt.s32.totalorder %s27_s17, %s27_s17 }
  0x13   :  { %p3685_p5 = scmp.ne.s32.totalorder %s27_s17, %s3684_s20  ;;  %p3690_p7 = scmp.lt.s32.totalorder %s3684_s20, %s3684_s20 }
  0x15   :  { %p3691_p8 = por %p3690_p7, %p3689_p6 }
  0x17   :  { %p3692_p9 = pnand %p3691_p8, %p3685_p5 }
  0x19   :  { %3695 = shalt.err (!%p3692_p9)
}
  0x1a   :  { %29 = dma.hbm_to_vmem [thread:$0]  %s4312_s0, 64, %s27_s17, [#allocation4]  }
  0x1b   :  { %s3704_s23 = scalar_lea.vmem %s50_s19, 3072  ;;  %p3709_p11 = scmp.lt.s32.totalorder %s50_s19, %s50_s19 }
  0x1c   :  { %p3705_p10 = scmp.ne.s32.totalorder %s50_s19, %s3704_s23  ;;  %p3710_p12 = scmp.lt.s32.totalorder %s3704_s23, %s3704_s23 }
  0x1e   :  { %p3711_p13 = por %p3710_p12, %p3709_p11 }
  0x20   :  { %p3712_p0 = pnand %p3711_p13, %p3705_p10 }
  0x22   :  { %3715 = shalt.err (!%p3712_p0)
}
  0x23   :  { %55 = dma.hbm_to_vmem [thread:$0]  %s4315_s3, 3072, %s50_s19, [#allocation7], %s3787_s12, %s3787_s12, %s3788_s13  }
  0x24   :  { %s3791_s25 = smov [#allocation9]  }
  0x25   :  { %s65_s26 = sshll.u32 %s3791_s25, 4  ;;  %s66_s26 = int_to_ptr.vmem [resolvable:$true] %s65_s26 }
  0x26   :  { %s3724_s27 = scalar_lea.vmem %s66_s26, 1024  ;;  %p3729_p2 = scmp.lt.s32.totalorder %s66_s26, %s66_s26 }
  0x27   :  { %p3725_p1 = scmp.ne.s32.totalorder %s66_s26, %s3724_s27  ;;  %p3730_p3 = scmp.lt.s32.totalorder %s3724_s27, %s3724_s27 }
  0x29   :  { %p3731_p4 = por %p3730_p3, %p3729_p2 }
  0x2b   :  { %p3732_p5 = pnand %p3731_p4, %p3725_p1 }
  0x2d   :  { %3735 = shalt.err (!%p3732_p5)
}
  0x2e   :  { %s3792_s0 = smov 64   ;;  %s3793_s28 = smov 4  }
  0x2f   :  { %71 = dma.hbm_to_vmem [thread:$0]  %s4318_s6, 1024, %s66_s26, [#allocation10], %s3792_s0, %s3792_s0, %s3793_s28  }
  0x30   :  { %3776 = dma.done.wait [#allocation4], 64  }
  0x31   :  { %3777 = vsyncadd [#allocation4], 4294967232 }
  0x32   :  { %3778 = dma.done.wait [#allocation7], 6144  }
  0x33   :  { %3779 = vsyncadd [#allocation7], 4294961152 }
  0x34   :  { %3780 = dma.done.wait [#allocation10], 1024  }
  0x35   :  { %3781 = vsyncadd [#allocation10], 4294966272  ;;  %v3794_v0 = vmov 0.0   ;;  %v3795_v1 = vmov 0   ;;  %vm3796_vm0 = vmmov 0   ;;  %s3797_s26 = smov [#allocation12]  }
  0x36   :  { %3207 = vmatprep.subr.bf16.mxu1 %v3794_v0  ;;  %309 = vmatprep.mubr.bf16.mxu0 %v3795_v1  ;;  %v3420_v2 = vld [vmem:[#allocation6 + $0xac] ss:$12 sps:$4 sm:$0xff]   ;;  %v3422_v3 = vld [vmem:[#allocation6 + $0xa8] ss:$12 sps:$4 sm:$0xff]   ;;  %v3425_v5 = vld [vmem:[#allocation6 + $0x90] ss:$12 sps:$4 sm:$0xff]  }
  0x37   :  { %3223 = vmatprep.mubr.msk.bf16.mxu1 %vm3796_vm0, %v3794_v0  ;;  %277 = vmatprep.subr.bf16.mxu0 %v3420_v2  ;;  %v3423_v4 = vld [vmem:[#allocation6 + $0x94] ss:$12 sps:$4 sm:$0xff]   ;;  %v3426_v6 = vld [vmem:[#allocation6 + $0x7c] ss:$12 sps:$4 sm:$0xff]   ;;  %v3428_v7 = vld [vmem:[#allocation6 + $0x78] ss:$12 sps:$4 sm:$0xff]  }
  0x38   :  { %278 = vmatpush1.bf16.msra.mxu0 %v3422_v3  ;;  %v3429_v8 = vld [vmem:[#allocation6 + $0x64] ss:$12 sps:$4 sm:$0xff]   ;;  %v3431_v9 = vld [vmem:[#allocation6 + $0x60] ss:$12 sps:$4 sm:$0xff]   ;;  %v3434_v13 = vld [vmem:[#allocation6 + $0x48] ss:$12 sps:$4 sm:$0xff]  }
  0x39   :  { %279 = vmatprep.subr.bf16.mxu0 %v3423_v4  ;;  %v3444_v10 = vld [vmem:[#allocation6 + $0xb0] ss:$12 sps:$4 sm:$0xff]   ;;  %v3432_v11 = vld [vmem:[#allocation6 + $0x4c] ss:$12 sps:$4 sm:$0xff]   ;;  %v3435_v14 = vld [vmem:[#allocation6 + $0x34] ss:$12 sps:$4 sm:$0xff]  }
  0x3a   :  { %3208 = vmatpush3.bf16.msra.mxu1 %v3444_v10  ;;  %v3448_v12 = vld [vmem:[#allocation6 + $0x98] ss:$12 sps:$4 sm:$0xff]   ;;  %v3452_v15 = vld [vmem:[#allocation6 + $0x80] ss:$12 sps:$4 sm:$0xff]   ;;  %v3437_v16 = vld [vmem:[#allocation6 + $0x30] ss:$12 sps:$4 sm:$0xff]  }
  0x3b   :  { %3209 = vmatprep.subr.bf16.mxu1 %v3794_v0  ;;  %v3438_v17 = vld [vmem:[#allocation6 + $0x1c] ss:$12 sps:$4 sm:$0xff]   ;;  %v3440_v19 = vld [vmem:[#allocation6 + $0x18] ss:$12 sps:$4 sm:$0xff]   ;;  %v3443_v22 = vld [vmem:[#allocation6] ss:$12 sps:$4 sm:$0xff]  }
  0x3c   :  { %280 = vmatpush1.bf16.msra.mxu0 %v3425_v5  ;;  %v3456_v18 = vld [vmem:[#allocation6 + $0x68] ss:$12 sps:$4 sm:$0xff]   ;;  %v3441_v20 = vld [vmem:[#allocation6 + $0x4] ss:$12 sps:$4 sm:$0xff]   ;;  %v98_v23 = vld [vmem:[#allocation3] sm:$0xf] }
  0x3d   :  { %281 = vmatprep.subr.bf16.mxu0 %v3426_v6  ;;  %v3460_v21 = vld [vmem:[#allocation6 + $0x50] ss:$12 sps:$4 sm:$0xff]   ;;  %v3869_v24 = vld [vmem:[#allocation8 + $0xac] ss:$12 sps:$4 sm:$0xff]   ;;  %v99_v26 = vmax.bf16 %v3795_v1, %v98_v23  ;;  %v3876_v28 = vld [vmem:[#allocation8 + $0xa8] ss:$12 sps:$4 sm:$0xff]  }
  0x3e   :  { %3210 = vmatpush3.bf16.msra.mxu1 %v3448_v12  ;;  %v3464_v25 = vld [vmem:[#allocation6 + $0x38] ss:$12 sps:$4 sm:$0xff]   ;;  %v3879_v29 = vld [vmem:[#allocation8 + $0x94] ss:$12 sps:$4 sm:$0xff]   ;;  %v3883_v31 = vld [vmem:[#allocation8 + $0x90] ss:$12 sps:$4 sm:$0xff]  }
  0x3f   :  { %3211 = vmatprep.subr.bf16.mxu1 %v3794_v0  ;;  %v93_v27 = vld [vmem:[%s4313_s1] sm:$0x1]  ;;  %v3468_v30 = vld [vmem:[#allocation6 + $0x20] ss:$12 sps:$4 sm:$0xff]   ;;  %v3887_v32 = vld [vmem:[#allocation8 + $0x7c] ss:$12 sps:$4 sm:$0xff]  }
  0x40   :  { %282 = vmatpush1.bf16.msra.mxu0 %v3428_v7  ;;  %94 = vst [vmem:[#allocation2] sm:$0x1] %v93_v27  ;;  %v3472_v33 = vld [vmem:[#allocation6 + $0x8] ss:$12 sps:$4 sm:$0xff]   ;;  %v3889_v34 = vld [vmem:[#allocation8 + $0x78] ss:$12 sps:$4 sm:$0xff]  }
  0x41   :  { %283 = vmatprep.subr.bf16.mxu0 %v3429_v8  ;;  %v3891_v35 = vld [vmem:[#allocation8 + $0x64] ss:$12 sps:$4 sm:$0xff]   ;;  %v3896_v37 = vld [vmem:[#allocation8 + $0x60] ss:$12 sps:$4 sm:$0xff]   ;;  %v3903_v40 = vld [vmem:[#allocation8 + $0x48] ss:$12 sps:$4 sm:$0xff]  }
  0x42   :  { %3212 = vmatpush3.bf16.msra.mxu1 %v3452_v15  ;;  %v3476_v36 = vld [vmem:[#allocation8 + $0xb0] ss:$12 sps:$4 sm:$0xff]   ;;  %v3898_v38 = vld [vmem:[#allocation8 + $0x4c] ss:$12 sps:$4 sm:$0xff]   ;;  %v3907_v41 = vld [vmem:[#allocation8 + $0x34] ss:$12 sps:$4 sm:$0xff]  }
  0x43   :  { %3213 = vmatprep.subr.bf16.mxu1 %v3794_v0  ;;  %v3477_v39 = vld [vmem:[#allocation8 + $0x98] ss:$12 sps:$4 sm:$0xff]   ;;  %v3478_v42 = vld [vmem:[#allocation8 + $0x80] ss:$12 sps:$4 sm:$0xff]   ;;  %v3912_v43 = vld [vmem:[#allocation8 + $0x30] ss:$12 sps:$4 sm:$0xff]  }
  0x44   :  { %284 = vmatpush1.bf16.msra.mxu0 %v3431_v9  ;;  %v3914_v44 = vld [vmem:[#allocation8 + $0x1c] ss:$12 sps:$4 sm:$0xff]   ;;  %v3919_v46 = vld [vmem:[#allocation8 + $0x18] ss:$12 sps:$4 sm:$0xff]   ;;  %v3926_v49 = vld [vmem:[#allocation8] ss:$12 sps:$4 sm:$0xff]   ;;  %v134_v9 = vlaneseq }
  0x45   :  { %285 = vmatprep.subr.bf16.mxu0 %v3432_v11  ;;  %v3479_v45 = vld [vmem:[#allocation8 + $0x68] ss:$12 sps:$4 sm:$0xff]   ;;  %v3921_v47 = vld [vmem:[#allocation8 + $0x4] ss:$12 sps:$4 sm:$0xff]   ;;  %v3482_v53 = vld [vmem:[#allocation8 + $0x20] ss:$12 sps:$4 sm:$0xff]  }
  0x46   :  { %3214 = vmatpush3.bf16.msra.mxu1 %v3456_v18  ;;  %v3480_v48 = vld [vmem:[#allocation8 + $0x50] ss:$12 sps:$4 sm:$0xff]   ;;  %v3481_v51 = vld [vmem:[#allocation8 + $0x38] ss:$12 sps:$4 sm:$0xff]   ;;  %v3483_v54 = vld [vmem:[#allocation8 + $0x8] ss:$12 sps:$4 sm:$0xff]  }
  0x47   :  { %3215 = vmatprep.subr.bf16.mxu1 %v3794_v0  ;;  %v3928_v50 = vld [vmem:[#allocation2] sm:$0x1]  ;;  %v3484_v55 = vld [vmem:[#allocation8 + $0xb0] ss:$12 sps:$4 sm:$0xff]   ;;  %v3486_v57 = vld [vmem:[#allocation8 + $0x80] ss:$12 sps:$4 sm:$0xff]  }
  0x48   :  { %286 = vmatpush1.bf16.msra.mxu0 %v3434_v13  ;;  %v359_v52 = vpack.c.bf16 %v3928_v50, %v3928_v50  ;;  %v3485_v56 = vld [vmem:[#allocation8 + $0x98] ss:$12 sps:$4 sm:$0xff]   ;;  %v3487_v58 = vld [vmem:[#allocation8 + $0x68] ss:$12 sps:$4 sm:$0xff]   ;;  %v3488_v59 = vld [vmem:[#allocation8 + $0x50] ss:$12 sps:$4 sm:$0xff]  }
  0x49   :  { %287 = vmatprep.subr.bf16.mxu0 %v3435_v14  ;;  %v3489_v60 = vld [vmem:[#allocation8 + $0x38] ss:$12 sps:$4 sm:$0xff]   ;;  %v3490_v61 = vld [vmem:[#allocation8 + $0x20] ss:$12 sps:$4 sm:$0xff]   ;;  %v3491_v62 = vld [vmem:[#allocation8 + $0x8] ss:$12 sps:$4 sm:$0xff]  }
  0x4a   :  { %3216 = vmatpush3.bf16.msra.mxu1 %v3460_v21  ;;  %v135_v10 = vshrl.u32 %v134_v9, 7  ;;  %v132_v12 = vld [vmem:[%s4316_s4] sm:$0x7]  ;;  %s2861_s27 = sshll.u32 %s3797_s26, 4  ;;  %s2862_s27 = int_to_ptr.vmem [resolvable:$true] %s2861_s27 }
  0x4b   :  { %3217 = vmatprep.subr.bf16.mxu1 %v3794_v0  ;;  %v392_v13 = vld [vmem:[%s4317_s5] sm:$0x7]  ;;  %s3736_s0 = scalar_lea.vmem %s2862_s27, 128  ;;  %p3741_p7 = scmp.lt.s32.totalorder %s2862_s27, %s2862_s27 }
  0x4c   :  { %288 = vmatpush1.bf16.msra.mxu0 %v3437_v16  ;;  %v3968_v11 = vsub.s32 0, %v135_v10  ;;  %v3978_v16 = vsub.s32 1, %v135_v10  ;;  %p3737_p6 = scmp.ne.s32.totalorder %s2862_s27, %s3736_s0  ;;  %p3742_p8 = scmp.lt.s32.totalorder %s3736_s0, %s3736_s0 }
  0x4d   :  { %289 = vmatprep.subr.bf16.mxu0 %v3438_v17 }
  0x4e   :  { %3218 = vmatpush3.bf16.msra.mxu1 %v3464_v25  ;;  %v137_v14 = vrot.slane %v132_v12, %v3968_v11  ;;  %v525_v15 = vrot.slane %v392_v13, %v3968_v11  ;;  %p3743_p9 = por %p3742_p8, %p3741_p7 }
  0x4f   :  { %3219 = vmatprep.subr.bf16.mxu1 %v3794_v0 }
  0x50   :  { %290 = vmatpush1.bf16.msra.mxu0 %v3440_v19  ;;  %p3744_p10 = pnand %p3743_p9, %p3737_p6 }
  0x51   :  { %291 = vmatprep.subr.bf16.mxu0 %v3441_v20  ;;  %v529_v20 = vrot.slane %v392_v13, %v3978_v16 }
  0x52   :  { %3220 = vmatpush3.bf16.msra.mxu1 %v3468_v30 }
  0x53   :  { %3221 = vmatprep.subr.bf16.mxu1 %v3794_v0 }
  0x54   :  { %292 = vmatpush1.bf16.msra.mxu0 %v3443_v22  ;;  %v141_v22 = vrot.slane %v132_v12, %v3978_v16 }
  0x55   :  { %537 = vmatprep.subr.bf16.mxu0 %v3869_v24 }
  0x56   :  { %3222 = vmatpush3.bf16.msra.mxu1 %v3472_v33 }
  0x57   :  { %310 = vmatmul.mubr.bf16.vlgmr.msra.gmra.mxu0 %v99_v26  ;;  %3227 = vmatprep.subr.bf16.mxu1 %v3794_v0 }
  0x58   :  { %538 = vmatpush1.bf16.msra.mxu0 %v3876_v28  ;;  %569 = vmatprep.mubr.bf16.mxu0 %v3795_v1 }
  0x59   :  { %539 = vmatprep.subr.bf16.mxu0 %v3879_v29  ;;  %3224 = vmatmul.mubr.bf16.vlgmr.msra.gmra.mxu1 %v99_v26 }
  0x5a   :  { %3228 = vmatpush3.bf16.msra.mxu1 %v3476_v36  ;;  %3243 = vmatprep.mubr.msk.bf16.mxu1 %vm3796_vm0, %v3794_v0 }
  0x5b   :  { %3229 = vmatprep.subr.bf16.mxu1 %v3794_v0 }
  0x5c   :  { %540 = vmatpush1.bf16.msra.mxu0 %v3883_v31 }
  0x5d   :  { %541 = vmatprep.subr.bf16.mxu0 %v3887_v32 }
  0x5e   :  { %3230 = vmatpush3.bf16.msra.mxu1 %v3477_v39 }
  0x5f   :  { %3231 = vmatprep.subr.bf16.mxu1 %v3794_v0 }
  0x60   :  { %542 = vmatpush1.bf16.msra.mxu0 %v3889_v34 }
  0x61   :  { %543 = vmatprep.subr.bf16.mxu0 %v3891_v35 }
  0x62   :  { %3232 = vmatpush3.bf16.msra.mxu1 %v3478_v42 }
  0x63   :  { %3233 = vmatprep.subr.bf16.mxu1 %v3794_v0 }
  0x64   :  { %544 = vmatpush1.bf16.msra.mxu0 %v3896_v37 }
  0x65   :  { %545 = vmatprep.subr.bf16.mxu0 %v3898_v38 }
  0x66   :  { %3234 = vmatpush3.bf16.msra.mxu1 %v3479_v45 }
  0x67   :  { %3235 = vmatprep.subr.bf16.mxu1 %v3794_v0 }
  0x68   :  { %546 = vmatpush1.bf16.msra.mxu0 %v3903_v40 }
  0x69   :  { %547 = vmatprep.subr.bf16.mxu0 %v3907_v41 }
  0x6a   :  { %3236 = vmatpush3.bf16.msra.mxu1 %v3480_v48 }
  0x6b   :  { %3237 = vmatprep.subr.bf16.mxu1 %v3794_v0 }
  0x6c   :  { %548 = vmatpush1.bf16.msra.mxu0 %v3912_v43 }
  0x6d   :  { %549 = vmatprep.subr.bf16.mxu0 %v3914_v44 }
  0x6e   :  { %3238 = vmatpush3.bf16.msra.mxu1 %v3481_v51 }
  0x6f   :  { %3239 = vmatprep.subr.bf16.mxu1 %v3794_v0 }
  0x70   :  { %550 = vmatpush1.bf16.msra.mxu0 %v3919_v46 }
  0x71   :  { %551 = vmatprep.subr.bf16.mxu0 %v3921_v47 }
  0x72   :  { %3240 = vmatpush3.bf16.msra.mxu1 %v3482_v53 }
  0x73   :  { %3241 = vmatprep.subr.bf16.mxu1 %v3794_v0 }
  0x74   :  { %552 = vmatpush1.bf16.msra.mxu0 %v3926_v49 }
  0x75   :  { %818 = vmatprep.subr.bf16.mxu0 %v3869_v24 }
  0x76   :  { %3242 = vmatpush3.bf16.msra.mxu1 %v3483_v54  ;;  %v3988_v54 = vsub.s32 2, %v135_v10  ;;  %v3494_v10 = vld [vmem:[#allocation8 + $0x80] ss:$12 sps:$4 sm:$0xff]  }
  0x77   :  { %570 = vmatmul.mubr.bf16.vlgmr.msra.gmra.mxu0 %v359_v52  ;;  %3247 = vmatprep.subr.bf16.mxu1 %v3794_v0 }
  0x78   :  { %819 = vmatpush1.bf16.msra.mxu0 %v3876_v28  ;;  %850 = vmatprep.mubr.bf16.mxu0 %v3795_v1 }
  0x79   :  { %820 = vmatprep.subr.bf16.mxu0 %v3879_v29  ;;  %3244 = vmatmul.mubr.bf16.vlgmr.msra.gmra.mxu1 %v359_v52 }
  0x7a   :  { %3263 = vmatprep.mubr.msk.bf16.mxu1 %vm3796_vm0, %v3794_v0  ;;  %3248 = vmatpush3.bf16.msra.mxu1 %v3484_v55  ;;  %v533_v55 = vrot.slane %v392_v13, %v3988_v54  ;;  %v3496_v13 = vld [vmem:[#allocation8 + $0x50] ss:$12 sps:$4 sm:$0xff]  }
  0x7b   :  { %3249 = vmatprep.subr.bf16.mxu1 %v3794_v0 }
  0x7c   :  { %821 = vmatpush1.bf16.msra.mxu0 %v3883_v31 }
  0x7d   :  { %822 = vmatprep.subr.bf16.mxu0 %v3887_v32 }
  0x7e   :  { %3250 = vmatpush3.bf16.msra.mxu1 %v3485_v56 }
  0x7f   :  { %3251 = vmatprep.subr.bf16.mxu1 %v3794_v0 }
  0x80   :  { %823 = vmatpush1.bf16.msra.mxu0 %v3889_v34 }
  0x81   :  { %824 = vmatprep.subr.bf16.mxu0 %v3891_v35 }
  0x82   :  { %3252 = vmatpush3.bf16.msra.mxu1 %v3486_v57  ;;  %v145_v57 = vrot.slane %v132_v12, %v3988_v54  ;;  %v3495_v12 = vld [vmem:[#allocation8 + $0x68] ss:$12 sps:$4 sm:$0xff]  }
  0x83   :  { %3253 = vmatprep.subr.bf16.mxu1 %v3794_v0 }
  0x84   :  { %825 = vmatpush1.bf16.msra.mxu0 %v3896_v37 }
  0x85   :  { %826 = vmatprep.subr.bf16.mxu0 %v3898_v38 }
  0x86   :  { %3254 = vmatpush3.bf16.msra.mxu1 %v3487_v58 }
  0x87   :  { %3255 = vmatprep.subr.bf16.mxu1 %v3794_v0 }
  0x88   :  { %827 = vmatpush1.bf16.msra.mxu0 %v3903_v40 }
  0x89   :  { %828 = vmatprep.subr.bf16.mxu0 %v3907_v41 }
  0x8a   :  { %3256 = vmatpush3.bf16.msra.mxu1 %v3488_v59 }
  0x8b   :  { %3257 = vmatprep.subr.bf16.mxu1 %v3794_v0 }
  0x8c   :  { %829 = vmatpush1.bf16.msra.mxu0 %v3912_v43 }
  0x8d   :  { %830 = vmatprep.subr.bf16.mxu0 %v3914_v44 }
  0x8e   :  { %3258 = vmatpush3.bf16.msra.mxu1 %v3489_v60 }
  0x8f   :  { %3259 = vmatprep.subr.bf16.mxu1 %v3794_v0 }
  0x90   :  { %831 = vmatpush1.bf16.msra.mxu0 %v3919_v46 }
  0x91   :  { %832 = vmatprep.subr.bf16.mxu0 %v3921_v47 }
  0x92   :  { %3260 = vmatpush3.bf16.msra.mxu1 %v3490_v61 }
  0x93   :  { %3261 = vmatprep.subr.bf16.mxu1 %v3794_v0 }
  0x94   :  { %833 = vmatpush1.bf16.msra.mxu0 %v3926_v49 }
  0x95   :  { %1115 = vmatprep.subr.bf16.mxu0 %v3869_v24 }
  0x96   :  { %3262 = vmatpush3.bf16.msra.mxu1 %v3491_v62 }
  0x97   :  { %3267 = vmatprep.subr.bf16.mxu1 %v3794_v0 }
 0x117   :  { %v311_v63 = vpop.f32.mrf.mxu0 }
 0x118   :  { %v3980_v18 = vadd.f32 %v311_v63, %v137_v14  ;;  %v3497_v14 = vld [vmem:[#allocation8 + $0x38] ss:$12 sps:$4 sm:$0xff]  }
 0x119   :  { %v313_v2 = vpop.f32.mrf.mxu0  ;;  %v352_v5 = vpop.f32.mrf.mxu1 }
 0x11a   :  { %v3985_v33 = vadd.f32 %v313_v2, %v141_v22  ;;  %v3992_v61 = vadd.f32 %v352_v5, %v145_v57  ;;  %v3493_v5 = vld [vmem:[#allocation8 + $0x98] ss:$12 sps:$4 sm:$0xff]  }
 0x11b   :  { %v315_v3 = vpop.f32.mrf.mxu0  ;;  %v3225_v6 = vpop.f32.mrf.mxu1 }
 0x11d   :  { %v316_v4 = vpop.f32.mrf.mxu0  ;;  %v355_v7 = vpop.f32.mrf.mxu1 }
 0x11f   :  { %v3226_v8 = vpop.f32.mrf.mxu1 }
 0x137   :  { %v571_v17 = vpop.f32.mrf.mxu0 }
 0x138   :  { %v572_v19 = vadd.f32 %v571_v17, %v525_v15  ;;  %v3499_v15 = vld [vmem:[#allocation8 + $0x8] ss:$12 sps:$4 sm:$0xff]   ;;  %v673_v17 = vld [vmem:[%s4317_s5] sm:$0x7] }
 0x139   :  { %v573_v21 = vpop.f32.mrf.mxu0  ;;  %v612_v39 = vpop.f32.mrf.mxu1 }
 0x13a   :  { %v618_v23 = vadd.f32 %v572_v19, %v3980_v18  ;;  %v574_v27 = vadd.f32 %v573_v21, %v529_v20  ;;  %v613_v59 = vadd.f32 %v612_v39, %v533_v55  ;;  %v806_v19 = vrot.slane %v673_v17, %v3968_v11 }
 0x13b   :  { %v575_v25 = vpop.f32.mrf.mxu0  ;;  %v3245_v42 = vpop.f32.mrf.mxu1  ;;  %v810_v20 = vrot.slane %v673_v17, %v3978_v16 }
 0x13c   :  { %v2924_v26 = vmul.f32 -1.442695, %v618_v23  ;;  %v625_v36 = vadd.f32 %v574_v27, %v3985_v33 }
 0x13d   :  { %v576_v30 = vpop.f32.mrf.mxu0  ;;  %v615_v48 = vpop.f32.mrf.mxu1 }
 0x13e   :  { %3572 = vpow2.f32 %v2924_v26  ;;  %v2925_v45 = vmul.f32 -1.442695, %v625_v36 }
 0x13f   :  { %v3246_v51 = vpop.f32.mrf.mxu1 }
 0x140   :  { %3574 = vpow2.f32 %v2925_v45 }
 0x14b   :  { %v3573_v52 = vpop.eup %3572 }
 0x14c   :  { %v622_v53 = vadd.f32 1.0, %v3573_v52 }
 0x14d   :  { %v3575_v56 = vpop.eup %3574 }
 0x14e   :  { %3576 = vrcp.f32 %v622_v53  ;;  %v629_v58 = vadd.f32 1.0, %v3575_v56 }
 0x150   :  { %3578 = vrcp.f32 %v629_v58  ;;  %v814_v58 = vrot.slane %v673_v17, %v3988_v54 }
 0x15b   :  { %v3577_v60 = vpop.eup %3576 }
 0x15c   :  { %v632_v62 = vmul.f32 %v3577_v60, %v613_v59 }
 0x15d   :  { %v3579_v2 = vpop.eup %3578 }
 0x15e   :  { %v633_v63 = vadd.f32 %v632_v62, %v3992_v61  ;;  %v635_v3 = vsub.f32 1.0, %v3579_v2  ;;  %v637_v7 = vmul.f32 %v3579_v2, %v3928_v50  ;;  %v3492_v50 = vld [vmem:[#allocation8 + $0xb0] ss:$12 sps:$4 sm:$0xff]  }
 0x160   :  { %3580 = vtanh.f32 %v633_v63 }
 0x16d   :  { %v3581_v4 = vpop.eup %3580 }
 0x16e   :  { %v636_v6 = vmul.f32 %v3581_v4, %v635_v3 }
 0x170   :  { %v3996_v8 = vadd.f32 %v637_v7, %v636_v6 }
 0x172   :  { %639 = vst [vmem:[#allocation12] sm:$0x1] %v3996_v8  ;;  %v640_v9 = vpack.c.bf16 %v3996_v8, %v3996_v8 }
 0x174   :  { %851 = vmatmul.mubr.bf16.vlgmr.msra.gmra.mxu0 %v640_v9  ;;  %3264 = vmatmul.mubr.bf16.vlgmr.msra.gmra.mxu1 %v640_v9  ;;  %v928_v9 = vrot.slane %v3996_v8, 7 }
 0x175   :  { %1116 = vmatpush1.bf16.msra.mxu0 %v3876_v28  ;;  %1147 = vmatprep.mubr.bf16.mxu0 %v3795_v1 }
 0x176   :  { %1117 = vmatprep.subr.bf16.mxu0 %v3879_v29  ;;  %3283 = vmatprep.mubr.msk.bf16.mxu1 %vm3796_vm0, %v3794_v0 }
 0x177   :  { %3268 = vmatpush3.bf16.msra.mxu1 %v3492_v50 }
 0x178   :  { %3269 = vmatprep.subr.bf16.mxu1 %v3794_v0 }
 0x179   :  { %1118 = vmatpush1.bf16.msra.mxu0 %v3883_v31 }
 0x17a   :  { %1119 = vmatprep.subr.bf16.mxu0 %v3887_v32 }
 0x17b   :  { %3270 = vmatpush3.bf16.msra.mxu1 %v3493_v5 }
 0x17c   :  { %3271 = vmatprep.subr.bf16.mxu1 %v3794_v0 }
 0x17d   :  { %1120 = vmatpush1.bf16.msra.mxu0 %v3889_v34 }
 0x17e   :  { %1121 = vmatprep.subr.bf16.mxu0 %v3891_v35 }
 0x17f   :  { %3272 = vmatpush3.bf16.msra.mxu1 %v3494_v10 }
 0x180   :  { %3273 = vmatprep.subr.bf16.mxu1 %v3794_v0 }
 0x181   :  { %1122 = vmatpush1.bf16.msra.mxu0 %v3896_v37 }
 0x182   :  { %1123 = vmatprep.subr.bf16.mxu0 %v3898_v38 }
 0x183   :  { %3274 = vmatpush3.bf16.msra.mxu1 %v3495_v12 }
 0x184   :  { %3275 = vmatprep.subr.bf16.mxu1 %v3794_v0 }
 0x185   :  { %1124 = vmatpush1.bf16.msra.mxu0 %v3903_v40 }
 0x186   :  { %1125 = vmatprep.subr.bf16.mxu0 %v3907_v41 }
 0x187   :  { %3276 = vmatpush3.bf16.msra.mxu1 %v3496_v13 }
 0x188   :  { %3277 = vmatprep.subr.bf16.mxu1 %v3794_v0 }
 0x189   :  { %1126 = vmatpush1.bf16.msra.mxu0 %v3912_v43 }
 0x18a   :  { %1127 = vmatprep.subr.bf16.mxu0 %v3914_v44 }
 0x18b   :  { %3278 = vmatpush3.bf16.msra.mxu1 %v3497_v14 }
 0x18c   :  { %3279 = vmatprep.subr.bf16.mxu1 %v3794_v0 }
 0x18d   :  { %1128 = vmatpush1.bf16.msra.mxu0 %v3919_v46 }
 0x18e   :  { %1129 = vmatprep.subr.bf16.mxu0 %v3921_v47 }
 0x191   :  { %1130 = vmatpush1.bf16.msra.mxu0 %v3926_v49 }
 0x192   :  { %1411 = vmatprep.subr.bf16.mxu0 %v3869_v24  ;;  %v3498_v24 = vld [vmem:[#allocation8 + $0x20] ss:$12 sps:$4 sm:$0xff]  }
 0x193   :  { %3280 = vmatpush3.bf16.msra.mxu1 %v3498_v24 }
 0x194   :  { %3281 = vmatprep.subr.bf16.mxu1 %v3794_v0 }
 0x197   :  { %3282 = vmatpush3.bf16.msra.mxu1 %v3499_v15 }
 0x198   :  { %3287 = vmatprep.subr.bf16.mxu1 %v3794_v0 }
 0x234   :  { %v852_v21 = vpop.f32.mrf.mxu0  ;;  %v893_v22 = vpop.f32.mrf.mxu1 }
 0x235   :  { %v853_v23 = vadd.f32 %v852_v21, %v806_v19  ;;  %v894_v60 = vadd.f32 %v893_v22, %v814_v58 }
 0x236   :  { %v854_v25 = vpop.f32.mrf.mxu0  ;;  %v3265_v26 = vpop.f32.mrf.mxu1 }
 0x237   :  { %v900_v27 = vrot.slane %v853_v23, 7  ;;  %v855_v30 = vadd.f32 %v854_v25, %v810_v20  ;;  %v920_v63 = vrot.slane %v894_v60, 7 }
 0x238   :  { %v856_v36 = vpop.f32.mrf.mxu0  ;;  %v896_v39 = vpop.f32.mrf.mxu1 }
 0x239   :  { %v902_v42 = vadd.f32 %v900_v27, %v3980_v18  ;;  %v910_v52 = vrot.slane %v855_v30, 7 }
 0x23a   :  { %v857_v45 = vpop.f32.mrf.mxu0  ;;  %v3266_v48 = vpop.f32.mrf.mxu1 }
 0x23b   :  { %v2950_v51 = vmul.f32 -1.442695, %v902_v42  ;;  %v912_v53 = vadd.f32 %v910_v52, %v3985_v33 }
 0x23d   :  { %3582 = vpow2.f32 %v2950_v51  ;;  %v2951_v55 = vmul.f32 -1.442695, %v912_v53 }
 0x23f   :  { %3584 = vpow2.f32 %v2951_v55 }
 0x24a   :  { %v3583_v56 = vpop.eup %3582 }
 0x24b   :  { %v906_v57 = vadd.f32 1.0, %v3583_v56 }
 0x24c   :  { %v3585_v59 = vpop.eup %3584 }
 0x24d   :  { %3586 = vrcp.f32 %v906_v57  ;;  %v916_v62 = vadd.f32 1.0, %v3585_v59 }
 0x24f   :  { %3588 = vrcp.f32 %v916_v62 }
 0x25a   :  { %v3587_v2 = vpop.eup %3586 }
 0x25b   :  { %v922_v3 = vmul.f32 %v3587_v2, %v920_v63 }
 0x25c   :  { %v3589_v6 = vpop.eup %3588 }
 0x25d   :  { %v923_v4 = vadd.f32 %v922_v3, %v3992_v61  ;;  %v925_v7 = vsub.f32 1.0, %v3589_v6  ;;  %v930_v10 = vmul.f32 %v3589_v6, %v928_v9  ;;  %v4089_v6 = vld [vmem:[#allocation8 + $0xa8] ss:$12 sps:$4 sm:$0xff]  }
 0x25e   :  { %v4093_v9 = vld [vmem:[#allocation8 + $0x94] ss:$12 sps:$4 sm:$0xff]  }
 0x25f   :  { %3590 = vtanh.f32 %v923_v4  ;;  %v4087_v4 = vld [vmem:[#allocation8 + $0xac] ss:$12 sps:$4 sm:$0xff]  }
 0x26c   :  { %v3591_v50 = vpop.eup %3590 }
 0x26d   :  { %v926_v5 = vmul.f32 %v3591_v50, %v925_v7  ;;  %v3511_v7 = vld [vmem:[#allocation8 + $0xb0] ss:$12 sps:$4 sm:$0xff]  }
 0x26e   :  { %v4096_v50 = vld [vmem:[#allocation8 + $0x90] ss:$12 sps:$4 sm:$0xff]  }
 0x26f   :  { %v4038_v12 = vadd.f32 %v930_v10, %v926_v5  ;;  %v3515_v5 = vld [vmem:[#allocation8 + $0x98] ss:$12 sps:$4 sm:$0xff]   ;;  %v4100_v10 = vld [vmem:[#allocation8 + $0x7c] ss:$12 sps:$4 sm:$0xff]  }
 0x271   :  { %932 = vst [vmem:[#allocation12] sm:$0x2] %v4038_v12  ;;  %v933_v13 = vpack.c.bf16 %v4038_v12, %v4038_v12  ;;  %v1225_v58 = vrot.slane %v4038_v12, 7  ;;  %v4103_v12 = vld [vmem:[#allocation8 + $0x78] ss:$12 sps:$4 sm:$0xff]  }
 0x273   :  { %v968_v14 = vshrl.u32 %v933_v13, 16  ;;  %v3519_v13 = vld [vmem:[#allocation8 + $0x80] ss:$12 sps:$4 sm:$0xff]  }
 0x275   :  { %1148 = vmatmul.mubr.bf16.vlgmr.msra.gmra.mxu0 %v968_v14  ;;  %3284 = vmatmul.mubr.bf16.vlgmr.msra.gmra.mxu1 %v968_v14  ;;  %v4106_v14 = vld [vmem:[#allocation8 + $0x64] ss:$12 sps:$4 sm:$0xff]  }
 0x276   :  { %1412 = vmatpush1.bf16.msra.mxu0 %v3876_v28  ;;  %1443 = vmatprep.mubr.bf16.mxu0 %v3795_v1  ;;  %v3500_v28 = vld [vmem:[#allocation8 + $0xb0] ss:$12 sps:$4 sm:$0xff]  }
 0x277   :  { %1413 = vmatprep.subr.bf16.mxu0 %v3879_v29  ;;  %3303 = vmatprep.mubr.msk.bf16.mxu1 %vm3796_vm0, %v3794_v0  ;;  %v3501_v29 = vld [vmem:[#allocation8 + $0x98] ss:$12 sps:$4 sm:$0xff]  }
 0x278   :  { %3288 = vmatpush3.bf16.msra.mxu1 %v3500_v28  ;;  %v4109_v28 = vld [vmem:[#allocation8 + $0x60] ss:$12 sps:$4 sm:$0xff]  }
 0x279   :  { %3289 = vmatprep.subr.bf16.mxu1 %v3794_v0 }
 0x27a   :  { %1414 = vmatpush1.bf16.msra.mxu0 %v3883_v31  ;;  %v3502_v31 = vld [vmem:[#allocation8 + $0x80] ss:$12 sps:$4 sm:$0xff]  }
 0x27b   :  { %1415 = vmatprep.subr.bf16.mxu0 %v3887_v32  ;;  %v3503_v32 = vld [vmem:[#allocation8 + $0x68] ss:$12 sps:$4 sm:$0xff]  }
 0x27c   :  { %3290 = vmatpush3.bf16.msra.mxu1 %v3501_v29  ;;  %v3523_v29 = vld [vmem:[#allocation8 + $0x68] ss:$12 sps:$4 sm:$0xff]  }
 0x27d   :  { %3291 = vmatprep.subr.bf16.mxu1 %v3794_v0 }
 0x27e   :  { %1416 = vmatpush1.bf16.msra.mxu0 %v3889_v34  ;;  %v3504_v34 = vld [vmem:[#allocation8 + $0x50] ss:$12 sps:$4 sm:$0xff]  }
 0x27f   :  { %1417 = vmatprep.subr.bf16.mxu0 %v3891_v35  ;;  %v3505_v35 = vld [vmem:[#allocation8 + $0x38] ss:$12 sps:$4 sm:$0xff]  }
 0x280   :  { %3292 = vmatpush3.bf16.msra.mxu1 %v3502_v31  ;;  %v4113_v31 = vld [vmem:[#allocation8 + $0x4c] ss:$12 sps:$4 sm:$0xff]  }
 0x281   :  { %3293 = vmatprep.subr.bf16.mxu1 %v3794_v0 }
 0x282   :  { %1418 = vmatpush1.bf16.msra.mxu0 %v3896_v37  ;;  %v3506_v37 = vld [vmem:[#allocation8 + $0x20] ss:$12 sps:$4 sm:$0xff]  }
 0x283   :  { %1419 = vmatprep.subr.bf16.mxu0 %v3898_v38  ;;  %v3507_v38 = vld [vmem:[#allocation8 + $0x8] ss:$12 sps:$4 sm:$0xff]  }
 0x284   :  { %3294 = vmatpush3.bf16.msra.mxu1 %v3503_v32  ;;  %v4116_v32 = vld [vmem:[#allocation8 + $0x48] ss:$12 sps:$4 sm:$0xff]  }
 0x285   :  { %3295 = vmatprep.subr.bf16.mxu1 %v3794_v0 }
 0x286   :  { %1420 = vmatpush1.bf16.msra.mxu0 %v3903_v40  ;;  %v966_v40 = vld [vmem:[%s4317_s5] sm:$0x7] }
 0x287   :  { %1421 = vmatprep.subr.bf16.mxu0 %v3907_v41  ;;  %v1103_v41 = vrot.slane %v966_v40, %v3968_v11  ;;  %v1111_v39 = vrot.slane %v966_v40, %v3988_v54 }
 0x288   :  { %3296 = vmatpush3.bf16.msra.mxu1 %v3504_v34  ;;  %v3527_v34 = vld [vmem:[#allocation8 + $0x50] ss:$12 sps:$4 sm:$0xff]  }
 0x289   :  { %3297 = vmatprep.subr.bf16.mxu1 %v3794_v0 }
 0x28a   :  { %1422 = vmatpush1.bf16.msra.mxu0 %v3912_v43  ;;  %v1107_v43 = vrot.slane %v966_v40, %v3978_v16  ;;  %v4127_v40 = vld [vmem:[#allocation8 + $0x1c] ss:$12 sps:$4 sm:$0xff]  }
 0x28b   :  { %1423 = vmatprep.subr.bf16.mxu0 %v3914_v44 }
 0x28c   :  { %3298 = vmatpush3.bf16.msra.mxu1 %v3505_v35  ;;  %v4120_v35 = vld [vmem:[#allocation8 + $0x34] ss:$12 sps:$4 sm:$0xff]  }
 0x28d   :  { %3299 = vmatprep.subr.bf16.mxu1 %v3794_v0 }
 0x28e   :  { %1424 = vmatpush1.bf16.msra.mxu0 %v3919_v46 }
 0x28f   :  { %1425 = vmatprep.subr.bf16.mxu0 %v3921_v47 }
 0x290   :  { %3300 = vmatpush3.bf16.msra.mxu1 %v3506_v37  ;;  %v4123_v37 = vld [vmem:[#allocation8 + $0x30] ss:$12 sps:$4 sm:$0xff]  }
 0x291   :  { %3301 = vmatprep.subr.bf16.mxu1 %v3794_v0 }
 0x292   :  { %1426 = vmatpush1.bf16.msra.mxu0 %v3926_v49 }
 0x293   :  { %1709 = vmatprep.subr.bf16.mxu0 %v4087_v4 }
 0x294   :  { %3302 = vmatpush3.bf16.msra.mxu1 %v3507_v38  ;;  %v3531_v38 = vld [vmem:[#allocation8 + $0x38] ss:$12 sps:$4 sm:$0xff]  }
 0x295   :  { %3307 = vmatprep.subr.bf16.mxu1 %v3794_v0 }
 0x335   :  { %v1149_v44 = vpop.f32.mrf.mxu0  ;;  %v1190_v46 = vpop.f32.mrf.mxu1 }
 0x336   :  { %v1150_v47 = vadd.f32 %v1149_v44, %v1103_v41  ;;  %v1191_v45 = vadd.f32 %v1190_v46, %v1111_v39  ;;  %v4130_v41 = vld [vmem:[#allocation8 + $0x18] ss:$12 sps:$4 sm:$0xff]   ;;  %v4137_v46 = vld [vmem:[#allocation8] ss:$12 sps:$4 sm:$0xff]  }
 0x337   :  { %v1151_v49 = vpop.f32.mrf.mxu0  ;;  %v3285_v8 = vpop.f32.mrf.mxu1  ;;  %v4134_v44 = vld [vmem:[#allocation8 + $0x4] ss:$12 sps:$4 sm:$0xff]  }
 0x338   :  { %v1197_v24 = vrot.slane %v1150_v47, 6  ;;  %v1152_v15 = vadd.f32 %v1151_v49, %v1107_v43  ;;  %v1217_v51 = vrot.slane %v1191_v45, 6  ;;  %v3535_v43 = vld [vmem:[#allocation8 + $0x20] ss:$12 sps:$4 sm:$0xff]   ;;  %v3539_v47 = vld [vmem:[#allocation8 + $0x8] ss:$12 sps:$4 sm:$0xff]  }
 0x339   :  { %v1153_v17 = vpop.f32.mrf.mxu0  ;;  %v1193_v19 = vpop.f32.mrf.mxu1  ;;  %v1263_v49 = vld [vmem:[%s4317_s5] sm:$0x7] }
 0x33a   :  { %v1199_v20 = vadd.f32 %v1197_v24, %v3980_v18  ;;  %v1207_v25 = vrot.slane %v1152_v15, 6  ;;  %v1399_v8 = vrot.slane %v1263_v49, %v3968_v11  ;;  %v1403_v24 = vrot.slane %v1263_v49, %v3978_v16 }
 0x33b   :  { %v1154_v21 = vpop.f32.mrf.mxu0  ;;  %v3286_v22 = vpop.f32.mrf.mxu1 }
 0x33c   :  { %v2976_v23 = vmul.f32 -1.442695, %v1199_v20  ;;  %v1209_v26 = vadd.f32 %v1207_v25, %v3985_v33 }
 0x33e   :  { %3592 = vpow2.f32 %v2976_v23  ;;  %v2977_v27 = vmul.f32 -1.442695, %v1209_v26 }
 0x340   :  { %3594 = vpow2.f32 %v2977_v27 }
 0x34b   :  { %v3593_v30 = vpop.eup %3592 }
 0x34c   :  { %v1203_v36 = vadd.f32 1.0, %v3593_v30 }
 0x34d   :  { %v3595_v42 = vpop.eup %3594 }
 0x34e   :  { %3596 = vrcp.f32 %v1203_v36  ;;  %v1213_v48 = vadd.f32 1.0, %v3595_v42 }
 0x350   :  { %3598 = vrcp.f32 %v1213_v48 }
 0x35b   :  { %v3597_v52 = vpop.eup %3596 }
 0x35c   :  { %v1219_v53 = vmul.f32 %v3597_v52, %v1217_v51 }
 0x35d   :  { %v3599_v56 = vpop.eup %3598 }
 0x35e   :  { %v1220_v55 = vadd.f32 %v1219_v53, %v3992_v61  ;;  %v1222_v57 = vsub.f32 1.0, %v3599_v56  ;;  %v1227_v62 = vmul.f32 %v3599_v56, %v1225_v58  ;;  %v1407_v53 = vrot.slane %v1263_v49, %v3988_v54  ;;  %v3541_v49 = vld [vmem:[#allocation8 + $0x98] ss:$12 sps:$4 sm:$0xff]  }
 0x360   :  { %3600 = vtanh.f32 %v1220_v55 }
 0x36d   :  { %v3601_v59 = vpop.eup %3600 }
 0x36e   :  { %v1223_v60 = vmul.f32 %v3601_v59, %v1222_v57 }
 0x370   :  { %v4079_v63 = vadd.f32 %v1227_v62, %v1223_v60 }
 0x372   :  { %1229 = vst [vmem:[#allocation12] sm:$0x4] %v4079_v63  ;;  %v1230_v2 = vpack.c.bf16 %v4079_v63, %v4079_v63 }
 0x374   :  { %v1265_v3 = vrot.slane %v1230_v2, 1 }
 0x376   :  { %1444 = vmatmul.mubr.bf16.vlgmr.msra.gmra.mxu0 %v1265_v3  ;;  %3304 = vmatmul.mubr.bf16.vlgmr.msra.gmra.mxu1 %v1265_v3 }
 0x377   :  { %1741 = vmatprep.mubr.bf16.mxu0 %v3795_v1  ;;  %3323 = vmatprep.mubr.msk.bf16.mxu1 %vm3796_vm0, %v3794_v0 }
 0x378   :  { %1710 = vmatpush1.bf16.msra.mxu0 %v4089_v6  ;;  %3308 = vmatpush3.bf16.msra.mxu1 %v3511_v7  ;;  %v1521_v7 = vrot.slane %v4079_v63, 7  ;;  %v3540_v63 = vld [vmem:[#allocation8 + $0xb0] ss:$12 sps:$4 sm:$0xff]  }
 0x379   :  { %3309 = vmatprep.subr.bf16.mxu1 %v3794_v0  ;;  %1711 = vmatprep.subr.bf16.mxu0 %v4093_v9 }
 0x37c   :  { %1712 = vmatpush1.bf16.msra.mxu0 %v4096_v50  ;;  %3310 = vmatpush3.bf16.msra.mxu1 %v3515_v5 }
 0x37d   :  { %3311 = vmatprep.subr.bf16.mxu1 %v3794_v0  ;;  %1713 = vmatprep.subr.bf16.mxu0 %v4100_v10 }
 0x380   :  { %1714 = vmatpush1.bf16.msra.mxu0 %v4103_v12  ;;  %3312 = vmatpush3.bf16.msra.mxu1 %v3519_v13 }
 0x381   :  { %1715 = vmatprep.subr.bf16.mxu0 %v4106_v14  ;;  %3313 = vmatprep.subr.bf16.mxu1 %v3794_v0 }
 0x384   :  { %1716 = vmatpush1.bf16.msra.mxu0 %v4109_v28  ;;  %3314 = vmatpush3.bf16.msra.mxu1 %v3523_v29 }
 0x385   :  { %1717 = vmatprep.subr.bf16.mxu0 %v4113_v31  ;;  %3315 = vmatprep.subr.bf16.mxu1 %v3794_v0 }
 0x388   :  { %1718 = vmatpush1.bf16.msra.mxu0 %v4116_v32  ;;  %3316 = vmatpush3.bf16.msra.mxu1 %v3527_v34 }
 0x389   :  { %1719 = vmatprep.subr.bf16.mxu0 %v4120_v35  ;;  %3317 = vmatprep.subr.bf16.mxu1 %v3794_v0 }
 0x38c   :  { %1720 = vmatpush1.bf16.msra.mxu0 %v4123_v37  ;;  %3318 = vmatpush3.bf16.msra.mxu1 %v3531_v38 }
 0x38d   :  { %1721 = vmatprep.subr.bf16.mxu0 %v4127_v40  ;;  %3319 = vmatprep.subr.bf16.mxu1 %v3794_v0 }
 0x390   :  { %1722 = vmatpush1.bf16.msra.mxu0 %v4130_v41  ;;  %3320 = vmatpush3.bf16.msra.mxu1 %v3535_v43 }
 0x391   :  { %1723 = vmatprep.subr.bf16.mxu0 %v4134_v44  ;;  %3321 = vmatprep.subr.bf16.mxu1 %v3794_v0 }
 0x394   :  { %1724 = vmatpush1.bf16.msra.mxu0 %v4137_v46  ;;  %3322 = vmatpush3.bf16.msra.mxu1 %v3539_v47 }
 0x395   :  { %2005 = vmatprep.subr.bf16.mxu0 %v4087_v4  ;;  %3327 = vmatprep.subr.bf16.mxu1 %v3794_v0 }
 0x436   :  { %v1445_v15 = vpop.f32.mrf.mxu0  ;;  %v1486_v17 = vpop.f32.mrf.mxu1 }
 0x437   :  { %v1446_v19 = vadd.f32 %v1445_v15, %v1399_v8  ;;  %v1487_v56 = vadd.f32 %v1486_v17, %v1407_v53  ;;  %v3542_v8 = vld [vmem:[#allocation8 + $0x80] ss:$12 sps:$4 sm:$0xff]   ;;  %v3544_v15 = vld [vmem:[#allocation8 + $0x50] ss:$12 sps:$4 sm:$0xff]   ;;  %v3545_v17 = vld [vmem:[#allocation8 + $0x38] ss:$12 sps:$4 sm:$0xff]  }
 0x438   :  { %v1447_v20 = vpop.f32.mrf.mxu0  ;;  %v3305_v21 = vpop.f32.mrf.mxu1 }
 0x439   :  { %v1493_v22 = vrot.slane %v1446_v19, 5  ;;  %v1448_v23 = vadd.f32 %v1447_v20, %v1403_v24  ;;  %v1513_v58 = vrot.slane %v1487_v56, 5  ;;  %v3543_v24 = vld [vmem:[#allocation8 + $0x68] ss:$12 sps:$4 sm:$0xff]   ;;  %v3546_v19 = vld [vmem:[#allocation8 + $0x20] ss:$12 sps:$4 sm:$0xff]  }
 0x43a   :  { %v1449_v25 = vpop.f32.mrf.mxu0  ;;  %v1489_v26 = vpop.f32.mrf.mxu1  ;;  %v3547_v20 = vld [vmem:[#allocation8 + $0x8] ss:$12 sps:$4 sm:$0xff]   ;;  %v1559_v21 = vld [vmem:[%s4317_s5] sm:$0x7] }
 0x43b   :  { %v1495_v27 = vadd.f32 %v1493_v22, %v3980_v18  ;;  %v1503_v42 = vrot.slane %v1448_v23, 5  ;;  %v1697_v22 = vrot.slane %v1559_v21, %v3968_v11  ;;  %v1701_v23 = vrot.slane %v1559_v21, %v3978_v16 }
 0x43c   :  { %v1450_v30 = vpop.f32.mrf.mxu0  ;;  %v3306_v36 = vpop.f32.mrf.mxu1 }
 0x43d   :  { %v3002_v39 = vmul.f32 -1.442695, %v1495_v27  ;;  %v1505_v45 = vadd.f32 %v1503_v42, %v3985_v33 }
 0x43f   :  { %3602 = vpow2.f32 %v3002_v39  ;;  %v3003_v48 = vmul.f32 -1.442695, %v1505_v45 }
 0x441   :  { %3604 = vpow2.f32 %v3003_v48 }
 0x44c   :  { %v3603_v51 = vpop.eup %3602 }
 0x44d   :  { %v1499_v52 = vadd.f32 1.0, %v3603_v51 }
 0x44e   :  { %v3605_v55 = vpop.eup %3604 }
 0x44f   :  { %3606 = vrcp.f32 %v1499_v52  ;;  %v1509_v57 = vadd.f32 1.0, %v3605_v55 }
 0x451   :  { %3608 = vrcp.f32 %v1509_v57 }
 0x45c   :  { %v3607_v59 = vpop.eup %3606 }
 0x45d   :  { %v1515_v60 = vmul.f32 %v3607_v59, %v1513_v58 }
 0x45e   :  { %v3609_v2 = vpop.eup %3608 }
 0x45f   :  { %v1516_v62 = vadd.f32 %v1515_v60, %v3992_v61  ;;  %v1518_v3 = vsub.f32 1.0, %v3609_v2  ;;  %v1523_v29 = vmul.f32 %v3609_v2, %v1521_v7 }
 0x461   :  { %3610 = vtanh.f32 %v1516_v62  ;;  %v1705_v62 = vrot.slane %v1559_v21, %v3988_v54  ;;  %v3550_v21 = vld [vmem:[#allocation8 + $0x80] ss:$12 sps:$4 sm:$0xff]  }
 0x46e   :  { %v3611_v5 = vpop.eup %3610 }
 0x46f   :  { %v1519_v13 = vmul.f32 %v3611_v5, %v1518_v3 }
 0x471   :  { %v4154_v34 = vadd.f32 %v1523_v29, %v1519_v13 }
 0x473   :  { %1525 = vst [vmem:[#allocation12] sm:$0x8] %v4154_v34  ;;  %v1526_v38 = vpack.c.bf16 %v4154_v34, %v4154_v34 }
 0x475   :  { %v1561_v43 = vshrl.u32 %v1526_v38, 16 }
 0x477   :  { %v1563_v47 = vrot.slane %v1561_v43, 1 }
 0x479   :  { %1742 = vmatmul.mubr.bf16.vlgmr.msra.gmra.mxu0 %v1563_v47  ;;  %3324 = vmatmul.mubr.bf16.vlgmr.msra.gmra.mxu1 %v1563_v47 }
 0x47a   :  { %2006 = vmatpush1.bf16.msra.mxu0 %v4089_v6  ;;  %2037 = vmatprep.mubr.bf16.mxu0 %v3795_v1 }
 0x47b   :  { %2007 = vmatprep.subr.bf16.mxu0 %v4093_v9  ;;  %3343 = vmatprep.mubr.msk.bf16.mxu1 %vm3796_vm0, %v3794_v0 }
 0x47c   :  { %3328 = vmatpush3.bf16.msra.mxu1 %v3540_v63  ;;  %v1819_v63 = vrot.slane %v4154_v34, 7  ;;  %v3548_v34 = vld [vmem:[#allocation8 + $0xb0] ss:$12 sps:$4 sm:$0xff]  }
 0x47d   :  { %3329 = vmatprep.subr.bf16.mxu1 %v3794_v0 }
 0x47e   :  { %2008 = vmatpush1.bf16.msra.mxu0 %v4096_v50 }
 0x47f   :  { %2009 = vmatprep.subr.bf16.mxu0 %v4100_v10 }
 0x480   :  { %3330 = vmatpush3.bf16.msra.mxu1 %v3541_v49 }
 0x481   :  { %3331 = vmatprep.subr.bf16.mxu1 %v3794_v0 }
 0x482   :  { %2010 = vmatpush1.bf16.msra.mxu0 %v4103_v12 }
 0x483   :  { %2011 = vmatprep.subr.bf16.mxu0 %v4106_v14 }
 0x484   :  { %3332 = vmatpush3.bf16.msra.mxu1 %v3542_v8 }
 0x485   :  { %3333 = vmatprep.subr.bf16.mxu1 %v3794_v0 }
 0x486   :  { %2012 = vmatpush1.bf16.msra.mxu0 %v4109_v28 }
 0x487   :  { %2013 = vmatprep.subr.bf16.mxu0 %v4113_v31 }
 0x488   :  { %3334 = vmatpush3.bf16.msra.mxu1 %v3543_v24 }
 0x489   :  { %3335 = vmatprep.subr.bf16.mxu1 %v3794_v0 }
 0x48a   :  { %2014 = vmatpush1.bf16.msra.mxu0 %v4116_v32 }
 0x48b   :  { %2015 = vmatprep.subr.bf16.mxu0 %v4120_v35 }
 0x48c   :  { %3336 = vmatpush3.bf16.msra.mxu1 %v3544_v15 }
 0x48d   :  { %3337 = vmatprep.subr.bf16.mxu1 %v3794_v0 }
 0x48e   :  { %2016 = vmatpush1.bf16.msra.mxu0 %v4123_v37 }
 0x48f   :  { %2017 = vmatprep.subr.bf16.mxu0 %v4127_v40 }
 0x490   :  { %3338 = vmatpush3.bf16.msra.mxu1 %v3545_v17 }
 0x491   :  { %3339 = vmatprep.subr.bf16.mxu1 %v3794_v0 }
 0x492   :  { %2018 = vmatpush1.bf16.msra.mxu0 %v4130_v41 }
 0x493   :  { %2019 = vmatprep.subr.bf16.mxu0 %v4134_v44 }
 0x494   :  { %3340 = vmatpush3.bf16.msra.mxu1 %v3546_v19 }
 0x495   :  { %3341 = vmatprep.subr.bf16.mxu1 %v3794_v0 }
 0x496   :  { %2020 = vmatpush1.bf16.msra.mxu0 %v4137_v46 }
 0x497   :  { %2303 = vmatprep.subr.bf16.mxu0 %v4087_v4 }
 0x498   :  { %3342 = vmatpush3.bf16.msra.mxu1 %v3547_v20  ;;  %v3549_v20 = vld [vmem:[#allocation8 + $0x98] ss:$12 sps:$4 sm:$0xff]  }
 0x499   :  { %3347 = vmatprep.subr.bf16.mxu1 %v3794_v0 }
 0x539   :  { %v1743_v25 = vpop.f32.mrf.mxu0  ;;  %v1784_v26 = vpop.f32.mrf.mxu1 }
 0x53a   :  { %v1744_v27 = vadd.f32 %v1743_v25, %v1697_v22  ;;  %v1785_v3 = vadd.f32 %v1784_v26, %v1705_v62  ;;  %v3551_v22 = vld [vmem:[#allocation8 + $0x68] ss:$12 sps:$4 sm:$0xff]   ;;  %v3553_v25 = vld [vmem:[#allocation8 + $0x38] ss:$12 sps:$4 sm:$0xff]  }
 0x53b   :  { %v1745_v30 = vpop.f32.mrf.mxu0  ;;  %v3325_v36 = vpop.f32.mrf.mxu1  ;;  %v3555_v26 = vld [vmem:[#allocation8 + $0x8] ss:$12 sps:$4 sm:$0xff]  }
 0x53c   :  { %v1791_v39 = vrot.slane %v1744_v27, 4  ;;  %v1746_v42 = vadd.f32 %v1745_v30, %v1701_v23  ;;  %v1811_v5 = vrot.slane %v1785_v3, 4  ;;  %v3552_v23 = vld [vmem:[#allocation8 + $0x50] ss:$12 sps:$4 sm:$0xff]  }
 0x53d   :  { %v1747_v45 = vpop.f32.mrf.mxu0  ;;  %v1787_v48 = vpop.f32.mrf.mxu1  ;;  %v1857_v27 = vld [vmem:[%s4317_s5] sm:$0x7] }
 0x53e   :  { %v1793_v51 = vadd.f32 %v1791_v39, %v3980_v18  ;;  %v1801_v56 = vrot.slane %v1746_v42, 4  ;;  %v1993_v30 = vrot.slane %v1857_v27, %v3968_v11  ;;  %v1997_v36 = vrot.slane %v1857_v27, %v3978_v16 }
 0x53f   :  { %v1748_v52 = vpop.f32.mrf.mxu0  ;;  %v3326_v53 = vpop.f32.mrf.mxu1 }
 0x540   :  { %v3028_v55 = vmul.f32 -1.442695, %v1793_v51  ;;  %v1803_v57 = vadd.f32 %v1801_v56, %v3985_v33 }
 0x542   :  { %3612 = vpow2.f32 %v3028_v55  ;;  %v3029_v58 = vmul.f32 -1.442695, %v1803_v57 }
 0x544   :  { %3614 = vpow2.f32 %v3029_v58 }
 0x54f   :  { %v3613_v59 = vpop.eup %3612 }
 0x550   :  { %v1797_v60 = vadd.f32 1.0, %v3613_v59 }
 0x551   :  { %v3615_v2 = vpop.eup %3614 }
 0x552   :  { %3616 = vrcp.f32 %v1797_v60  ;;  %v1807_v7 = vadd.f32 1.0, %v3615_v2 }
 0x554   :  { %3618 = vrcp.f32 %v1807_v7 }
 0x55f   :  { %v3617_v13 = vpop.eup %3616 }
 0x560   :  { %v1813_v29 = vmul.f32 %v3617_v13, %v1811_v5  ;;  %v2001_v13 = vrot.slane %v1857_v27, %v3988_v54 }
 0x561   :  { %v3619_v43 = vpop.eup %3618 }
 0x562   :  { %v1814_v38 = vadd.f32 %v1813_v29, %v3992_v61  ;;  %v1816_v47 = vsub.f32 1.0, %v3619_v43  ;;  %v1821_v24 = vmul.f32 %v3619_v43, %v1819_v63 }
 0x564   :  { %3620 = vtanh.f32 %v1814_v38 }
 0x571   :  { %v3621_v49 = vpop.eup %3620 }
 0x572   :  { %v1817_v8 = vmul.f32 %v3621_v49, %v1816_v47 }
 0x574   :  { %v4196_v15 = vadd.f32 %v1821_v24, %v1817_v8 }
 0x576   :  { %1823 = vst [vmem:[#allocation12] sm:$0x10] %v4196_v15  ;;  %v1824_v17 = vpack.c.bf16 %v4196_v15, %v4196_v15 }
 0x578   :  { %v1859_v19 = vrot.slane %v1824_v17, 2 }
 0x57a   :  { %2038 = vmatmul.mubr.bf16.vlgmr.msra.gmra.mxu0 %v1859_v19  ;;  %3344 = vmatmul.mubr.bf16.vlgmr.msra.gmra.mxu1 %v1859_v19  ;;  %v2115_v19 = vrot.slane %v4196_v15, 7 }
 0x57b   :  { %2304 = vmatpush1.bf16.msra.mxu0 %v4089_v6  ;;  %2335 = vmatprep.mubr.bf16.mxu0 %v3795_v1 }
 0x57c   :  { %2305 = vmatprep.subr.bf16.mxu0 %v4093_v9  ;;  %3363 = vmatprep.mubr.msk.bf16.mxu1 %vm3796_vm0, %v3794_v0 }
 0x57d   :  { %3348 = vmatpush3.bf16.msra.mxu1 %v3548_v34 }
 0x57e   :  { %3349 = vmatprep.subr.bf16.mxu1 %v3794_v0 }
 0x57f   :  { %2306 = vmatpush1.bf16.msra.mxu0 %v4096_v50 }
 0x580   :  { %2307 = vmatprep.subr.bf16.mxu0 %v4100_v10 }
 0x581   :  { %3350 = vmatpush3.bf16.msra.mxu1 %v3549_v20 }
 0x582   :  { %3351 = vmatprep.subr.bf16.mxu1 %v3794_v0 }
 0x583   :  { %2308 = vmatpush1.bf16.msra.mxu0 %v4103_v12 }
 0x584   :  { %2309 = vmatprep.subr.bf16.mxu0 %v4106_v14 }
 0x585   :  { %3352 = vmatpush3.bf16.msra.mxu1 %v3550_v21 }
 0x586   :  { %3353 = vmatprep.subr.bf16.mxu1 %v3794_v0 }
 0x587   :  { %2310 = vmatpush1.bf16.msra.mxu0 %v4109_v28 }
 0x588   :  { %2311 = vmatprep.subr.bf16.mxu0 %v4113_v31 }
 0x589   :  { %3354 = vmatpush3.bf16.msra.mxu1 %v3551_v22 }
 0x58a   :  { %3355 = vmatprep.subr.bf16.mxu1 %v3794_v0 }
 0x58b   :  { %2312 = vmatpush1.bf16.msra.mxu0 %v4116_v32 }
 0x58c   :  { %2313 = vmatprep.subr.bf16.mxu0 %v4120_v35 }
 0x58d   :  { %3356 = vmatpush3.bf16.msra.mxu1 %v3552_v23 }
 0x58e   :  { %3357 = vmatprep.subr.bf16.mxu1 %v3794_v0 }
 0x58f   :  { %2314 = vmatpush1.bf16.msra.mxu0 %v4123_v37 }
 0x590   :  { %2315 = vmatprep.subr.bf16.mxu0 %v4127_v40 }
 0x591   :  { %3358 = vmatpush3.bf16.msra.mxu1 %v3553_v25 }
 0x592   :  { %3359 = vmatprep.subr.bf16.mxu1 %v3794_v0 }
 0x593   :  { %2316 = vmatpush1.bf16.msra.mxu0 %v4130_v41 }
 0x594   :  { %2317 = vmatprep.subr.bf16.mxu0 %v4134_v44 }
 0x597   :  { %2318 = vmatpush1.bf16.msra.mxu0 %v4137_v46 }
 0x598   :  { %2599 = vmatprep.subr.bf16.mxu0 %v4087_v4  ;;  %v3554_v4 = vld [vmem:[#allocation8 + $0x20] ss:$12 sps:$4 sm:$0xff]  }
 0x599   :  { %3360 = vmatpush3.bf16.msra.mxu1 %v3554_v4 }
 0x59a   :  { %3361 = vmatprep.subr.bf16.mxu1 %v3794_v0 }
 0x59d   :  { %3362 = vmatpush3.bf16.msra.mxu1 %v3555_v26 }
 0x59e   :  { %3367 = vmatprep.subr.bf16.mxu1 %v3794_v0 }
 0x63a   :  { %v2039_v39 = vpop.f32.mrf.mxu0  ;;  %v2080_v42 = vpop.f32.mrf.mxu1 }
 0x63b   :  { %v2040_v45 = vadd.f32 %v2039_v39, %v1993_v30  ;;  %v2081_v38 = vadd.f32 %v2080_v42, %v2001_v13 }
 0x63c   :  { %v2041_v48 = vpop.f32.mrf.mxu0  ;;  %v3345_v51 = vpop.f32.mrf.mxu1 }
 0x63d   :  { %v2087_v52 = vrot.slane %v2040_v45, 3  ;;  %v2042_v53 = vadd.f32 %v2041_v48, %v1997_v36  ;;  %v2107_v47 = vrot.slane %v2081_v38, 3 }
 0x63e   :  { %v2043_v55 = vpop.f32.mrf.mxu0  ;;  %v2083_v56 = vpop.f32.mrf.mxu1 }
 0x63f   :  { %v2089_v57 = vadd.f32 %v2087_v52, %v3980_v18  ;;  %v2097_v62 = vrot.slane %v2042_v53, 3 }
 0x640   :  { %v2044_v58 = vpop.f32.mrf.mxu0  ;;  %v3346_v59 = vpop.f32.mrf.mxu1 }
 0x641   :  { %v3054_v60 = vmul.f32 -1.442695, %v2089_v57  ;;  %v2099_v2 = vadd.f32 %v2097_v62, %v3985_v33 }
 0x643   :  { %3622 = vpow2.f32 %v3054_v60  ;;  %v3055_v3 = vmul.f32 -1.442695, %v2099_v2 }
 0x645   :  { %3624 = vpow2.f32 %v3055_v3 }
 0x650   :  { %v3623_v7 = vpop.eup %3622 }
 0x651   :  { %v2093_v5 = vadd.f32 1.0, %v3623_v7 }
 0x652   :  { %v3625_v29 = vpop.eup %3624 }
 0x653   :  { %3626 = vrcp.f32 %v2093_v5  ;;  %v2103_v43 = vadd.f32 1.0, %v3625_v29 }
 0x655   :  { %3628 = vrcp.f32 %v2103_v43 }
 0x660   :  { %v3627_v63 = vpop.eup %3626 }
 0x661   :  { %v2109_v49 = vmul.f32 %v3627_v63, %v2107_v47 }
 0x662   :  { %v3629_v24 = vpop.eup %3628 }
 0x663   :  { %v2110_v8 = vadd.f32 %v2109_v49, %v3992_v61  ;;  %v2112_v17 = vsub.f32 1.0, %v3629_v24  ;;  %v2117_v21 = vmul.f32 %v3629_v24, %v2115_v19  ;;  %v3565_v24 = vld [vmem:[#allocation9 + $0x30] sm:$0xff]   ;;  %v3567_v19 = vld [vmem:[#allocation9 + $0x20] sm:$0xff]  }
 0x665   :  { %3630 = vtanh.f32 %v2110_v8  ;;  %v3564_v8 = vld [vmem:[#allocation9 + $0x38] sm:$0xff]  }
 0x672   :  { %v3631_v34 = vpop.eup %3630 }
 0x673   :  { %v2113_v20 = vmul.f32 %v3631_v34, %v2112_v17  ;;  %v3566_v17 = vld [vmem:[#allocation9 + $0x28] sm:$0xff]   ;;  %v3568_v34 = vld [vmem:[#allocation9 + $0x18] sm:$0xff]  }
 0x675   :  { %v4238_v22 = vadd.f32 %v2117_v21, %v2113_v20  ;;  %v3569_v20 = vld [vmem:[#allocation9 + $0x10] sm:$0xff]   ;;  %v3570_v21 = vld [vmem:[#allocation9 + $0x8] sm:$0xff]  }
 0x677   :  { %2119 = vst [vmem:[#allocation12] sm:$0x20] %v4238_v22  ;;  %v2120_v23 = vpack.c.bf16 %v4238_v22, %v4238_v22  ;;  %v2413_v13 = vrot.slane %v4238_v22, 7  ;;  %v3571_v22 = vld [vmem:[#allocation9] sm:$0xff]  }
 0x679   :  { %v2155_v25 = vshrl.u32 %v2120_v23, 16  ;;  %v2451_v23 = vld [vmem:[%s4317_s5] sm:$0x7] }
 0x67b   :  { %v2157_v4 = vrot.slane %v2155_v25, 2  ;;  %v2587_v25 = vrot.slane %v2451_v23, %v3968_v11 }
 0x67d   :  { %2336 = vmatmul.mubr.bf16.vlgmr.msra.gmra.mxu0 %v2157_v4  ;;  %3364 = vmatmul.mubr.bf16.vlgmr.msra.gmra.mxu1 %v2157_v4  ;;  %v2591_v4 = vrot.slane %v2451_v23, %v3978_v16 }
 0x67e   :  { %2600 = vmatpush1.bf16.msra.mxu0 %v4089_v6  ;;  %2631 = vmatprep.mubr.bf16.mxu0 %v3795_v1  ;;  %v3556_v1 = vld [vmem:[#allocation8 + $0xb0] ss:$12 sps:$4 sm:$0xff]   ;;  %v3557_v6 = vld [vmem:[#allocation8 + $0x98] ss:$12 sps:$4 sm:$0xff]  }
 0x67f   :  { %2601 = vmatprep.subr.bf16.mxu0 %v4093_v9  ;;  %3383 = vmatprep.mubr.msk.bf16.mxu1 %vm3796_vm0, %v3794_v0  ;;  %v3558_v9 = vld [vmem:[#allocation8 + $0x80] ss:$12 sps:$4 sm:$0xff]  }
 0x680   :  { %3368 = vmatpush3.bf16.msra.mxu1 %v3556_v1 }
 0x681   :  { %3369 = vmatprep.subr.bf16.mxu1 %v3794_v0 }
 0x682   :  { %2602 = vmatpush1.bf16.msra.mxu0 %v4096_v50  ;;  %v3559_v50 = vld [vmem:[#allocation8 + $0x68] ss:$12 sps:$4 sm:$0xff]  }
 0x683   :  { %2603 = vmatprep.subr.bf16.mxu0 %v4100_v10  ;;  %v3560_v10 = vld [vmem:[#allocation8 + $0x50] ss:$12 sps:$4 sm:$0xff]  }
 0x684   :  { %3370 = vmatpush3.bf16.msra.mxu1 %v3557_v6 }
 0x685   :  { %3371 = vmatprep.subr.bf16.mxu1 %v3794_v0 }
 0x686   :  { %2604 = vmatpush1.bf16.msra.mxu0 %v4103_v12  ;;  %v3561_v12 = vld [vmem:[#allocation8 + $0x38] ss:$12 sps:$4 sm:$0xff]  }
 0x687   :  { %2605 = vmatprep.subr.bf16.mxu0 %v4106_v14  ;;  %v3562_v14 = vld [vmem:[#allocation8 + $0x20] ss:$12 sps:$4 sm:$0xff]  }
 0x688   :  { %3372 = vmatpush3.bf16.msra.mxu1 %v3558_v9 }
 0x689   :  { %3373 = vmatprep.subr.bf16.mxu1 %v3794_v0 }
 0x68a   :  { %2606 = vmatpush1.bf16.msra.mxu0 %v4109_v28  ;;  %v3563_v28 = vld [vmem:[#allocation8 + $0x8] ss:$12 sps:$4 sm:$0xff]  }
 0x68b   :  { %2607 = vmatprep.subr.bf16.mxu0 %v4113_v31  ;;  %v2153_v31 = vld [vmem:[%s4317_s5] sm:$0x7] }
 0x68c   :  { %3374 = vmatpush3.bf16.msra.mxu1 %v3559_v50  ;;  %v2299_v56 = vrot.slane %v2153_v31, %v3988_v54 }
 0x68d   :  { %3375 = vmatprep.subr.bf16.mxu1 %v3794_v0 }
 0x68e   :  { %2608 = vmatpush1.bf16.msra.mxu0 %v4116_v32  ;;  %v2291_v32 = vrot.slane %v2153_v31, %v3968_v11 }
 0x68f   :  { %2609 = vmatprep.subr.bf16.mxu0 %v4120_v35  ;;  %v2295_v35 = vrot.slane %v2153_v31, %v3978_v16 }
 0x690   :  { %3376 = vmatpush3.bf16.msra.mxu1 %v3560_v10 }
 0x691   :  { %3377 = vmatprep.subr.bf16.mxu1 %v3794_v0 }
 0x692   :  { %2610 = vmatpush1.bf16.msra.mxu0 %v4123_v37 }
 0x693   :  { %2611 = vmatprep.subr.bf16.mxu0 %v4127_v40 }
 0x694   :  { %3378 = vmatpush3.bf16.msra.mxu1 %v3561_v12 }
 0x695   :  { %3379 = vmatprep.subr.bf16.mxu1 %v3794_v0 }
 0x696   :  { %2612 = vmatpush1.bf16.msra.mxu0 %v4130_v41 }
 0x697   :  { %2613 = vmatprep.subr.bf16.mxu0 %v4134_v44 }
 0x698   :  { %3380 = vmatpush3.bf16.msra.mxu1 %v3562_v14 }
 0x699   :  { %3381 = vmatprep.subr.bf16.mxu1 %v3794_v0 }
 0x69a   :  { %2614 = vmatpush1.bf16.msra.mxu0 %v4137_v46 }
 0x69b   :  { %3387 = vmatprep.subr.bf16.mxu0 %v3794_v0 }
 0x69c   :  { %3382 = vmatpush3.bf16.msra.mxu1 %v3563_v28 }
 0x73d   :  { %v2337_v37 = vpop.f32.mrf.mxu0  ;;  %v2378_v40 = vpop.f32.mrf.mxu1 }
 0x73e   :  { %v2338_v41 = vadd.f32 %v2337_v37, %v2291_v32  ;;  %v2379_v58 = vadd.f32 %v2378_v40, %v2299_v56  ;;  %v3108_v56 = vld [vmem:[%s4319_s7] ss:$0 sm:$0xff] }
 0x73f   :  { %v2339_v44 = vpop.f32.mrf.mxu0  ;;  %v3365_v46 = vpop.f32.mrf.mxu1 }
 0x740   :  { %v2385_v15 = vrot.slane %v2338_v41, 2  ;;  %v2340_v26 = vadd.f32 %v2339_v44, %v2295_v35  ;;  %v2405_v60 = vrot.slane %v2379_v58, 2  ;;  %v2595_v46 = vrot.slane %v2451_v23, %v3988_v54 }
 0x741   :  { %v2341_v27 = vpop.f32.mrf.mxu0  ;;  %v2381_v30 = vpop.f32.mrf.mxu1 }
 0x742   :  { %v2387_v36 = vadd.f32 %v2385_v15, %v3980_v18  ;;  %v2395_v48 = vrot.slane %v2340_v26, 2 }
 0x743   :  { %v2342_v39 = vpop.f32.mrf.mxu0  ;;  %v3366_v42 = vpop.f32.mrf.mxu1 }
 0x744   :  { %v3080_v45 = vmul.f32 -1.442695, %v2387_v36  ;;  %v2397_v51 = vadd.f32 %v2395_v48, %v3985_v33 }
 0x746   :  { %3632 = vpow2.f32 %v3080_v45  ;;  %v3081_v52 = vmul.f32 -1.442695, %v2397_v51 }
 0x748   :  { %3634 = vpow2.f32 %v3081_v52 }
 0x753   :  { %v3633_v53 = vpop.eup %3632 }
 0x754   :  { %v2391_v55 = vadd.f32 1.0, %v3633_v53 }
 0x755   :  { %v3635_v57 = vpop.eup %3634 }
 0x756   :  { %3636 = vrcp.f32 %v2391_v55  ;;  %v2401_v59 = vadd.f32 1.0, %v3635_v57 }
 0x758   :  { %3638 = vrcp.f32 %v2401_v59 }
 0x763   :  { %v3637_v62 = vpop.eup %3636 }
 0x764   :  { %v2407_v2 = vmul.f32 %v3637_v62, %v2405_v60 }
 0x765   :  { %v3639_v7 = vpop.eup %3638 }
 0x766   :  { %v2408_v3 = vadd.f32 %v2407_v2, %v3992_v61  ;;  %v2410_v5 = vsub.f32 1.0, %v3639_v7  ;;  %v2415_v43 = vmul.f32 %v3639_v7, %v2413_v13 }
 0x768   :  { %3640 = vtanh.f32 %v2408_v3 }
 0x775   :  { %v3641_v29 = vpop.eup %3640 }
 0x776   :  { %v2411_v38 = vmul.f32 %v3641_v29, %v2410_v5 }
 0x778   :  { %v4279_v47 = vadd.f32 %v2415_v43, %v2411_v38 }
 0x77a   :  { %2417 = vst [vmem:[#allocation12] sm:$0x40] %v4279_v47  ;;  %v2418_v63 = vpack.c.bf16 %v4279_v47, %v4279_v47 }
 0x77c   :  { %v2453_v49 = vrot.slane %v2418_v63, 3 }
 0x77e   :  { %2632 = vmatmul.mubr.bf16.vlgmr.msra.gmra.mxu0 %v2453_v49  ;;  %3384 = vmatmul.mubr.bf16.vlgmr.msra.gmra.mxu1 %v2453_v49 }
 0x77f   :  { %3403 = vmatprep.mubr.msk.bf16.mxu0 %vm3796_vm0, %v3794_v0  ;;  %3388 = vmatpush3.bf16.msra.mxu0 %v3564_v8 }
 0x780   :  { %3389 = vmatprep.subr.bf16.mxu0 %v3794_v0 }
 0x783   :  { %3390 = vmatpush3.bf16.msra.mxu0 %v3565_v24 }
 0x784   :  { %3391 = vmatprep.subr.bf16.mxu0 %v3794_v0 }
 0x787   :  { %3392 = vmatpush3.bf16.msra.mxu0 %v3566_v17 }
 0x788   :  { %3393 = vmatprep.subr.bf16.mxu0 %v3794_v0 }
 0x78b   :  { %3394 = vmatpush3.bf16.msra.mxu0 %v3567_v19 }
 0x78c   :  { %3395 = vmatprep.subr.bf16.mxu0 %v3794_v0 }
 0x78f   :  { %3396 = vmatpush3.bf16.msra.mxu0 %v3568_v34 }
 0x790   :  { %3397 = vmatprep.subr.bf16.mxu0 %v3794_v0 }
 0x793   :  { %3398 = vmatpush3.bf16.msra.mxu0 %v3569_v20 }
 0x794   :  { %3399 = vmatprep.subr.bf16.mxu0 %v3794_v0 }
 0x797   :  { %3400 = vmatpush3.bf16.msra.mxu0 %v3570_v21 }
 0x798   :  { %3401 = vmatprep.subr.bf16.mxu0 %v3794_v0 }
 0x79b   :  { %3402 = vmatpush3.bf16.msra.mxu0 %v3571_v22 }
 0x83e   :  { %v2633_v1 = vpop.f32.mrf.mxu0  ;;  %v2674_v6 = vpop.f32.mrf.mxu1 }
 0x83f   :  { %v2634_v9 = vadd.f32 %v2633_v1, %v2587_v25  ;;  %v2675_v26 = vadd.f32 %v2674_v6, %v2595_v46 }
 0x840   :  { %v2635_v50 = vpop.f32.mrf.mxu0  ;;  %v3385_v10 = vpop.f32.mrf.mxu1 }
 0x841   :  { %v2681_v12 = vrot.slane %v2634_v9, 1  ;;  %v2636_v14 = vadd.f32 %v2635_v50, %v2591_v4  ;;  %v2701_v30 = vrot.slane %v2675_v26, 1 }
 0x842   :  { %v2637_v28 = vpop.f32.mrf.mxu0  ;;  %v2677_v31 = vpop.f32.mrf.mxu1 }
 0x843   :  { %v2683_v0 = vadd.f32 %v2681_v12, %v3980_v18  ;;  %v2691_v40 = vrot.slane %v2636_v14, 1 }
 0x844   :  { %v2638_v32 = vpop.f32.mrf.mxu0  ;;  %v3386_v35 = vpop.f32.mrf.mxu1 }
 0x845   :  { %v3106_v37 = vmul.f32 -1.442695, %v2683_v0  ;;  %v2693_v11 = vadd.f32 %v2691_v40, %v3985_v33  ;;  %v2709_v33 = vrot.slane %v4279_v47, 7 }
 0x847   :  { %3642 = vpow2.f32 %v3106_v37  ;;  %v3107_v41 = vmul.f32 -1.442695, %v2693_v11 }
 0x849   :  { %3644 = vpow2.f32 %v3107_v41 }
 0x854   :  { %v3643_v16 = vpop.eup %3642 }
 0x855   :  { %v2687_v44 = vadd.f32 1.0, %v3643_v16 }
 0x856   :  { %v3645_v15 = vpop.eup %3644 }
 0x857   :  { %3646 = vrcp.f32 %v2687_v44  ;;  %v2697_v27 = vadd.f32 1.0, %v3645_v15 }
 0x859   :  { %3648 = vrcp.f32 %v2697_v27 }
 0x864   :  { %v3647_v36 = vpop.eup %3646 }
 0x865   :  { %v2703_v18 = vmul.f32 %v3647_v36, %v2701_v30 }
 0x866   :  { %v3649_v42 = vpop.eup %3648 }
 0x867   :  { %v2704_v39 = vadd.f32 %v2703_v18, %v3992_v61  ;;  %v2706_v45 = vsub.f32 1.0, %v3649_v42  ;;  %v2711_v52 = vmul.f32 %v3649_v42, %v2709_v33 }
 0x869   :  { %3650 = vtanh.f32 %v2704_v39 }
 0x876   :  { %v3651_v48 = vpop.eup %3650 }
 0x877   :  { %v2707_v51 = vmul.f32 %v3651_v48, %v2706_v45 }
 0x879   :  { %v2712_v53 = vadd.f32 %v2711_v52, %v2707_v51 }
 0x87b   :  { %2713 = vst [vmem:[#allocation12] sm:$0x80] %v2712_v53  ;;  %2714 = vst [vmem:[#allocation2 - $0x7] sm:$0x80] %v2712_v53 }
 0x882   :  { %v2715_v54 = vld [vmem:[#allocation12] sm:$0xff] }
 0x883   :  { %v2716_v55 = vpack.c.bf16 %v2715_v54, %v2715_v54 }
 0x885   :  { %3404 = vmatmul.mubr.bf16.vlgmr.msra.gmra.mxu0 %v2716_v55 }
 0x945   :  { %v2822_v57 = vpop.f32.mrf.mxu0 }
 0x946   :  { %v2823_v61 = vadd.f32 %v3108_v56, %v2822_v57 }
 0x947   :  { %v3405_v58 = vpop.f32.mrf.mxu0 }
 0x948   :  { %2833 = vmax.xlane.f32.xlu0 %v2823_v61 }
 0x949   :  { %v2825_v59 = vpop.f32.mrf.mxu0 }
 0x94b   :  { %v3406_v60 = vpop.f32.mrf.mxu0 }
 0x9d1   :  { %v2834_v62 = vpop.xlane.xlu0 %2833 }
 0x9d2   :  { %v2835_v2 = vsub.f32 %v2823_v61, %v2834_v62 }
 0x9d4   :  { %v2836_v3 = vmul.f32 1.442695, %v2835_v2 }
 0x9d6   :  { %3652 = vpow2.f32 %v2836_v3 }
 0x9e3   :  { %v3653_v7 = vpop.eup %3652 }
 0x9e4   :  { %2838 = vadd.xlane.f32.xlu0 %v3653_v7 }
 0x9e5   :  { %3747 = shalt.err (!%p3744_p10)
}
 0x9e6   :  { %2864 = dma.vmem_to_hbm [thread:$0]  %s2862_s27, 128, %s4321_s9, [#allocation13]  }
 0x9e7   :  { %s3798_s29 = smov [#allocation11]  }
 0x9e8   :  { %s2851_s30 = sshll.u32 %s3798_s29, 4  ;;  %s2852_s30 = int_to_ptr.vmem [resolvable:$true] %s2851_s30 }
 0x9e9   :  { %s3756_s3 = scalar_lea.vmem %s2852_s30, 128  ;;  %p3761_p12 = scmp.lt.s32.totalorder %s2852_s30, %s2852_s30 }
 0x9ea   :  { %p3757_p11 = scmp.ne.s32.totalorder %s2852_s30, %s3756_s3  ;;  %p3762_p13 = scmp.lt.s32.totalorder %s3756_s3, %s3756_s3 }
 0x9ec   :  { %p3763_p0 = por %p3762_p13, %p3761_p12 }
 0x9ee   :  { %p3764_p1 = pnand %p3763_p0, %p3757_p11 }
 0xa6d   :  { %v2839_v5 = vpop.xlane.xlu0 %2838 }
 0xa6e   :  { %3654 = vlog2.f32 %v2839_v5 }
 0xa7b   :  { %v3655_v13 = vpop.eup %3654 }
 0xa7c   :  { %v2841_v29 = vmul.f32 0.6931472, %v3655_v13 }
 0xa7e   :  { %v2842_v38 = vadd.f32 %v2841_v29, %v2834_v62 }
 0xa80   :  { %v2843_v43 = vsub.f32 %v2823_v61, %v2842_v38 }
 0xa82   :  { %2844 = vst [vmem:[#allocation11] sm:$0xff] %v2843_v43 }
 0xa83   :  { %3767 = shalt.err (!%p3764_p1)
}
 0xa84   :  { %2854 = dma.vmem_to_hbm [thread:$0]  %s2852_s30, 128, %s4320_s8, [#allocation5]  }
 0xa85   :  { %3782 = dma.done.wait [#allocation5], 128  }
 0xa86   :  { %3783 = vsyncadd [#allocation5], 4294967168 }
 0xa87   :  { %3784 = dma.done.wait [#allocation13], 128  }
 0xa88   :  { %3785 = vsyncadd [#allocation13], 4294967168 }
 0xa89   :  { %2871 = vsyncpa [#allocation4], 1 }
 0xa8a   :  { %2872 = vsyncpa [#allocation7], 1 }
 0xa8b   :  { %2873 = vsyncpa [#allocation10], 1 }
 0xa8c   :  { %2874 = vsyncpa [#allocation5], 1 }
 0xa8d   :  { %2875 = vsyncpa [#allocation13], 1 }

// kernel: tpu_custom_call.1
= control target key start
LH: loop header
LB: loop body
LE: loop exit
PB: predicated region body
PF: predicated region fallthrough
CT: control target
= control target key end

     0   :  { %15 = vsyncpa [#allocation4], 0  ;;  %s4312_s0 = inlined_call_operand.hbm [shape: bf16[8,128], index: 0, kind: input, shape index: {}]   ;;  %s4313_s1 = inlined_call_operand.vmem [shape: f32[1,128], index: 1, kind: input, shape index: {}]   ;;  %s4314_s2 = inlined_call_operand.hbm [shape: bf16[128,384], index: 2, kind: input, shape index: {}]   ;;  %s4315_s3 = inlined_call_operand.hbm [shape: bf16[128,384], index: 3, kind: input, shape index: {}]   ;;  %s4316_s4 = inlined_call_operand.vmem [shape: f32[1,384], index: 4, kind: input, shape index: {}]   ;;  %s4317_s5 = inlined_call_operand.vmem [shape: f32[1,384], index: 5, kind: input, shape index: {}]   ;;  %s4318_s6 = inlined_call_operand.hbm [shape: bf16[128,128], index: 6, kind: input, shape index: {}]   ;;  %s4319_s7 = inlined_call_operand.vmem [shape: f32[1,128], index: 7, kind: input, shape index: {}]   ;;  %s4320_s8 = inlined_call_operand.hbm [shape: f32[8,128], index: 8, kind: output, shape index: {0}]   ;;  %s4321_s9 = inlined_call_operand.hbm [shape: f32[8,128], index: 9, kind: output, shape index: {1}]  }
   0x1   :  { %16 = vsyncpa [#allocation7], 0 }
   0x2   :  { %17 = vsyncpa [#allocation10], 0 }
   0x3   :  { %18 = vsyncpa [#allocation5], 0 }
   0x4   :  { %19 = vsyncpa [#allocation13], 0  ;;  %s3786_s30 = smov [#allocation6]  }
   0x5   :  { %s37_s10 = sshll.u32 %s3786_s30, 4  ;;  %s38_s10 = int_to_ptr.vmem [resolvable:$true] %s37_s10 }
   0x6   :  { %s3664_s11 = scalar_lea.vmem %s38_s10, 3072  ;;  %p3669_p1 = scmp.lt.s32.totalorder %s38_s10, %s38_s10 }
   0x7   :  { %p3665_p0 = scmp.ne.s32.totalorder %s38_s10, %s3664_s11  ;;  %p3670_p2 = scmp.lt.s32.totalorder %s3664_s11, %s3664_s11 }
   0x9   :  { %p3671_p3 = por %p3670_p2, %p3669_p1 }
   0xb   :  { %p3672_p4 = pnand %p3671_p3, %p3665_p0 }
   0xd   :  { %3675 = shalt.err (!%p3672_p4)
}
   0xe   :  { %s3787_s12 = smov 192   ;;  %s3788_s13 = smov 12  }
   0xf   :  { %43 = dma.hbm_to_vmem [thread:$0]  %s4314_s2, 3072, %s38_s10, [#allocation7], %s3787_s12, %s3787_s12, %s3788_s13  }
  0x10   :  { %s3789_s16 = smov [#allocation3]   ;;  %s3790_s18 = smov [#allocation8]  }
  0x11   :  { %s26_s17 = sshll.u32 %s3789_s16, 4  ;;  %s49_s19 = sshll.u32 %s3790_s18, 4  ;;  %s27_s17 = int_to_ptr.vmem [resolvable:$true] %s26_s17  ;;  %s50_s19 = int_to_ptr.vmem [resolvable:$true] %s49_s19 }
  0x12   :  { %s3684_s20 = scalar_lea.vmem %s27_s17, 64  ;;  %p3689_p6 = scmp.lt.s32.totalorder %s27_s17, %s27_s17 }
  0x13   :  { %p3685_p5 = scmp.ne.s32.totalorder %s27_s17, %s3684_s20  ;;  %p3690_p7 = scmp.lt.s32.totalorder %s3684_s20, %s3684_s20 }
  0x15   :  { %p3691_p8 = por %p3690_p7, %p3689_p6 }
  0x17   :  { %p3692_p9 = pnand %p3691_p8, %p3685_p5 }
  0x19   :  { %3695 = shalt.err (!%p3692_p9)
}
  0x1a   :  { %29 = dma.hbm_to_vmem [thread:$0]  %s4312_s0, 64, %s27_s17, [#allocation4]  }
  0x1b   :  { %s3704_s23 = scalar_lea.vmem %s50_s19, 3072  ;;  %p3709_p11 = scmp.lt.s32.totalorder %s50_s19, %s50_s19 }
  0x1c   :  { %p3705_p10 = scmp.ne.s32.totalorder %s50_s19, %s3704_s23  ;;  %p3710_p12 = scmp.lt.s32.totalorder %s3704_s23, %s3704_s23 }
  0x1e   :  { %p3711_p13 = por %p3710_p12, %p3709_p11 }
  0x20   :  { %p3712_p0 = pnand %p3711_p13, %p3705_p10 }
  0x22   :  { %3715 = shalt.err (!%p3712_p0)
}
  0x23   :  { %55 = dma.hbm_to_vmem [thread:$0]  %s4315_s3, 3072, %s50_s19, [#allocation7], %s3787_s12, %s3787_s12, %s3788_s13  }
  0x24   :  { %s3791_s25 = smov [#allocation9]  }
  0x25   :  { %s65_s26 = sshll.u32 %s3791_s25, 4  ;;  %s66_s26 = int_to_ptr.vmem [resolvable:$true] %s65_s26 }
  0x26   :  { %s3724_s27 = scalar_lea.vmem %s66_s26, 1024  ;;  %p3729_p2 = scmp.lt.s32.totalorder %s66_s26, %s66_s26 }
  0x27   :  { %p3725_p1 = scmp.ne.s32.totalorder %s66_s26, %s3724_s27  ;;  %p3730_p3 = scmp.lt.s32.totalorder %s3724_s27, %s3724_s27 }
  0x29   :  { %p3731_p4 = por %p3730_p3, %p3729_p2 }
  0x2b   :  { %p3732_p5 = pnand %p3731_p4, %p3725_p1 }
  0x2d   :  { %3735 = shalt.err (!%p3732_p5)
}
  0x2e   :  { %s3792_s0 = smov 64   ;;  %s3793_s28 = smov 4  }
  0x2f   :  { %71 = dma.hbm_to_vmem [thread:$0]  %s4318_s6, 1024, %s66_s26, [#allocation10], %s3792_s0, %s3792_s0, %s3793_s28  }
  0x30   :  { %3776 = dma.done.wait [#allocation4], 64  }
  0x31   :  { %3777 = vsyncadd [#allocation4], 4294967232 }
  0x32   :  { %3778 = dma.done.wait [#allocation7], 6144  }
  0x33   :  { %3779 = vsyncadd [#allocation7], 4294961152 }
  0x34   :  { %3780 = dma.done.wait [#allocation10], 1024  }
  0x35   :  { %3781 = vsyncadd [#allocation10], 4294966272  ;;  %v3794_v0 = vmov 0.0   ;;  %v3795_v1 = vmov 0   ;;  %vm3796_vm0 = vmmov 0   ;;  %s3797_s26 = smov [#allocation12]  }
  0x36   :  { %3207 = vmatprep.subr.bf16.mxu1 %v3794_v0  ;;  %309 = vmatprep.mubr.bf16.mxu0 %v3795_v1  ;;  %v3420_v2 = vld [vmem:[#allocation6 + $0xac] ss:$12 sps:$4 sm:$0xff]   ;;  %v3422_v3 = vld [vmem:[#allocation6 + $0xa8] ss:$12 sps:$4 sm:$0xff]   ;;  %v3425_v5 = vld [vmem:[#allocation6 + $0x90] ss:$12 sps:$4 sm:$0xff]  }
  0x37   :  { %3223 = vmatprep.mubr.msk.bf16.mxu1 %vm3796_vm0, %v3794_v0  ;;  %277 = vmatprep.subr.bf16.mxu0 %v3420_v2  ;;  %v3423_v4 = vld [vmem:[#allocation6 + $0x94] ss:$12 sps:$4 sm:$0xff]   ;;  %v3426_v6 = vld [vmem:[#allocation6 + $0x7c] ss:$12 sps:$4 sm:$0xff]   ;;  %v3428_v7 = vld [vmem:[#allocation6 + $0x78] ss:$12 sps:$4 sm:$0xff]  }
  0x38   :  { %278 = vmatpush1.bf16.msra.mxu0 %v3422_v3  ;;  %v3429_v8 = vld [vmem:[#allocation6 + $0x64] ss:$12 sps:$4 sm:$0xff]   ;;  %v3431_v9 = vld [vmem:[#allocation6 + $0x60] ss:$12 sps:$4 sm:$0xff]   ;;  %v3434_v13 = vld [vmem:[#allocation6 + $0x48] ss:$12 sps:$4 sm:$0xff]  }
  0x39   :  { %279 = vmatprep.subr.bf16.mxu0 %v3423_v4  ;;  %v3444_v10 = vld [vmem:[#allocation6 + $0xb0] ss:$12 sps:$4 sm:$0xff]   ;;  %v3432_v11 = vld [vmem:[#allocation6 + $0x4c] ss:$12 sps:$4 sm:$0xff]   ;;  %v3435_v14 = vld [vmem:[#allocation6 + $0x34] ss:$12 sps:$4 sm:$0xff]  }
  0x3a   :  { %3208 = vmatpush3.bf16.msra.mxu1 %v3444_v10  ;;  %v3448_v12 = vld [vmem:[#allocation6 + $0x98] ss:$12 sps:$4 sm:$0xff]   ;;  %v3452_v15 = vld [vmem:[#allocation6 + $0x80] ss:$12 sps:$4 sm:$0xff]   ;;  %v3437_v16 = vld [vmem:[#allocation6 + $0x30] ss:$12 sps:$4 sm:$0xff]  }
  0x3b   :  { %3209 = vmatprep.subr.bf16.mxu1 %v3794_v0  ;;  %v3438_v17 = vld [vmem:[#allocation6 + $0x1c] ss:$12 sps:$4 sm:$0xff]   ;;  %v3440_v19 = vld [vmem:[#allocation6 + $0x18] ss:$12 sps:$4 sm:$0xff]   ;;  %v3443_v22 = vld [vmem:[#allocation6] ss:$12 sps:$4 sm:$0xff]  }
  0x3c   :  { %280 = vmatpush1.bf16.msra.mxu0 %v3425_v5  ;;  %v3456_v18 = vld [vmem:[#allocation6 + $0x68] ss:$12 sps:$4 sm:$0xff]   ;;  %v3441_v20 = vld [vmem:[#allocation6 + $0x4] ss:$12 sps:$4 sm:$0xff]   ;;  %v98_v23 = vld [vmem:[#allocation3] sm:$0xf] }
  0x3d   :  { %281 = vmatprep.subr.bf16.mxu0 %v3426_v6  ;;  %v3460_v21 = vld [vmem:[#allocation6 + $0x50] ss:$12 sps:$4 sm:$0xff]   ;;  %v3869_v24 = vld [vmem:[#allocation8 + $0xac] ss:$12 sps:$4 sm:$0xff]   ;;  %v99_v26 = vmax.bf16 %v3795_v1, %v98_v23  ;;  %v3876_v28 = vld [vmem:[#allocation8 + $0xa8] ss:$12 sps:$4 sm:$0xff]  }
  0x3e   :  { %3210 = vmatpush3.bf16.msra.mxu1 %v3448_v12  ;;  %v3464_v25 = vld [vmem:[#allocation6 + $0x38] ss:$12 sps:$4 sm:$0xff]   ;;  %v3879_v29 = vld [vmem:[#allocation8 + $0x94] ss:$12 sps:$4 sm:$0xff]   ;;  %v3883_v31 = vld [vmem:[#allocation8 + $0x90] ss:$12 sps:$4 sm:$0xff]  }
  0x3f   :  { %3211 = vmatprep.subr.bf16.mxu1 %v3794_v0  ;;  %v93_v27 = vld [vmem:[%s4313_s1] sm:$0x1]  ;;  %v3468_v30 = vld [vmem:[#allocation6 + $0x20] ss:$12 sps:$4 sm:$0xff]   ;;  %v3887_v32 = vld [vmem:[#allocation8 + $0x7c] ss:$12 sps:$4 sm:$0xff]  }
  0x40   :  { %282 = vmatpush1.bf16.msra.mxu0 %v3428_v7  ;;  %94 = vst [vmem:[#allocation2] sm:$0x1] %v93_v27  ;;  %v3472_v33 = vld [vmem:[#allocation6 + $0x8] ss:$12 sps:$4 sm:$0xff]   ;;  %v3889_v34 = vld [vmem:[#allocation8 + $0x78] ss:$12 sps:$4 sm:$0xff]  }
  0x41   :  { %283 = vmatprep.subr.bf16.mxu0 %v3429_v8  ;;  %v3891_v35 = vld [vmem:[#allocation8 + $0x64] ss:$12 sps:$4 sm:$0xff]   ;;  %v3896_v37 = vld [vmem:[#allocation8 + $0x60] ss:$12 sps:$4 sm:$0xff]   ;;  %v3903_v40 = vld [vmem:[#allocation8 + $0x48] ss:$12 sps:$4 sm:$0xff]  }
  0x42   :  { %3212 = vmatpush3.bf16.msra.mxu1 %v3452_v15  ;;  %v3476_v36 = vld [vmem:[#allocation8 + $0xb0] ss:$12 sps:$4 sm:$0xff]   ;;  %v3898_v38 = vld [vmem:[#allocation8 + $0x4c] ss:$12 sps:$4 sm:$0xff]   ;;  %v3907_v41 = vld [vmem:[#allocation8 + $0x34] ss:$12 sps:$4 sm:$0xff]  }
  0x43   :  { %3213 = vmatprep.subr.bf16.mxu1 %v3794_v0  ;;  %v3477_v39 = vld [vmem:[#allocation8 + $0x98] ss:$12 sps:$4 sm:$0xff]   ;;  %v3478_v42 = vld [vmem:[#allocation8 + $0x80] ss:$12 sps:$4 sm:$0xff]   ;;  %v3912_v43 = vld [vmem:[#allocation8 + $0x30] ss:$12 sps:$4 sm:$0xff]  }
  0x44   :  { %284 = vmatpush1.bf16.msra.mxu0 %v3431_v9  ;;  %v3914_v44 = vld [vmem:[#allocation8 + $0x1c] ss:$12 sps:$4 sm:$0xff]   ;;  %v3919_v46 = vld [vmem:[#allocation8 + $0x18] ss:$12 sps:$4 sm:$0xff]   ;;  %v3926_v49 = vld [vmem:[#allocation8] ss:$12 sps:$4 sm:$0xff]   ;;  %v134_v9 = vlaneseq }
  0x45   :  { %285 = vmatprep.subr.bf16.mxu0 %v3432_v11  ;;  %v3479_v45 = vld [vmem:[#allocation8 + $0x68] ss:$12 sps:$4 sm:$0xff]   ;;  %v3921_v47 = vld [vmem:[#allocation8 + $0x4] ss:$12 sps:$4 sm:$0xff]   ;;  %v3482_v53 = vld [vmem:[#allocation8 + $0x20] ss:$12 sps:$4 sm:$0xff]  }
  0x46   :  { %3214 = vmatpush3.bf16.msra.mxu1 %v3456_v18  ;;  %v3480_v48 = vld [vmem:[#allocation8 + $0x50] ss:$12 sps:$4 sm:$0xff]   ;;  %v3481_v51 = vld [vmem:[#allocation8 + $0x38] ss:$12 sps:$4 sm:$0xff]   ;;  %v3483_v54 = vld [vmem:[#allocation8 + $0x8] ss:$12 sps:$4 sm:$0xff]  }
  0x47   :  { %3215 = vmatprep.subr.bf16.mxu1 %v3794_v0  ;;  %v3928_v50 = vld [vmem:[#allocation2] sm:$0x1]  ;;  %v3484_v55 = vld [vmem:[#allocation8 + $0xb0] ss:$12 sps:$4 sm:$0xff]   ;;  %v3486_v57 = vld [vmem:[#allocation8 + $0x80] ss:$12 sps:$4 sm:$0xff]  }
  0x48   :  { %286 = vmatpush1.bf16.msra.mxu0 %v3434_v13  ;;  %v359_v52 = vpack.c.bf16 %v3928_v50, %v3928_v50  ;;  %v3485_v56 = vld [vmem:[#allocation8 + $0x98] ss:$12 sps:$4 sm:$0xff]   ;;  %v3487_v58 = vld [vmem:[#allocation8 + $0x68] ss:$12 sps:$4 sm:$0xff]   ;;  %v3488_v59 = vld [vmem:[#allocation8 + $0x50] ss:$12 sps:$4 sm:$0xff]  }
  0x49   :  { %287 = vmatprep.subr.bf16.mxu0 %v3435_v14  ;;  %v3489_v60 = vld [vmem:[#allocation8 + $0x38] ss:$12 sps:$4 sm:$0xff]   ;;  %v3490_v61 = vld [vmem:[#allocation8 + $0x20] ss:$12 sps:$4 sm:$0xff]   ;;  %v3491_v62 = vld [vmem:[#allocation8 + $0x8] ss:$12 sps:$4 sm:$0xff]  }
  0x4a   :  { %3216 = vmatpush3.bf16.msra.mxu1 %v3460_v21  ;;  %v135_v10 = vshrl.u32 %v134_v9, 7  ;;  %v132_v12 = vld [vmem:[%s4316_s4] sm:$0x7]  ;;  %s2861_s27 = sshll.u32 %s3797_s26, 4  ;;  %s2862_s27 = int_to_ptr.vmem [resolvable:$true] %s2861_s27 }
  0x4b   :  { %3217 = vmatprep.subr.bf16.mxu1 %v3794_v0  ;;  %v392_v13 = vld [vmem:[%s4317_s5] sm:$0x7]  ;;  %s3736_s0 = scalar_lea.vmem %s2862_s27, 128  ;;  %p3741_p7 = scmp.lt.s32.totalorder %s2862_s27, %s2862_s27 }
  0x4c   :  { %288 = vmatpush1.bf16.msra.mxu0 %v3437_v16  ;;  %v3968_v11 = vsub.s32 0, %v135_v10  ;;  %v3978_v16 = vsub.s32 1, %v135_v10  ;;  %p3737_p6 = scmp.ne.s32.totalorder %s2862_s27, %s3736_s0  ;;  %p3742_p8 = scmp.lt.s32.totalorder %s3736_s0, %s3736_s0 }
  0x4d   :  { %289 = vmatprep.subr.bf16.mxu0 %v3438_v17 }
  0x4e   :  { %3218 = vmatpush3.bf16.msra.mxu1 %v3464_v25  ;;  %v137_v14 = vrot.slane %v132_v12, %v3968_v11  ;;  %v525_v15 = vrot.slane %v392_v13, %v3968_v11  ;;  %p3743_p9 = por %p3742_p8, %p3741_p7 }
  0x4f   :  { %3219 = vmatprep.subr.bf16.mxu1 %v3794_v0 }
  0x50   :  { %290 = vmatpush1.bf16.msra.mxu0 %v3440_v19  ;;  %p3744_p10 = pnand %p3743_p9, %p3737_p6 }
  0x51   :  { %291 = vmatprep.subr.bf16.mxu0 %v3441_v20  ;;  %v529_v20 = vrot.slane %v392_v13, %v3978_v16 }
  0x52   :  { %3220 = vmatpush3.bf16.msra.mxu1 %v3468_v30 }
  0x53   :  { %3221 = vmatprep.subr.bf16.mxu1 %v3794_v0 }
  0x54   :  { %292 = vmatpush1.bf16.msra.mxu0 %v3443_v22  ;;  %v141_v22 = vrot.slane %v132_v12, %v3978_v16 }
  0x55   :  { %537 = vmatprep.subr.bf16.mxu0 %v3869_v24 }
  0x56   :  { %3222 = vmatpush3.bf16.msra.mxu1 %v3472_v33 }
  0x57   :  { %310 = vmatmul.mubr.bf16.vlgmr.msra.gmra.mxu0 %v99_v26  ;;  %3227 = vmatprep.subr.bf16.mxu1 %v3794_v0 }
  0x58   :  { %538 = vmatpush1.bf16.msra.mxu0 %v3876_v28  ;;  %569 = vmatprep.mubr.bf16.mxu0 %v3795_v1 }
  0x59   :  { %539 = vmatprep.subr.bf16.mxu0 %v3879_v29  ;;  %3224 = vmatmul.mubr.bf16.vlgmr.msra.gmra.mxu1 %v99_v26 }
  0x5a   :  { %3228 = vmatpush3.bf16.msra.mxu1 %v3476_v36  ;;  %3243 = vmatprep.mubr.msk.bf16.mxu1 %vm3796_vm0, %v3794_v0 }
  0x5b   :  { %3229 = vmatprep.subr.bf16.mxu1 %v3794_v0 }
  0x5c   :  { %540 = vmatpush1.bf16.msra.mxu0 %v3883_v31 }
  0x5d   :  { %541 = vmatprep.subr.bf16.mxu0 %v3887_v32 }
  0x5e   :  { %3230 = vmatpush3.bf16.msra.mxu1 %v3477_v39 }
  0x5f   :  { %3231 = vmatprep.subr.bf16.mxu1 %v3794_v0 }
  0x60   :  { %542 = vmatpush1.bf16.msra.mxu0 %v3889_v34 }
  0x61   :  { %543 = vmatprep.subr.bf16.mxu0 %v3891_v35 }
  0x62   :  { %3232 = vmatpush3.bf16.msra.mxu1 %v3478_v42 }
  0x63   :  { %3233 = vmatprep.subr.bf16.mxu1 %v3794_v0 }
  0x64   :  { %544 = vmatpush1.bf16.msra.mxu0 %v3896_v37 }
  0x65   :  { %545 = vmatprep.subr.bf16.mxu0 %v3898_v38 }
  0x66   :  { %3234 = vmatpush3.bf16.msra.mxu1 %v3479_v45 }
  0x67   :  { %3235 = vmatprep.subr.bf16.mxu1 %v3794_v0 }
  0x68   :  { %546 = vmatpush1.bf16.msra.mxu0 %v3903_v40 }
  0x69   :  { %547 = vmatprep.subr.bf16.mxu0 %v3907_v41 }
  0x6a   :  { %3236 = vmatpush3.bf16.msra.mxu1 %v3480_v48 }
  0x6b   :  { %3237 = vmatprep.subr.bf16.mxu1 %v3794_v0 }
  0x6c   :  { %548 = vmatpush1.bf16.msra.mxu0 %v3912_v43 }
  0x6d   :  { %549 = vmatprep.subr.bf16.mxu0 %v3914_v44 }
  0x6e   :  { %3238 = vmatpush3.bf16.msra.mxu1 %v3481_v51 }
  0x6f   :  { %3239 = vmatprep.subr.bf16.mxu1 %v3794_v0 }
  0x70   :  { %550 = vmatpush1.bf16.msra.mxu0 %v3919_v46 }
  0x71   :  { %551 = vmatprep.subr.bf16.mxu0 %v3921_v47 }
  0x72   :  { %3240 = vmatpush3.bf16.msra.mxu1 %v3482_v53 }
  0x73   :  { %3241 = vmatprep.subr.bf16.mxu1 %v3794_v0 }
  0x74   :  { %552 = vmatpush1.bf16.msra.mxu0 %v3926_v49 }
  0x75   :  { %818 = vmatprep.subr.bf16.mxu0 %v3869_v24 }
  0x76   :  { %3242 = vmatpush3.bf16.msra.mxu1 %v3483_v54  ;;  %v3988_v54 = vsub.s32 2, %v135_v10  ;;  %v3494_v10 = vld [vmem:[#allocation8 + $0x80] ss:$12 sps:$4 sm:$0xff]  }
  0x77   :  { %570 = vmatmul.mubr.bf16.vlgmr.msra.gmra.mxu0 %v359_v52  ;;  %3247 = vmatprep.subr.bf16.mxu1 %v3794_v0 }
  0x78   :  { %819 = vmatpush1.bf16.msra.mxu0 %v3876_v28  ;;  %850 = vmatprep.mubr.bf16.mxu0 %v3795_v1 }
  0x79   :  { %820 = vmatprep.subr.bf16.mxu0 %v3879_v29  ;;  %3244 = vmatmul.mubr.bf16.vlgmr.msra.gmra.mxu1 %v359_v52 }
  0x7a   :  { %3263 = vmatprep.mubr.msk.bf16.mxu1 %vm3796_vm0, %v3794_v0  ;;  %3248 = vmatpush3.bf16.msra.mxu1 %v3484_v55  ;;  %v533_v55 = vrot.slane %v392_v13, %v3988_v54  ;;  %v3496_v13 = vld [vmem:[#allocation8 + $0x50] ss:$12 sps:$4 sm:$0xff]  }
  0x7b   :  { %3249 = vmatprep.subr.bf16.mxu1 %v3794_v0 }
  0x7c   :  { %821 = vmatpush1.bf16.msra.mxu0 %v3883_v31 }
  0x7d   :  { %822 = vmatprep.subr.bf16.mxu0 %v3887_v32 }
  0x7e   :  { %3250 = vmatpush3.bf16.msra.mxu1 %v3485_v56 }
  0x7f   :  { %3251 = vmatprep.subr.bf16.mxu1 %v3794_v0 }
  0x80   :  { %823 = vmatpush1.bf16.msra.mxu0 %v3889_v34 }
  0x81   :  { %824 = vmatprep.subr.bf16.mxu0 %v3891_v35 }
  0x82   :  { %3252 = vmatpush3.bf16.msra.mxu1 %v3486_v57  ;;  %v145_v57 = vrot.slane %v132_v12, %v3988_v54  ;;  %v3495_v12 = vld [vmem:[#allocation8 + $0x68] ss:$12 sps:$4 sm:$0xff]  }
  0x83   :  { %3253 = vmatprep.subr.bf16.mxu1 %v3794_v0 }
  0x84   :  { %825 = vmatpush1.bf16.msra.mxu0 %v3896_v37 }
  0x85   :  { %826 = vmatprep.subr.bf16.mxu0 %v3898_v38 }
  0x86   :  { %3254 = vmatpush3.bf16.msra.mxu1 %v3487_v58 }
  0x87   :  { %3255 = vmatprep.subr.bf16.mxu1 %v3794_v0 }
  0x88   :  { %827 = vmatpush1.bf16.msra.mxu0 %v3903_v40 }
  0x89   :  { %828 = vmatprep.subr.bf16.mxu0 %v3907_v41 }
  0x8a   :  { %3256 = vmatpush3.bf16.msra.mxu1 %v3488_v59 }
  0x8b   :  { %3257 = vmatprep.subr.bf16.mxu1 %v3794_v0 }
  0x8c   :  { %829 = vmatpush1.bf16.msra.mxu0 %v3912_v43 }
  0x8d   :  { %830 = vmatprep.subr.bf16.mxu0 %v3914_v44 }
  0x8e   :  { %3258 = vmatpush3.bf16.msra.mxu1 %v3489_v60 }
  0x8f   :  { %3259 = vmatprep.subr.bf16.mxu1 %v3794_v0 }
  0x90   :  { %831 = vmatpush1.bf16.msra.mxu0 %v3919_v46 }
  0x91   :  { %832 = vmatprep.subr.bf16.mxu0 %v3921_v47 }
  0x92   :  { %3260 = vmatpush3.bf16.msra.mxu1 %v3490_v61 }
  0x93   :  { %3261 = vmatprep.subr.bf16.mxu1 %v3794_v0 }
  0x94   :  { %833 = vmatpush1.bf16.msra.mxu0 %v3926_v49 }
  0x95   :  { %1115 = vmatprep.subr.bf16.mxu0 %v3869_v24 }
  0x96   :  { %3262 = vmatpush3.bf16.msra.mxu1 %v3491_v62 }
  0x97   :  { %3267 = vmatprep.subr.bf16.mxu1 %v3794_v0 }
 0x117   :  { %v311_v63 = vpop.f32.mrf.mxu0 }
 0x118   :  { %v3980_v18 = vadd.f32 %v311_v63, %v137_v14  ;;  %v3497_v14 = vld [vmem:[#allocation8 + $0x38] ss:$12 sps:$4 sm:$0xff]  }
 0x119   :  { %v313_v2 = vpop.f32.mrf.mxu0  ;;  %v352_v5 = vpop.f32.mrf.mxu1 }
 0x11a   :  { %v3985_v33 = vadd.f32 %v313_v2, %v141_v22  ;;  %v3992_v61 = vadd.f32 %v352_v5, %v145_v57  ;;  %v3493_v5 = vld [vmem:[#allocation8 + $0x98] ss:$12 sps:$4 sm:$0xff]  }
 0x11b   :  { %v315_v3 = vpop.f32.mrf.mxu0  ;;  %v3225_v6 = vpop.f32.mrf.mxu1 }
 0x11d   :  { %v316_v4 = vpop.f32.mrf.mxu0  ;;  %v355_v7 = vpop.f32.mrf.mxu1 }
 0x11f   :  { %v3226_v8 = vpop.f32.mrf.mxu1 }
 0x137   :  { %v571_v17 = vpop.f32.mrf.mxu0 }
 0x138   :  { %v572_v19 = vadd.f32 %v571_v17, %v525_v15  ;;  %v3499_v15 = vld [vmem:[#allocation8 + $0x8] ss:$12 sps:$4 sm:$0xff]   ;;  %v673_v17 = vld [vmem:[%s4317_s5] sm:$0x7] }
 0x139   :  { %v573_v21 = vpop.f32.mrf.mxu0  ;;  %v612_v39 = vpop.f32.mrf.mxu1 }
 0x13a   :  { %v618_v23 = vadd.f32 %v572_v19, %v3980_v18  ;;  %v574_v27 = vadd.f32 %v573_v21, %v529_v20  ;;  %v613_v59 = vadd.f32 %v612_v39, %v533_v55  ;;  %v806_v19 = vrot.slane %v673_v17, %v3968_v11 }
 0x13b   :  { %v575_v25 = vpop.f32.mrf.mxu0  ;;  %v3245_v42 = vpop.f32.mrf.mxu1  ;;  %v810_v20 = vrot.slane %v673_v17, %v3978_v16 }
 0x13c   :  { %v2924_v26 = vmul.f32 -1.442695, %v618_v23  ;;  %v625_v36 = vadd.f32 %v574_v27, %v3985_v33 }
 0x13d   :  { %v576_v30 = vpop.f32.mrf.mxu0  ;;  %v615_v48 = vpop.f32.mrf.mxu1 }
 0x13e   :  { %3572 = vpow2.f32 %v2924_v26  ;;  %v2925_v45 = vmul.f32 -1.442695, %v625_v36 }
 0x13f   :  { %v3246_v51 = vpop.f32.mrf.mxu1 }
 0x140   :  { %3574 = vpow2.f32 %v2925_v45 }
 0x14b   :  { %v3573_v52 = vpop.eup %3572 }
 0x14c   :  { %v622_v53 = vadd.f32 1.0, %v3573_v52 }
 0x14d   :  { %v3575_v56 = vpop.eup %3574 }
 0x14e   :  { %3576 = vrcp.f32 %v622_v53  ;;  %v629_v58 = vadd.f32 1.0, %v3575_v56 }
 0x150   :  { %3578 = vrcp.f32 %v629_v58  ;;  %v814_v58 = vrot.slane %v673_v17, %v3988_v54 }
 0x15b   :  { %v3577_v60 = vpop.eup %3576 }
 0x15c   :  { %v632_v62 = vmul.f32 %v3577_v60, %v613_v59 }
 0x15d   :  { %v3579_v2 = vpop.eup %3578 }
 0x15e   :  { %v633_v63 = vadd.f32 %v632_v62, %v3992_v61  ;;  %v635_v3 = vsub.f32 1.0, %v3579_v2  ;;  %v637_v7 = vmul.f32 %v3579_v2, %v3928_v50  ;;  %v3492_v50 = vld [vmem:[#allocation8 + $0xb0] ss:$12 sps:$4 sm:$0xff]  }
 0x160   :  { %3580 = vtanh.f32 %v633_v63 }
 0x16d   :  { %v3581_v4 = vpop.eup %3580 }
 0x16e   :  { %v636_v6 = vmul.f32 %v3581_v4, %v635_v3 }
 0x170   :  { %v3996_v8 = vadd.f32 %v637_v7, %v636_v6 }
 0x172   :  { %639 = vst [vmem:[#allocation12] sm:$0x1] %v3996_v8  ;;  %v640_v9 = vpack.c.bf16 %v3996_v8, %v3996_v8 }
 0x174   :  { %851 = vmatmul.mubr.bf16.vlgmr.msra.gmra.mxu0 %v640_v9  ;;  %3264 = vmatmul.mubr.bf16.vlgmr.msra.gmra.mxu1 %v640_v9  ;;  %v928_v9 = vrot.slane %v3996_v8, 7 }
 0x175   :  { %1116 = vmatpush1.bf16.msra.mxu0 %v3876_v28  ;;  %1147 = vmatprep.mubr.bf16.mxu0 %v3795_v1 }
 0x176   :  { %1117 = vmatprep.subr.bf16.mxu0 %v3879_v29  ;;  %3283 = vmatprep.mubr.msk.bf16.mxu1 %vm3796_vm0, %v3794_v0 }
 0x177   :  { %3268 = vmatpush3.bf16.msra.mxu1 %v3492_v50 }
 0x178   :  { %3269 = vmatprep.subr.bf16.mxu1 %v3794_v0 }
 0x179   :  { %1118 = vmatpush1.bf16.msra.mxu0 %v3883_v31 }
 0x17a   :  { %1119 = vmatprep.subr.bf16.mxu0 %v3887_v32 }
 0x17b   :  { %3270 = vmatpush3.bf16.msra.mxu1 %v3493_v5 }
 0x17c   :  { %3271 = vmatprep.subr.bf16.mxu1 %v3794_v0 }
 0x17d   :  { %1120 = vmatpush1.bf16.msra.mxu0 %v3889_v34 }
 0x17e   :  { %1121 = vmatprep.subr.bf16.mxu0 %v3891_v35 }
 0x17f   :  { %3272 = vmatpush3.bf16.msra.mxu1 %v3494_v10 }
 0x180   :  { %3273 = vmatprep.subr.bf16.mxu1 %v3794_v0 }
 0x181   :  { %1122 = vmatpush1.bf16.msra.mxu0 %v3896_v37 }
 0x182   :  { %1123 = vmatprep.subr.bf16.mxu0 %v3898_v38 }
 0x183   :  { %3274 = vmatpush3.bf16.msra.mxu1 %v3495_v12 }
 0x184   :  { %3275 = vmatprep.subr.bf16.mxu1 %v3794_v0 }
 0x185   :  { %1124 = vmatpush1.bf16.msra.mxu0 %v3903_v40 }
 0x186   :  { %1125 = vmatprep.subr.bf16.mxu0 %v3907_v41 }
 0x187   :  { %3276 = vmatpush3.bf16.msra.mxu1 %v3496_v13 }
 0x188   :  { %3277 = vmatprep.subr.bf16.mxu1 %v3794_v0 }
 0x189   :  { %1126 = vmatpush1.bf16.msra.mxu0 %v3912_v43 }
 0x18a   :  { %1127 = vmatprep.subr.bf16.mxu0 %v3914_v44 }
 0x18b   :  { %3278 = vmatpush3.bf16.msra.mxu1 %v3497_v14 }
 0x18c   :  { %3279 = vmatprep.subr.bf16.mxu1 %v3794_v0 }
 0x18d   :  { %1128 = vmatpush1.bf16.msra.mxu0 %v3919_v46 }
 0x18e   :  { %1129 = vmatprep.subr.bf16.mxu0 %v3921_v47 }
 0x191   :  { %1130 = vmatpush1.bf16.msra.mxu0 %v3926_v49 }
 0x192   :  { %1411 = vmatprep.subr.bf16.mxu0 %v3869_v24  ;;  %v3498_v24 = vld [vmem:[#allocation8 + $0x20] ss:$12 sps:$4 sm:$0xff]  }
 0x193   :  { %3280 = vmatpush3.bf16.msra.mxu1 %v3498_v24 }
 0x194   :  { %3281 = vmatprep.subr.bf16.mxu1 %v3794_v0 }
 0x197   :  { %3282 = vmatpush3.bf16.msra.mxu1 %v3499_v15 }
 0x198   :  { %3287 = vmatprep.subr.bf16.mxu1 %v3794_v0 }
 0x234   :  { %v852_v21 = vpop.f32.mrf.mxu0  ;;  %v893_v22 = vpop.f32.mrf.mxu1 }
 0x235   :  { %v853_v23 = vadd.f32 %v852_v21, %v806_v19  ;;  %v894_v60 = vadd.f32 %v893_v22, %v814_v58 }
 0x236   :  { %v854_v25 = vpop.f32.mrf.mxu0  ;;  %v3265_v26 = vpop.f32.mrf.mxu1 }
 0x237   :  { %v900_v27 = vrot.slane %v853_v23, 7  ;;  %v855_v30 = vadd.f32 %v854_v25, %v810_v20  ;;  %v920_v63 = vrot.slane %v894_v60, 7 }
 0x238   :  { %v856_v36 = vpop.f32.mrf.mxu0  ;;  %v896_v39 = vpop.f32.mrf.mxu1 }
 0x239   :  { %v902_v42 = vadd.f32 %v900_v27, %v3980_v18  ;;  %v910_v52 = vrot.slane %v855_v30, 7 }
 0x23a   :  { %v857_v45 = vpop.f32.mrf.mxu0  ;;  %v3266_v48 = vpop.f32.mrf.mxu1 }
 0x23b   :  { %v2950_v51 = vmul.f32 -1.442695, %v902_v42  ;;  %v912_v53 = vadd.f32 %v910_v52, %v3985_v33 }
 0x23d   :  { %3582 = vpow2.f32 %v2950_v51  ;;  %v2951_v55 = vmul.f32 -1.442695, %v912_v53 }
 0x23f   :  { %3584 = vpow2.f32 %v2951_v55 }
 0x24a   :  { %v3583_v56 = vpop.eup %3582 }
 0x24b   :  { %v906_v57 = vadd.f32 1.0, %v3583_v56 }
 0x24c   :  { %v3585_v59 = vpop.eup %3584 }
 0x24d   :  { %3586 = vrcp.f32 %v906_v57  ;;  %v916_v62 = vadd.f32 1.0, %v3585_v59 }
 0x24f   :  { %3588 = vrcp.f32 %v916_v62 }
 0x25a   :  { %v3587_v2 = vpop.eup %3586 }
 0x25b   :  { %v922_v3 = vmul.f32 %v3587_v2, %v920_v63 }
 0x25c   :  { %v3589_v6 = vpop.eup %3588 }
 0x25d   :  { %v923_v4 = vadd.f32 %v922_v3, %v3992_v61  ;;  %v925_v7 = vsub.f32 1.0, %v3589_v6  ;;  %v930_v10 = vmul.f32 %v3589_v6, %v928_v9  ;;  %v4089_v6 = vld [vmem:[#allocation8 + $0xa8] ss:$12 sps:$4 sm:$0xff]  }
 0x25e   :  { %v4093_v9 = vld [vmem:[#allocation8 + $0x94] ss:$12 sps:$4 sm:$0xff]  }
 0x25f   :  { %3590 = vtanh.f32 %v923_v4  ;;  %v4087_v4 = vld [vmem:[#allocation8 + $0xac] ss:$12 sps:$4 sm:$0xff]  }
 0x26c   :  { %v3591_v50 = vpop.eup %3590 }
 0x26d   :  { %v926_v5 = vmul.f32 %v3591_v50, %v925_v7  ;;  %v3511_v7 = vld [vmem:[#allocation8 + $0xb0] ss:$12 sps:$4 sm:$0xff]  }
 0x26e   :  { %v4096_v50 = vld [vmem:[#allocation8 + $0x90] ss:$12 sps:$4 sm:$0xff]  }
 0x26f   :  { %v4038_v12 = vadd.f32 %v930_v10, %v926_v5  ;;  %v3515_v5 = vld [vmem:[#allocation8 + $0x98] ss:$12 sps:$4 sm:$0xff]   ;;  %v4100_v10 = vld [vmem:[#allocation8 + $0x7c] ss:$12 sps:$4 sm:$0xff]  }
 0x271   :  { %932 = vst [vmem:[#allocation12] sm:$0x2] %v4038_v12  ;;  %v933_v13 = vpack.c.bf16 %v4038_v12, %v4038_v12  ;;  %v1225_v58 = vrot.slane %v4038_v12, 7  ;;  %v4103_v12 = vld [vmem:[#allocation8 + $0x78] ss:$12 sps:$4 sm:$0xff]  }
 0x273   :  { %v968_v14 = vshrl.u32 %v933_v13, 16  ;;  %v3519_v13 = vld [vmem:[#allocation8 + $0x80] ss:$12 sps:$4 sm:$0xff]  }
 0x275   :  { %1148 = vmatmul.mubr.bf16.vlgmr.msra.gmra.mxu0 %v968_v14  ;;  %3284 = vmatmul.mubr.bf16.vlgmr.msra.gmra.mxu1 %v968_v14  ;;  %v4106_v14 = vld [vmem:[#allocation8 + $0x64] ss:$12 sps:$4 sm:$0xff]  }
 0x276   :  { %1412 = vmatpush1.bf16.msra.mxu0 %v3876_v28  ;;  %1443 = vmatprep.mubr.bf16.mxu0 %v3795_v1  ;;  %v3500_v28 = vld [vmem:[#allocation8 + $0xb0] ss:$12 sps:$4 sm:$0xff]  }
 0x277   :  { %1413 = vmatprep.subr.bf16.mxu0 %v3879_v29  ;;  %3303 = vmatprep.mubr.msk.bf16.mxu1 %vm3796_vm0, %v3794_v0  ;;  %v3501_v29 = vld [vmem:[#allocation8 + $0x98] ss:$12 sps:$4 sm:$0xff]  }
 0x278   :  { %3288 = vmatpush3.bf16.msra.mxu1 %v3500_v28  ;;  %v4109_v28 = vld [vmem:[#allocation8 + $0x60] ss:$12 sps:$4 sm:$0xff]  }
 0x279   :  { %3289 = vmatprep.subr.bf16.mxu1 %v3794_v0 }
 0x27a   :  { %1414 = vmatpush1.bf16.msra.mxu0 %v3883_v31  ;;  %v3502_v31 = vld [vmem:[#allocation8 + $0x80] ss:$12 sps:$4 sm:$0xff]  }
 0x27b   :  { %1415 = vmatprep.subr.bf16.mxu0 %v3887_v32  ;;  %v3503_v32 = vld [vmem:[#allocation8 + $0x68] ss:$12 sps:$4 sm:$0xff]  }
 0x27c   :  { %3290 = vmatpush3.bf16.msra.mxu1 %v3501_v29  ;;  %v3523_v29 = vld [vmem:[#allocation8 + $0x68] ss:$12 sps:$4 sm:$0xff]  }
 0x27d   :  { %3291 = vmatprep.subr.bf16.mxu1 %v3794_v0 }
 0x27e   :  { %1416 = vmatpush1.bf16.msra.mxu0 %v3889_v34  ;;  %v3504_v34 = vld [vmem:[#allocation8 + $0x50] ss:$12 sps:$4 sm:$0xff]  }
 0x27f   :  { %1417 = vmatprep.subr.bf16.mxu0 %v3891_v35  ;;  %v3505_v35 = vld [vmem:[#allocation8 + $0x38] ss:$12 sps:$4 sm:$0xff]  }
 0x280   :  { %3292 = vmatpush3.bf16.msra.mxu1 %v3502_v31  ;;  %v4113_v31 = vld [vmem:[#allocation8 + $0x4c] ss:$12 sps:$4 sm:$0xff]  }
 0x281   :  { %3293 = vmatprep.subr.bf16.mxu1 %v3794_v0 }
 0x282   :  { %1418 = vmatpush1.bf16.msra.mxu0 %v3896_v37  ;;  %v3506_v37 = vld [vmem:[#allocation8 + $0x20] ss:$12 sps:$4 sm:$0xff]  }
 0x283   :  { %1419 = vmatprep.subr.bf16.mxu0 %v3898_v38  ;;  %v3507_v38 = vld [vmem:[#allocation8 + $0x8] ss:$12 sps:$4 sm:$0xff]  }
 0x284   :  { %3294 = vmatpush3.bf16.msra.mxu1 %v3503_v32  ;;  %v4116_v32 = vld [vmem:[#allocation8 + $0x48] ss:$12 sps:$4 sm:$0xff]  }
 0x285   :  { %3295 = vmatprep.subr.bf16.mxu1 %v3794_v0 }
 0x286   :  { %1420 = vmatpush1.bf16.msra.mxu0 %v3903_v40  ;;  %v966_v40 = vld [vmem:[%s4317_s5] sm:$0x7] }
 0x287   :  { %1421 = vmatprep.subr.bf16.mxu0 %v3907_v41  ;;  %v1103_v41 = vrot.slane %v966_v40, %v3968_v11  ;;  %v1111_v39 = vrot.slane %v966_v40, %v3988_v54 }
 0x288   :  { %3296 = vmatpush3.bf16.msra.mxu1 %v3504_v34  ;;  %v3527_v34 = vld [vmem:[#allocation8 + $0x50] ss:$12 sps:$4 sm:$0xff]  }
 0x289   :  { %3297 = vmatprep.subr.bf16.mxu1 %v3794_v0 }
 0x28a   :  { %1422 = vmatpush1.bf16.msra.mxu0 %v3912_v43  ;;  %v1107_v43 = vrot.slane %v966_v40, %v3978_v16  ;;  %v4127_v40 = vld [vmem:[#allocation8 + $0x1c] ss:$12 sps:$4 sm:$0xff]  }
 0x28b   :  { %1423 = vmatprep.subr.bf16.mxu0 %v3914_v44 }
 0x28c   :  { %3298 = vmatpush3.bf16.msra.mxu1 %v3505_v35  ;;  %v4120_v35 = vld [vmem:[#allocation8 + $0x34] ss:$12 sps:$4 sm:$0xff]  }
 0x28d   :  { %3299 = vmatprep.subr.bf16.mxu1 %v3794_v0 }
 0x28e   :  { %1424 = vmatpush1.bf16.msra.mxu0 %v3919_v46 }
 0x28f   :  { %1425 = vmatprep.subr.bf16.mxu0 %v3921_v47 }
 0x290   :  { %3300 = vmatpush3.bf16.msra.mxu1 %v3506_v37  ;;  %v4123_v37 = vld [vmem:[#allocation8 + $0x30] ss:$12 sps:$4 sm:$0xff]  }
 0x291   :  { %3301 = vmatprep.subr.bf16.mxu1 %v3794_v0 }
 0x292   :  { %1426 = vmatpush1.bf16.msra.mxu0 %v3926_v49 }
 0x293   :  { %1709 = vmatprep.subr.bf16.mxu0 %v4087_v4 }
 0x294   :  { %3302 = vmatpush3.bf16.msra.mxu1 %v3507_v38  ;;  %v3531_v38 = vld [vmem:[#allocation8 + $0x38] ss:$12 sps:$4 sm:$0xff]  }
 0x295   :  { %3307 = vmatprep.subr.bf16.mxu1 %v3794_v0 }
 0x335   :  { %v1149_v44 = vpop.f32.mrf.mxu0  ;;  %v1190_v46 = vpop.f32.mrf.mxu1 }
 0x336   :  { %v1150_v47 = vadd.f32 %v1149_v44, %v1103_v41  ;;  %v1191_v45 = vadd.f32 %v1190_v46, %v1111_v39  ;;  %v4130_v41 = vld [vmem:[#allocation8 + $0x18] ss:$12 sps:$4 sm:$0xff]   ;;  %v4137_v46 = vld [vmem:[#allocation8] ss:$12 sps:$4 sm:$0xff]  }
 0x337   :  { %v1151_v49 = vpop.f32.mrf.mxu0  ;;  %v3285_v8 = vpop.f32.mrf.mxu1  ;;  %v4134_v44 = vld [vmem:[#allocation8 + $0x4] ss:$12 sps:$4 sm:$0xff]  }
 0x338   :  { %v1197_v24 = vrot.slane %v1150_v47, 6  ;;  %v1152_v15 = vadd.f32 %v1151_v49, %v1107_v43  ;;  %v1217_v51 = vrot.slane %v1191_v45, 6  ;;  %v3535_v43 = vld [vmem:[#allocation8 + $0x20] ss:$12 sps:$4 sm:$0xff]   ;;  %v3539_v47 = vld [vmem:[#allocation8 + $0x8] ss:$12 sps:$4 sm:$0xff]  }
 0x339   :  { %v1153_v17 = vpop.f32.mrf.mxu0  ;;  %v1193_v19 = vpop.f32.mrf.mxu1  ;;  %v1263_v49 = vld [vmem:[%s4317_s5] sm:$0x7] }
 0x33a   :  { %v1199_v20 = vadd.f32 %v1197_v24, %v3980_v18  ;;  %v1207_v25 = vrot.slane %v1152_v15, 6  ;;  %v1399_v8 = vrot.slane %v1263_v49, %v3968_v11  ;;  %v1403_v24 = vrot.slane %v1263_v49, %v3978_v16 }
 0x33b   :  { %v1154_v21 = vpop.f32.mrf.mxu0  ;;  %v3286_v22 = vpop.f32.mrf.mxu1 }
 0x33c   :  { %v2976_v23 = vmul.f32 -1.442695, %v1199_v20  ;;  %v1209_v26 = vadd.f32 %v1207_v25, %v3985_v33 }
 0x33e   :  { %3592 = vpow2.f32 %v2976_v23  ;;  %v2977_v27 = vmul.f32 -1.442695, %v1209_v26 }
 0x340   :  { %3594 = vpow2.f32 %v2977_v27 }
 0x34b   :  { %v3593_v30 = vpop.eup %3592 }
 0x34c   :  { %v1203_v36 = vadd.f32 1.0, %v3593_v30 }
 0x34d   :  { %v3595_v42 = vpop.eup %3594 }
 0x34e   :  { %3596 = vrcp.f32 %v1203_v36  ;;  %v1213_v48 = vadd.f32 1.0, %v3595_v42 }
 0x350   :  { %3598 = vrcp.f32 %v1213_v48 }
 0x35b   :  { %v3597_v52 = vpop.eup %3596 }
 0x35c   :  { %v1219_v53 = vmul.f32 %v3597_v52, %v1217_v51 }
 0x35d   :  { %v3599_v56 = vpop.eup %3598 }
 0x35e   :  { %v1220_v55 = vadd.f32 %v1219_v53, %v3992_v61  ;;  %v1222_v57 = vsub.f32 1.0, %v3599_v56  ;;  %v1227_v62 = vmul.f32 %v3599_v56, %v1225_v58  ;;  %v1407_v53 = vrot.slane %v1263_v49, %v3988_v54  ;;  %v3541_v49 = vld [vmem:[#allocation8 + $0x98] ss:$12 sps:$4 sm:$0xff]  }
 0x360   :  { %3600 = vtanh.f32 %v1220_v55 }
 0x36d   :  { %v3601_v59 = vpop.eup %3600 }
 0x36e   :  { %v1223_v60 = vmul.f32 %v3601_v59, %v1222_v57 }
 0x370   :  { %v4079_v63 = vadd.f32 %v1227_v62, %v1223_v60 }
 0x372   :  { %1229 = vst [vmem:[#allocation12] sm:$0x4] %v4079_v63  ;;  %v1230_v2 = vpack.c.bf16 %v4079_v63, %v4079_v63 }
 0x374   :  { %v1265_v3 = vrot.slane %v1230_v2, 1 }
 0x376   :  { %1444 = vmatmul.mubr.bf16.vlgmr.msra.gmra.mxu0 %v1265_v3  ;;  %3304 = vmatmul.mubr.bf16.vlgmr.msra.gmra.mxu1 %v1265_v3 }
 0x377   :  { %1741 = vmatprep.mubr.bf16.mxu0 %v3795_v1  ;;  %3323 = vmatprep.mubr.msk.bf16.mxu1 %vm3796_vm0, %v3794_v0 }
 0x378   :  { %1710 = vmatpush1.bf16.msra.mxu0 %v4089_v6  ;;  %3308 = vmatpush3.bf16.msra.mxu1 %v3511_v7  ;;  %v1521_v7 = vrot.slane %v4079_v63, 7  ;;  %v3540_v63 = vld [vmem:[#allocation8 + $0xb0] ss:$12 sps:$4 sm:$0xff]  }
 0x379   :  { %3309 = vmatprep.subr.bf16.mxu1 %v3794_v0  ;;  %1711 = vmatprep.subr.bf16.mxu0 %v4093_v9 }
 0x37c   :  { %1712 = vmatpush1.bf16.msra.mxu0 %v4096_v50  ;;  %3310 = vmatpush3.bf16.msra.mxu1 %v3515_v5 }
 0x37d   :  { %3311 = vmatprep.subr.bf16.mxu1 %v3794_v0  ;;  %1713 = vmatprep.subr.bf16.mxu0 %v4100_v10 }
 0x380   :  { %1714 = vmatpush1.bf16.msra.mxu0 %v4103_v12  ;;  %3312 = vmatpush3.bf16.msra.mxu1 %v3519_v13 }
 0x381   :  { %1715 = vmatprep.subr.bf16.mxu0 %v4106_v14  ;;  %3313 = vmatprep.subr.bf16.mxu1 %v3794_v0 }
 0x384   :  { %1716 = vmatpush1.bf16.msra.mxu0 %v4109_v28  ;;  %3314 = vmatpush3.bf16.msra.mxu1 %v3523_v29 }
 0x385   :  { %1717 = vmatprep.subr.bf16.mxu0 %v4113_v31  ;;  %3315 = vmatprep.subr.bf16.mxu1 %v3794_v0 }
 0x388   :  { %1718 = vmatpush1.bf16.msra.mxu0 %v4116_v32  ;;  %3316 = vmatpush3.bf16.msra.mxu1 %v3527_v34 }
 0x389   :  { %1719 = vmatprep.subr.bf16.mxu0 %v4120_v35  ;;  %3317 = vmatprep.subr.bf16.mxu1 %v3794_v0 }
 0x38c   :  { %1720 = vmatpush1.bf16.msra.mxu0 %v4123_v37  ;;  %3318 = vmatpush3.bf16.msra.mxu1 %v3531_v38 }
 0x38d   :  { %1721 = vmatprep.subr.bf16.mxu0 %v4127_v40  ;;  %3319 = vmatprep.subr.bf16.mxu1 %v3794_v0 }
 0x390   :  { %1722 = vmatpush1.bf16.msra.mxu0 %v4130_v41  ;;  %3320 = vmatpush3.bf16.msra.mxu1 %v3535_v43 }
 0x391   :  { %1723 = vmatprep.subr.bf16.mxu0 %v4134_v44  ;;  %3321 = vmatprep.subr.bf16.mxu1 %v3794_v0 }
 0x394   :  { %1724 = vmatpush1.bf16.msra.mxu0 %v4137_v46  ;;  %3322 = vmatpush3.bf16.msra.mxu1 %v3539_v47 }
 0x395   :  { %2005 = vmatprep.subr.bf16.mxu0 %v4087_v4  ;;  %3327 = vmatprep.subr.bf16.mxu1 %v3794_v0 }
 0x436   :  { %v1445_v15 = vpop.f32.mrf.mxu0  ;;  %v1486_v17 = vpop.f32.mrf.mxu1 }
 0x437   :  { %v1446_v19 = vadd.f32 %v1445_v15, %v1399_v8  ;;  %v1487_v56 = vadd.f32 %v1486_v17, %v1407_v53  ;;  %v3542_v8 = vld [vmem:[#allocation8 + $0x80] ss:$12 sps:$4 sm:$0xff]   ;;  %v3544_v15 = vld [vmem:[#allocation8 + $0x50] ss:$12 sps:$4 sm:$0xff]   ;;  %v3545_v17 = vld [vmem:[#allocation8 + $0x38] ss:$12 sps:$4 sm:$0xff]  }
 0x438   :  { %v1447_v20 = vpop.f32.mrf.mxu0  ;;  %v3305_v21 = vpop.f32.mrf.mxu1 }
 0x439   :  { %v1493_v22 = vrot.slane %v1446_v19, 5  ;;  %v1448_v23 = vadd.f32 %v1447_v20, %v1403_v24  ;;  %v1513_v58 = vrot.slane %v1487_v56, 5  ;;  %v3543_v24 = vld [vmem:[#allocation8 + $0x68] ss:$12 sps:$4 sm:$0xff]   ;;  %v3546_v19 = vld [vmem:[#allocation8 + $0x20] ss:$12 sps:$4 sm:$0xff]  }
 0x43a   :  { %v1449_v25 = vpop.f32.mrf.mxu0  ;;  %v1489_v26 = vpop.f32.mrf.mxu1  ;;  %v3547_v20 = vld [vmem:[#allocation8 + $0x8] ss:$12 sps:$4 sm:$0xff]   ;;  %v1559_v21 = vld [vmem:[%s4317_s5] sm:$0x7] }
 0x43b   :  { %v1495_v27 = vadd.f32 %v1493_v22, %v3980_v18  ;;  %v1503_v42 = vrot.slane %v1448_v23, 5  ;;  %v1697_v22 = vrot.slane %v1559_v21, %v3968_v11  ;;  %v1701_v23 = vrot.slane %v1559_v21, %v3978_v16 }
 0x43c   :  { %v1450_v30 = vpop.f32.mrf.mxu0  ;;  %v3306_v36 = vpop.f32.mrf.mxu1 }
 0x43d   :  { %v3002_v39 = vmul.f32 -1.442695, %v1495_v27  ;;  %v1505_v45 = vadd.f32 %v1503_v42, %v3985_v33 }
 0x43f   :  { %3602 = vpow2.f32 %v3002_v39  ;;  %v3003_v48 = vmul.f32 -1.442695, %v1505_v45 }
 0x441   :  { %3604 = vpow2.f32 %v3003_v48 }
 0x44c   :  { %v3603_v51 = vpop.eup %3602 }
 0x44d   :  { %v1499_v52 = vadd.f32 1.0, %v3603_v51 }
 0x44e   :  { %v3605_v55 = vpop.eup %3604 }
 0x44f   :  { %3606 = vrcp.f32 %v1499_v52  ;;  %v1509_v57 = vadd.f32 1.0, %v3605_v55 }
 0x451   :  { %3608 = vrcp.f32 %v1509_v57 }
 0x45c   :  { %v3607_v59 = vpop.eup %3606 }
 0x45d   :  { %v1515_v60 = vmul.f32 %v3607_v59, %v1513_v58 }
 0x45e   :  { %v3609_v2 = vpop.eup %3608 }
 0x45f   :  { %v1516_v62 = vadd.f32 %v1515_v60, %v3992_v61  ;;  %v1518_v3 = vsub.f32 1.0, %v3609_v2  ;;  %v1523_v29 = vmul.f32 %v3609_v2, %v1521_v7 }
 0x461   :  { %3610 = vtanh.f32 %v1516_v62  ;;  %v1705_v62 = vrot.slane %v1559_v21, %v3988_v54  ;;  %v3550_v21 = vld [vmem:[#allocation8 + $0x80] ss:$12 sps:$4 sm:$0xff]  }
 0x46e   :  { %v3611_v5 = vpop.eup %3610 }
 0x46f   :  { %v1519_v13 = vmul.f32 %v3611_v5, %v1518_v3 }
 0x471   :  { %v4154_v34 = vadd.f32 %v1523_v29, %v1519_v13 }
 0x473   :  { %1525 = vst [vmem:[#allocation12] sm:$0x8] %v4154_v34  ;;  %v1526_v38 = vpack.c.bf16 %v4154_v34, %v4154_v34 }
 0x475   :  { %v1561_v43 = vshrl.u32 %v1526_v38, 16 }
 0x477   :  { %v1563_v47 = vrot.slane %v1561_v43, 1 }
 0x479   :  { %1742 = vmatmul.mubr.bf16.vlgmr.msra.gmra.mxu0 %v1563_v47  ;;  %3324 = vmatmul.mubr.bf16.vlgmr.msra.gmra.mxu1 %v1563_v47 }
 0x47a   :  { %2006 = vmatpush1.bf16.msra.mxu0 %v4089_v6  ;;  %2037 = vmatprep.mubr.bf16.mxu0 %v3795_v1 }
 0x47b   :  { %2007 = vmatprep.subr.bf16.mxu0 %v4093_v9  ;;  %3343 = vmatprep.mubr.msk.bf16.mxu1 %vm3796_vm0, %v3794_v0 }
 0x47c   :  { %3328 = vmatpush3.bf16.msra.mxu1 %v3540_v63  ;;  %v1819_v63 = vrot.slane %v4154_v34, 7  ;;  %v3548_v34 = vld [vmem:[#allocation8 + $0xb0] ss:$12 sps:$4 sm:$0xff]  }
 0x47d   :  { %3329 = vmatprep.subr.bf16.mxu1 %v3794_v0 }
 0x47e   :  { %2008 = vmatpush1.bf16.msra.mxu0 %v4096_v50 }
 0x47f   :  { %2009 = vmatprep.subr.bf16.mxu0 %v4100_v10 }
 0x480   :  { %3330 = vmatpush3.bf16.msra.mxu1 %v3541_v49 }
 0x481   :  { %3331 = vmatprep.subr.bf16.mxu1 %v3794_v0 }
 0x482   :  { %2010 = vmatpush1.bf16.msra.mxu0 %v4103_v12 }
 0x483   :  { %2011 = vmatprep.subr.bf16.mxu0 %v4106_v14 }
 0x484   :  { %3332 = vmatpush3.bf16.msra.mxu1 %v3542_v8 }
 0x485   :  { %3333 = vmatprep.subr.bf16.mxu1 %v3794_v0 }
 0x486   :  { %2012 = vmatpush1.bf16.msra.mxu0 %v4109_v28 }
 0x487   :  { %2013 = vmatprep.subr.bf16.mxu0 %v4113_v31 }
 0x488   :  { %3334 = vmatpush3.bf16.msra.mxu1 %v3543_v24 }
 0x489   :  { %3335 = vmatprep.subr.bf16.mxu1 %v3794_v0 }
 0x48a   :  { %2014 = vmatpush1.bf16.msra.mxu0 %v4116_v32 }
 0x48b   :  { %2015 = vmatprep.subr.bf16.mxu0 %v4120_v35 }
 0x48c   :  { %3336 = vmatpush3.bf16.msra.mxu1 %v3544_v15 }
 0x48d   :  { %3337 = vmatprep.subr.bf16.mxu1 %v3794_v0 }
 0x48e   :  { %2016 = vmatpush1.bf16.msra.mxu0 %v4123_v37 }
 0x48f   :  { %2017 = vmatprep.subr.bf16.mxu0 %v4127_v40 }
 0x490   :  { %3338 = vmatpush3.bf16.msra.mxu1 %v3545_v17 }
 0x491   :  { %3339 = vmatprep.subr.bf16.mxu1 %v3794_v0 }
 0x492   :  { %2018 = vmatpush1.bf16.msra.mxu0 %v4130_v41 }
 0x493   :  { %2019 = vmatprep.subr.bf16.mxu0 %v4134_v44 }
 0x494   :  { %3340 = vmatpush3.bf16.msra.mxu1 %v3546_v19 }
 0x495   :  { %3341 = vmatprep.subr.bf16.mxu1 %v3794_v0 }
 0x496   :  { %2020 = vmatpush1.bf16.msra.mxu0 %v4137_v46 }
 0x497   :  { %2303 = vmatprep.subr.bf16.mxu0 %v4087_v4 }
 0x498   :  { %3342 = vmatpush3.bf16.msra.mxu1 %v3547_v20  ;;  %v3549_v20 = vld [vmem:[#allocation8 + $0x98] ss:$12 sps:$4 sm:$0xff]  }
 0x499   :  { %3347 = vmatprep.subr.bf16.mxu1 %v3794_v0 }
 0x539   :  { %v1743_v25 = vpop.f32.mrf.mxu0  ;;  %v1784_v26 = vpop.f32.mrf.mxu1 }
 0x53a   :  { %v1744_v27 = vadd.f32 %v1743_v25, %v1697_v22  ;;  %v1785_v3 = vadd.f32 %v1784_v26, %v1705_v62  ;;  %v3551_v22 = vld [vmem:[#allocation8 + $0x68] ss:$12 sps:$4 sm:$0xff]   ;;  %v3553_v25 = vld [vmem:[#allocation8 + $0x38] ss:$12 sps:$4 sm:$0xff]  }
 0x53b   :  { %v1745_v30 = vpop.f32.mrf.mxu0  ;;  %v3325_v36 = vpop.f32.mrf.mxu1  ;;  %v3555_v26 = vld [vmem:[#allocation8 + $0x8] ss:$12 sps:$4 sm:$0xff]  }
 0x53c   :  { %v1791_v39 = vrot.slane %v1744_v27, 4  ;;  %v1746_v42 = vadd.f32 %v1745_v30, %v1701_v23  ;;  %v1811_v5 = vrot.slane %v1785_v3, 4  ;;  %v3552_v23 = vld [vmem:[#allocation8 + $0x50] ss:$12 sps:$4 sm:$0xff]  }
 0x53d   :  { %v1747_v45 = vpop.f32.mrf.mxu0  ;;  %v1787_v48 = vpop.f32.mrf.mxu1  ;;  %v1857_v27 = vld [vmem:[%s4317_s5] sm:$0x7] }
 0x53e   :  { %v1793_v51 = vadd.f32 %v1791_v39, %v3980_v18  ;;  %v1801_v56 = vrot.slane %v1746_v42, 4  ;;  %v1993_v30 = vrot.slane %v1857_v27, %v3968_v11  ;;  %v1997_v36 = vrot.slane %v1857_v27, %v3978_v16 }
 0x53f   :  { %v1748_v52 = vpop.f32.mrf.mxu0  ;;  %v3326_v53 = vpop.f32.mrf.mxu1 }
 0x540   :  { %v3028_v55 = vmul.f32 -1.442695, %v1793_v51  ;;  %v1803_v57 = vadd.f32 %v1801_v56, %v3985_v33 }
 0x542   :  { %3612 = vpow2.f32 %v3028_v55  ;;  %v3029_v58 = vmul.f32 -1.442695, %v1803_v57 }
 0x544   :  { %3614 = vpow2.f32 %v3029_v58 }
 0x54f   :  { %v3613_v59 = vpop.eup %3612 }
 0x550   :  { %v1797_v60 = vadd.f32 1.0, %v3613_v59 }
 0x551   :  { %v3615_v2 = vpop.eup %3614 }
 0x552   :  { %3616 = vrcp.f32 %v1797_v60  ;;  %v1807_v7 = vadd.f32 1.0, %v3615_v2 }
 0x554   :  { %3618 = vrcp.f32 %v1807_v7 }
 0x55f   :  { %v3617_v13 = vpop.eup %3616 }
 0x560   :  { %v1813_v29 = vmul.f32 %v3617_v13, %v1811_v5  ;;  %v2001_v13 = vrot.slane %v1857_v27, %v3988_v54 }
 0x561   :  { %v3619_v43 = vpop.eup %3618 }
 0x562   :  { %v1814_v38 = vadd.f32 %v1813_v29, %v3992_v61  ;;  %v1816_v47 = vsub.f32 1.0, %v3619_v43  ;;  %v1821_v24 = vmul.f32 %v3619_v43, %v1819_v63 }
 0x564   :  { %3620 = vtanh.f32 %v1814_v38 }
 0x571   :  { %v3621_v49 = vpop.eup %3620 }
 0x572   :  { %v1817_v8 = vmul.f32 %v3621_v49, %v1816_v47 }
 0x574   :  { %v4196_v15 = vadd.f32 %v1821_v24, %v1817_v8 }
 0x576   :  { %1823 = vst [vmem:[#allocation12] sm:$0x10] %v4196_v15  ;;  %v1824_v17 = vpack.c.bf16 %v4196_v15, %v4196_v15 }
 0x578   :  { %v1859_v19 = vrot.slane %v1824_v17, 2 }
 0x57a   :  { %2038 = vmatmul.mubr.bf16.vlgmr.msra.gmra.mxu0 %v1859_v19  ;;  %3344 = vmatmul.mubr.bf16.vlgmr.msra.gmra.mxu1 %v1859_v19  ;;  %v2115_v19 = vrot.slane %v4196_v15, 7 }
 0x57b   :  { %2304 = vmatpush1.bf16.msra.mxu0 %v4089_v6  ;;  %2335 = vmatprep.mubr.bf16.mxu0 %v3795_v1 }
 0x57c   :  { %2305 = vmatprep.subr.bf16.mxu0 %v4093_v9  ;;  %3363 = vmatprep.mubr.msk.bf16.mxu1 %vm3796_vm0, %v3794_v0 }
 0x57d   :  { %3348 = vmatpush3.bf16.msra.mxu1 %v3548_v34 }
 0x57e   :  { %3349 = vmatprep.subr.bf16.mxu1 %v3794_v0 }
 0x57f   :  { %2306 = vmatpush1.bf16.msra.mxu0 %v4096_v50 }
 0x580   :  { %2307 = vmatprep.subr.bf16.mxu0 %v4100_v10 }
 0x581   :  { %3350 = vmatpush3.bf16.msra.mxu1 %v3549_v20 }
 0x582   :  { %3351 = vmatprep.subr.bf16.mxu1 %v3794_v0 }
 0x583   :  { %2308 = vmatpush1.bf16.msra.mxu0 %v4103_v12 }
 0x584   :  { %2309 = vmatprep.subr.bf16.mxu0 %v4106_v14 }
 0x585   :  { %3352 = vmatpush3.bf16.msra.mxu1 %v3550_v21 }
 0x586   :  { %3353 = vmatprep.subr.bf16.mxu1 %v3794_v0 }
 0x587   :  { %2310 = vmatpush1.bf16.msra.mxu0 %v4109_v28 }
 0x588   :  { %2311 = vmatprep.subr.bf16.mxu0 %v4113_v31 }
 0x589   :  { %3354 = vmatpush3.bf16.msra.mxu1 %v3551_v22 }
 0x58a   :  { %3355 = vmatprep.subr.bf16.mxu1 %v3794_v0 }
 0x58b   :  { %2312 = vmatpush1.bf16.msra.mxu0 %v4116_v32 }
 0x58c   :  { %2313 = vmatprep.subr.bf16.mxu0 %v4120_v35 }
 0x58d   :  { %3356 = vmatpush3.bf16.msra.mxu1 %v3552_v23 }
 0x58e   :  { %3357 = vmatprep.subr.bf16.mxu1 %v3794_v0 }
 0x58f   :  { %2314 = vmatpush1.bf16.msra.mxu0 %v4123_v37 }
 0x590   :  { %2315 = vmatprep.subr.bf16.mxu0 %v4127_v40 }
 0x591   :  { %3358 = vmatpush3.bf16.msra.mxu1 %v3553_v25 }
 0x592   :  { %3359 = vmatprep.subr.bf16.mxu1 %v3794_v0 }
 0x593   :  { %2316 = vmatpush1.bf16.msra.mxu0 %v4130_v41 }
 0x594   :  { %2317 = vmatprep.subr.bf16.mxu0 %v4134_v44 }
 0x597   :  { %2318 = vmatpush1.bf16.msra.mxu0 %v4137_v46 }
 0x598   :  { %2599 = vmatprep.subr.bf16.mxu0 %v4087_v4  ;;  %v3554_v4 = vld [vmem:[#allocation8 + $0x20] ss:$12 sps:$4 sm:$0xff]  }
 0x599   :  { %3360 = vmatpush3.bf16.msra.mxu1 %v3554_v4 }
 0x59a   :  { %3361 = vmatprep.subr.bf16.mxu1 %v3794_v0 }
 0x59d   :  { %3362 = vmatpush3.bf16.msra.mxu1 %v3555_v26 }
 0x59e   :  { %3367 = vmatprep.subr.bf16.mxu1 %v3794_v0 }
 0x63a   :  { %v2039_v39 = vpop.f32.mrf.mxu0  ;;  %v2080_v42 = vpop.f32.mrf.mxu1 }
 0x63b   :  { %v2040_v45 = vadd.f32 %v2039_v39, %v1993_v30  ;;  %v2081_v38 = vadd.f32 %v2080_v42, %v2001_v13 }
 0x63c   :  { %v2041_v48 = vpop.f32.mrf.mxu0  ;;  %v3345_v51 = vpop.f32.mrf.mxu1 }
 0x63d   :  { %v2087_v52 = vrot.slane %v2040_v45, 3  ;;  %v2042_v53 = vadd.f32 %v2041_v48, %v1997_v36  ;;  %v2107_v47 = vrot.slane %v2081_v38, 3 }
 0x63e   :  { %v2043_v55 = vpop.f32.mrf.mxu0  ;;  %v2083_v56 = vpop.f32.mrf.mxu1 }
 0x63f   :  { %v2089_v57 = vadd.f32 %v2087_v52, %v3980_v18  ;;  %v2097_v62 = vrot.slane %v2042_v53, 3 }
 0x640   :  { %v2044_v58 = vpop.f32.mrf.mxu0  ;;  %v3346_v59 = vpop.f32.mrf.mxu1 }
 0x641   :  { %v3054_v60 = vmul.f32 -1.442695, %v2089_v57  ;;  %v2099_v2 = vadd.f32 %v2097_v62, %v3985_v33 }
 0x643   :  { %3622 = vpow2.f32 %v3054_v60  ;;  %v3055_v3 = vmul.f32 -1.442695, %v2099_v2 }
 0x645   :  { %3624 = vpow2.f32 %v3055_v3 }
 0x650   :  { %v3623_v7 = vpop.eup %3622 }
 0x651   :  { %v2093_v5 = vadd.f32 1.0, %v3623_v7 }
 0x652   :  { %v3625_v29 = vpop.eup %3624 }
 0x653   :  { %3626 = vrcp.f32 %v2093_v5  ;;  %v2103_v43 = vadd.f32 1.0, %v3625_v29 }
 0x655   :  { %3628 = vrcp.f32 %v2103_v43 }
 0x660   :  { %v3627_v63 = vpop.eup %3626 }
 0x661   :  { %v2109_v49 = vmul.f32 %v3627_v63, %v2107_v47 }
 0x662   :  { %v3629_v24 = vpop.eup %3628 }
 0x663   :  { %v2110_v8 = vadd.f32 %v2109_v49, %v3992_v61  ;;  %v2112_v17 = vsub.f32 1.0, %v3629_v24  ;;  %v2117_v21 = vmul.f32 %v3629_v24, %v2115_v19  ;;  %v3565_v24 = vld [vmem:[#allocation9 + $0x30] sm:$0xff]   ;;  %v3567_v19 = vld [vmem:[#allocation9 + $0x20] sm:$0xff]  }
 0x665   :  { %3630 = vtanh.f32 %v2110_v8  ;;  %v3564_v8 = vld [vmem:[#allocation9 + $0x38] sm:$0xff]  }
 0x672   :  { %v3631_v34 = vpop.eup %3630 }
 0x673   :  { %v2113_v20 = vmul.f32 %v3631_v34, %v2112_v17  ;;  %v3566_v17 = vld [vmem:[#allocation9 + $0x28] sm:$0xff]   ;;  %v3568_v34 = vld [vmem:[#allocation9 + $0x18] sm:$0xff]  }
 0x675   :  { %v4238_v22 = vadd.f32 %v2117_v21, %v2113_v20  ;;  %v3569_v20 = vld [vmem:[#allocation9 + $0x10] sm:$0xff]   ;;  %v3570_v21 = vld [vmem:[#allocation9 + $0x8] sm:$0xff]  }
 0x677   :  { %2119 = vst [vmem:[#allocation12] sm:$0x20] %v4238_v22  ;;  %v2120_v23 = vpack.c.bf16 %v4238_v22, %v4238_v22  ;;  %v2413_v13 = vrot.slane %v4238_v22, 7  ;;  %v3571_v22 = vld [vmem:[#allocation9] sm:$0xff]  }
 0x679   :  { %v2155_v25 = vshrl.u32 %v2120_v23, 16  ;;  %v2451_v23 = vld [vmem:[%s4317_s5] sm:$0x7] }
 0x67b   :  { %v2157_v4 = vrot.slane %v2155_v25, 2  ;;  %v2587_v25 = vrot.slane %v2451_v23, %v3968_v11 }
 0x67d   :  { %2336 = vmatmul.mubr.bf16.vlgmr.msra.gmra.mxu0 %v2157_v4  ;;  %3364 = vmatmul.mubr.bf16.vlgmr.msra.gmra.mxu1 %v2157_v4  ;;  %v2591_v4 = vrot.slane %v2451_v23, %v3978_v16 }
 0x67e   :  { %2600 = vmatpush1.bf16.msra.mxu0 %v4089_v6  ;;  %2631 = vmatprep.mubr.bf16.mxu0 %v3795_v1  ;;  %v3556_v1 = vld [vmem:[#allocation8 + $0xb0] ss:$12 sps:$4 sm:$0xff]   ;;  %v3557_v6 = vld [vmem:[#allocation8 + $0x98] ss:$12 sps:$4 sm:$0xff]  }
 0x67f   :  { %2601 = vmatprep.subr.bf16.mxu0 %v4093_v9  ;;  %3383 = vmatprep.mubr.msk.bf16.mxu1 %vm3796_vm0, %v3794_v0  ;;  %v3558_v9 = vld [vmem:[#allocation8 + $0x80] ss:$12 sps:$4 sm:$0xff]  }
 0x680   :  { %3368 = vmatpush3.bf16.msra.mxu1 %v3556_v1 }
 0x681   :  { %3369 = vmatprep.subr.bf16.mxu1 %v3794_v0 }
 0x682   :  { %2602 = vmatpush1.bf16.msra.mxu0 %v4096_v50  ;;  %v3559_v50 = vld [vmem:[#allocation8 + $0x68] ss:$12 sps:$4 sm:$0xff]  }
 0x683   :  { %2603 = vmatprep.subr.bf16.mxu0 %v4100_v10  ;;  %v3560_v10 = vld [vmem:[#allocation8 + $0x50] ss:$12 sps:$4 sm:$0xff]  }
 0x684   :  { %3370 = vmatpush3.bf16.msra.mxu1 %v3557_v6 }
 0x685   :  { %3371 = vmatprep.subr.bf16.mxu1 %v3794_v0 }
 0x686   :  { %2604 = vmatpush1.bf16.msra.mxu0 %v4103_v12  ;;  %v3561_v12 = vld [vmem:[#allocation8 + $0x38] ss:$12 sps:$4 sm:$0xff]  }
 0x687   :  { %2605 = vmatprep.subr.bf16.mxu0 %v4106_v14  ;;  %v3562_v14 = vld [vmem:[#allocation8 + $0x20] ss:$12 sps:$4 sm:$0xff]  }
 0x688   :  { %3372 = vmatpush3.bf16.msra.mxu1 %v3558_v9 }
 0x689   :  { %3373 = vmatprep.subr.bf16.mxu1 %v3794_v0 }
 0x68a   :  { %2606 = vmatpush1.bf16.msra.mxu0 %v4109_v28  ;;  %v3563_v28 = vld [vmem:[#allocation8 + $0x8] ss:$12 sps:$4 sm:$0xff]  }
 0x68b   :  { %2607 = vmatprep.subr.bf16.mxu0 %v4113_v31  ;;  %v2153_v31 = vld [vmem:[%s4317_s5] sm:$0x7] }
 0x68c   :  { %3374 = vmatpush3.bf16.msra.mxu1 %v3559_v50  ;;  %v2299_v56 = vrot.slane %v2153_v31, %v3988_v54 }
 0x68d   :  { %3375 = vmatprep.subr.bf16.mxu1 %v3794_v0 }
 0x68e   :  { %2608 = vmatpush1.bf16.msra.mxu0 %v4116_v32  ;;  %v2291_v32 = vrot.slane %v2153_v31, %v3968_v11 }
 0x68f   :  { %2609 = vmatprep.subr.bf16.mxu0 %v4120_v35  ;;  %v2295_v35 = vrot.slane %v2153_v31, %v3978_v16 }
 0x690   :  { %3376 = vmatpush3.bf16.msra.mxu1 %v3560_v10 }
 0x691   :  { %3377 = vmatprep.subr.bf16.mxu1 %v3794_v0 }
 0x692   :  { %2610 = vmatpush1.bf16.msra.mxu0 %v4123_v37 }
 0x693   :  { %2611 = vmatprep.subr.bf16.mxu0 %v4127_v40 }
 0x694   :  { %3378 = vmatpush3.bf16.msra.mxu1 %v3561_v12 }
 0x695   :  { %3379 = vmatprep.subr.bf16.mxu1 %v3794_v0 }
 0x696   :  { %2612 = vmatpush1.bf16.msra.mxu0 %v4130_v41 }
 0x697   :  { %2613 = vmatprep.subr.bf16.mxu0 %v4134_v44 }
 0x698   :  { %3380 = vmatpush3.bf16.msra.mxu1 %v3562_v14 }
 0x699   :  { %3381 = vmatprep.subr.bf16.mxu1 %v3794_v0 }
 0x69a   :  { %2614 = vmatpush1.bf16.msra.mxu0 %v4137_v46 }
 0x69b   :  { %3387 = vmatprep.subr.bf16.mxu0 %v3794_v0 }
 0x69c   :  { %3382 = vmatpush3.bf16.msra.mxu1 %v3563_v28 }
 0x73d   :  { %v2337_v37 = vpop.f32.mrf.mxu0  ;;  %v2378_v40 = vpop.f32.mrf.mxu1 }
 0x73e   :  { %v2338_v41 = vadd.f32 %v2337_v37, %v2291_v32  ;;  %v2379_v58 = vadd.f32 %v2378_v40, %v2299_v56  ;;  %v3108_v56 = vld [vmem:[%s4319_s7] ss:$0 sm:$0xff] }
 0x73f   :  { %v2339_v44 = vpop.f32.mrf.mxu0  ;;  %v3365_v46 = vpop.f32.mrf.mxu1 }
 0x740   :  { %v2385_v15 = vrot.slane %v2338_v41, 2  ;;  %v2340_v26 = vadd.f32 %v2339_v44, %v2295_v35  ;;  %v2405_v60 = vrot.slane %v2379_v58, 2  ;;  %v2595_v46 = vrot.slane %v2451_v23, %v3988_v54 }
 0x741   :  { %v2341_v27 = vpop.f32.mrf.mxu0  ;;  %v2381_v30 = vpop.f32.mrf.mxu1 }
 0x742   :  { %v2387_v36 = vadd.f32 %v2385_v15, %v3980_v18  ;;  %v2395_v48 = vrot.slane %v2340_v26, 2 }
 0x743   :  { %v2342_v39 = vpop.f32.mrf.mxu0  ;;  %v3366_v42 = vpop.f32.mrf.mxu1 }
 0x744   :  { %v3080_v45 = vmul.f32 -1.442695, %v2387_v36  ;;  %v2397_v51 = vadd.f32 %v2395_v48, %v3985_v33 }
 0x746   :  { %3632 = vpow2.f32 %v3080_v45  ;;  %v3081_v52 = vmul.f32 -1.442695, %v2397_v51 }
 0x748   :  { %3634 = vpow2.f32 %v3081_v52 }
 0x753   :  { %v3633_v53 = vpop.eup %3632 }
 0x754   :  { %v2391_v55 = vadd.f32 1.0, %v3633_v53 }
 0x755   :  { %v3635_v57 = vpop.eup %3634 }
 0x756   :  { %3636 = vrcp.f32 %v2391_v55  ;;  %v2401_v59 = vadd.f32 1.0, %v3635_v57 }
 0x758   :  { %3638 = vrcp.f32 %v2401_v59 }
 0x763   :  { %v3637_v62 = vpop.eup %3636 }
 0x764   :  { %v2407_v2 = vmul.f32 %v3637_v62, %v2405_v60 }
 0x765   :  { %v3639_v7 = vpop.eup %3638 }
 0x766   :  { %v2408_v3 = vadd.f32 %v2407_v2, %v3992_v61  ;;  %v2410_v5 = vsub.f32 1.0, %v3639_v7  ;;  %v2415_v43 = vmul.f32 %v3639_v7, %v2413_v13 }
 0x768   :  { %3640 = vtanh.f32 %v2408_v3 }
 0x775   :  { %v3641_v29 = vpop.eup %3640 }
 0x776   :  { %v2411_v38 = vmul.f32 %v3641_v29, %v2410_v5 }
 0x778   :  { %v4279_v47 = vadd.f32 %v2415_v43, %v2411_v38 }
 0x77a   :  { %2417 = vst [vmem:[#allocation12] sm:$0x40] %v4279_v47  ;;  %v2418_v63 = vpack.c.bf16 %v4279_v47, %v4279_v47 }
 0x77c   :  { %v2453_v49 = vrot.slane %v2418_v63, 3 }
 0x77e   :  { %2632 = vmatmul.mubr.bf16.vlgmr.msra.gmra.mxu0 %v2453_v49  ;;  %3384 = vmatmul.mubr.bf16.vlgmr.msra.gmra.mxu1 %v2453_v49 }
 0x77f   :  { %3403 = vmatprep.mubr.msk.bf16.mxu0 %vm3796_vm0, %v3794_v0  ;;  %3388 = vmatpush3.bf16.msra.mxu0 %v3564_v8 }
 0x780   :  { %3389 = vmatprep.subr.bf16.mxu0 %v3794_v0 }
 0x783   :  { %3390 = vmatpush3.bf16.msra.mxu0 %v3565_v24 }
 0x784   :  { %3391 = vmatprep.subr.bf16.mxu0 %v3794_v0 }
 0x787   :  { %3392 = vmatpush3.bf16.msra.mxu0 %v3566_v17 }
 0x788   :  { %3393 = vmatprep.subr.bf16.mxu0 %v3794_v0 }
 0x78b   :  { %3394 = vmatpush3.bf16.msra.mxu0 %v3567_v19 }
 0x78c   :  { %3395 = vmatprep.subr.bf16.mxu0 %v3794_v0 }
 0x78f   :  { %3396 = vmatpush3.bf16.msra.mxu0 %v3568_v34 }
 0x790   :  { %3397 = vmatprep.subr.bf16.mxu0 %v3794_v0 }
 0x793   :  { %3398 = vmatpush3.bf16.msra.mxu0 %v3569_v20 }
 0x794   :  { %3399 = vmatprep.subr.bf16.mxu0 %v3794_v0 }
 0x797   :  { %3400 = vmatpush3.bf16.msra.mxu0 %v3570_v21 }
 0x798   :  { %3401 = vmatprep.subr.bf16.mxu0 %v3794_v0 }
 0x79b   :  { %3402 = vmatpush3.bf16.msra.mxu0 %v3571_v22 }
 0x83e   :  { %v2633_v1 = vpop.f32.mrf.mxu0  ;;  %v2674_v6 = vpop.f32.mrf.mxu1 }
 0x83f   :  { %v2634_v9 = vadd.f32 %v2633_v1, %v2587_v25  ;;  %v2675_v26 = vadd.f32 %v2674_v6, %v2595_v46 }
 0x840   :  { %v2635_v50 = vpop.f32.mrf.mxu0  ;;  %v3385_v10 = vpop.f32.mrf.mxu1 }
 0x841   :  { %v2681_v12 = vrot.slane %v2634_v9, 1  ;;  %v2636_v14 = vadd.f32 %v2635_v50, %v2591_v4  ;;  %v2701_v30 = vrot.slane %v2675_v26, 1 }
 0x842   :  { %v2637_v28 = vpop.f32.mrf.mxu0  ;;  %v2677_v31 = vpop.f32.mrf.mxu1 }
 0x843   :  { %v2683_v0 = vadd.f32 %v2681_v12, %v3980_v18  ;;  %v2691_v40 = vrot.slane %v2636_v14, 1 }
 0x844   :  { %v2638_v32 = vpop.f32.mrf.mxu0  ;;  %v3386_v35 = vpop.f32.mrf.mxu1 }
 0x845   :  { %v3106_v37 = vmul.f32 -1.442695, %v2683_v0  ;;  %v2693_v11 = vadd.f32 %v2691_v40, %v3985_v33  ;;  %v2709_v33 = vrot.slane %v4279_v47, 7 }
 0x847   :  { %3642 = vpow2.f32 %v3106_v37  ;;  %v3107_v41 = vmul.f32 -1.442695, %v2693_v11 }
 0x849   :  { %3644 = vpow2.f32 %v3107_v41 }
 0x854   :  { %v3643_v16 = vpop.eup %3642 }
 0x855   :  { %v2687_v44 = vadd.f32 1.0, %v3643_v16 }
 0x856   :  { %v3645_v15 = vpop.eup %3644 }
 0x857   :  { %3646 = vrcp.f32 %v2687_v44  ;;  %v2697_v27 = vadd.f32 1.0, %v3645_v15 }
 0x859   :  { %3648 = vrcp.f32 %v2697_v27 }
 0x864   :  { %v3647_v36 = vpop.eup %3646 }
 0x865   :  { %v2703_v18 = vmul.f32 %v3647_v36, %v2701_v30 }
 0x866   :  { %v3649_v42 = vpop.eup %3648 }
 0x867   :  { %v2704_v39 = vadd.f32 %v2703_v18, %v3992_v61  ;;  %v2706_v45 = vsub.f32 1.0, %v3649_v42  ;;  %v2711_v52 = vmul.f32 %v3649_v42, %v2709_v33 }
 0x869   :  { %3650 = vtanh.f32 %v2704_v39 }
 0x876   :  { %v3651_v48 = vpop.eup %3650 }
 0x877   :  { %v2707_v51 = vmul.f32 %v3651_v48, %v2706_v45 }
 0x879   :  { %v2712_v53 = vadd.f32 %v2711_v52, %v2707_v51 }
 0x87b   :  { %2713 = vst [vmem:[#allocation12] sm:$0x80] %v2712_v53  ;;  %2714 = vst [vmem:[#allocation2 - $0x7] sm:$0x80] %v2712_v53 }
 0x882   :  { %v2715_v54 = vld [vmem:[#allocation12] sm:$0xff] }
 0x883   :  { %v2716_v55 = vpack.c.bf16 %v2715_v54, %v2715_v54 }
 0x885   :  { %3404 = vmatmul.mubr.bf16.vlgmr.msra.gmra.mxu0 %v2716_v55 }
 0x945   :  { %v2822_v57 = vpop.f32.mrf.mxu0 }
 0x946   :  { %v2823_v61 = vadd.f32 %v3108_v56, %v2822_v57 }
 0x947   :  { %v3405_v58 = vpop.f32.mrf.mxu0 }
 0x948   :  { %2833 = vmax.xlane.f32.xlu0 %v2823_v61 }
 0x949   :  { %v2825_v59 = vpop.f32.mrf.mxu0 }
 0x94b   :  { %v3406_v60 = vpop.f32.mrf.mxu0 }
 0x9d1   :  { %v2834_v62 = vpop.xlane.xlu0 %2833 }
 0x9d2   :  { %v2835_v2 = vsub.f32 %v2823_v61, %v2834_v62 }
 0x9d4   :  { %v2836_v3 = vmul.f32 1.442695, %v2835_v2 }
 0x9d6   :  { %3652 = vpow2.f32 %v2836_v3 }
 0x9e3   :  { %v3653_v7 = vpop.eup %3652 }
 0x9e4   :  { %2838 = vadd.xlane.f32.xlu0 %v3653_v7 }
 0x9e5   :  { %3747 = shalt.err (!%p3744_p10)
}
 0x9e6   :  { %2864 = dma.vmem_to_hbm [thread:$0]  %s2862_s27, 128, %s4321_s9, [#allocation13]  }
 0x9e7   :  { %s3798_s29 = smov [#allocation11]  }
 0x9e8   :  { %s2851_s30 = sshll.u32 %s3798_s29, 4  ;;  %s2852_s30 = int_to_ptr.vmem [resolvable:$true] %s2851_s30 }
 0x9e9   :  { %s3756_s3 = scalar_lea.vmem %s2852_s30, 128  ;;  %p3761_p12 = scmp.lt.s32.totalorder %s2852_s30, %s2852_s30 }
 0x9ea   :  { %p3757_p11 = scmp.ne.s32.totalorder %s2852_s30, %s3756_s3  ;;  %p3762_p13 = scmp.lt.s32.totalorder %s3756_s3, %s3756_s3 }
 0x9ec   :  { %p3763_p0 = por %p3762_p13, %p3761_p12 }
 0x9ee   :  { %p3764_p1 = pnand %p3763_p0, %p3757_p11 }
 0xa6d   :  { %v2839_v5 = vpop.xlane.xlu0 %2838 }
 0xa6e   :  { %3654 = vlog2.f32 %v2839_v5 }
 0xa7b   :  { %v3655_v13 = vpop.eup %3654 }
 0xa7c   :  { %v2841_v29 = vmul.f32 0.6931472, %v3655_v13 }
 0xa7e   :  { %v2842_v38 = vadd.f32 %v2841_v29, %v2834_v62 }
 0xa80   :  { %v2843_v43 = vsub.f32 %v2823_v61, %v2842_v38 }
 0xa82   :  { %2844 = vst [vmem:[#allocation11] sm:$0xff] %v2843_v43 }
 0xa83   :  { %3767 = shalt.err (!%p3764_p1)
}
 0xa84   :  { %2854 = dma.vmem_to_hbm [thread:$0]  %s2852_s30, 128, %s4320_s8, [#allocation5]  }
 0xa85   :  { %3782 = dma.done.wait [#allocation5], 128  }
 0xa86   :  { %3783 = vsyncadd [#allocation5], 4294967168 }
 0xa87   :  { %3784 = dma.done.wait [#allocation13], 128  }
 0xa88   :  { %3785 = vsyncadd [#allocation13], 4294967168 }
 0xa89   :  { %2871 = vsyncpa [#allocation4], 1 }
 0xa8a   :  { %2872 = vsyncpa [#allocation7], 1 }
 0xa8b   :  { %2873 = vsyncpa [#allocation10], 1 }
 0xa8c   :  { %2874 = vsyncpa [#allocation5], 1 }
 0xa8d   :  { %2875 = vsyncpa [#allocation13], 1 }

</bundles_post_ra>
